<compile_context>
chip_gen: v7x
topology: tpu7x:2x2x1
jax: 0.10.0
libtpu: 0.0.40
codegen_flags: <defaults>
</compile_context>

<pallas_src>
import functools

import jax
import jax.numpy as jnp
from jax import lax
from jax.experimental import pallas as pl
from jax.experimental.pallas import tpu as pltpu


def _round_up(x, m):
    return (x + m - 1) // m * m


# ----------------------------- kernels ------------------------------------- #

def _noisy_linear_train_kernel(x_ref, wmu_ref, wsig_ref, eps_out_ref, eps_in_ref,
                               bmu_ref, bsig_ref, beps_ref, o_ref, acc_ref):
    k = pl.program_id(2)

    @pl.when(k == 0)
    def _():
        acc_ref[...] = jnp.zeros_like(acc_ref)

    # Rank-1 reconstruction of the weight_epsilon tile on the VPU
    # (saves a full (out, in) HBM read per call).
    w_eps = eps_out_ref[...] * eps_in_ref[...]          # (tn, 1) * (1, tk) -> (tn, tk)
    w_eff = wmu_ref[...] + wsig_ref[...] * w_eps        # (tn, tk)

    # x @ w_eff.T without materializing a transpose: contract dim 1 of both.
    acc_ref[...] += lax.dot_general(
        x_ref[...], w_eff,
        dimension_numbers=(((1,), (1,)), ((), ())),
        preferred_element_type=jnp.float32)

    @pl.when(k == pl.num_programs(2) - 1)
    def _():
        b_eff = bmu_ref[...] + bsig_ref[...] * beps_ref[...]   # (1, tn)
        o_ref[...] = (acc_ref[...] + b_eff).astype(o_ref.dtype)


def _noisy_linear_eval_kernel(x_ref, wmu_ref, bmu_ref, o_ref, acc_ref):
    k = pl.program_id(2)

    @pl.when(k == 0)
    def _():
        acc_ref[...] = jnp.zeros_like(acc_ref)

    acc_ref[...] += lax.dot_general(
        x_ref[...], wmu_ref[...],
        dimension_numbers=(((1,), (1,)), ((), ())),
        preferred_element_type=jnp.float32)

    @pl.when(k == pl.num_programs(2) - 1)
    def _():
        o_ref[...] = (acc_ref[...] + bmu_ref[...]).astype(o_ref.dtype)


# ----------------------------- wrapper -------------------------------------- #

def _pick_tiles(B, K, N):
    # Batch tile on sublanes; K/N tiles multiples of 128 on lanes, capped at 512
    # so 2 weight inputs x 2 pipeline buffers x (512x512 f32) = 4 MiB stays well
    # inside the default scoped VMEM on every generation (incl. v7x's 64 MiB).
    tb = min(_round_up(B, 8), 128)
    tk = min(_round_up(K, 128), 512)
    tn = min(_round_up(N, 128), 512)
    return tb, tk, tn


@functools.partial(jax.jit, static_argnames=("training",))
def noisy_linear_forward(x, params, training=True):
    """Pallas implementation of NoisyLinear.forward.

    x: (B, in_features) float32
    params: dict with weight_mu/weight_sigma (out, in), bias_mu/bias_sigma (out,),
            and the factored noise eps_in (in,), eps_out (out,)
            (weight_epsilon == outer(eps_out, eps_in), bias_epsilon == eps_out).
    """
    B, K = x.shape
    N = params["weight_mu"].shape[0]
    dtype = x.dtype

    tb, tk, tn = _pick_tiles(B, K, N)
    Bp, Kp, Np = _round_up(B, tb), _round_up(K, tk), _round_up(N, tn)

    # Zero-pad to tile multiples (padded K contributes 0 to the dot; padded
    # B/N rows/cols are sliced off below). Keeps output stores lane-dense.
    xp = jnp.pad(x, ((0, Bp - B), (0, Kp - K)))
    wmu = jnp.pad(params["weight_mu"], ((0, Np - N), (0, Kp - K)))
    bmu = jnp.pad(params["bias_mu"], (0, Np - N)).reshape(1, Np)

    grid = (Bp // tb, Np // tn, Kp // tk)

    x_spec = pl.BlockSpec((tb, tk), lambda i, j, k: (i, k))
    w_spec = pl.BlockSpec((tn, tk), lambda i, j, k: (j, k))
    col_n_spec = pl.BlockSpec((tn, 1), lambda i, j, k: (j, 0))
    row_k_spec = pl.BlockSpec((1, tk), lambda i, j, k: (0, k))
    row_n_spec = pl.BlockSpec((1, tn), lambda i, j, k: (0, j))
    out_spec = pl.BlockSpec((tb, tn), lambda i, j, k: (i, j))

    compiler_params = pltpu.CompilerParams(
        dimension_semantics=("parallel", "parallel", "arbitrary"))

    if training:
        wsig = jnp.pad(params["weight_sigma"], ((0, Np - N), (0, Kp - K)))
        eps_out_col = jnp.pad(params["eps_out"], (0, Np - N)).reshape(Np, 1)
        eps_in_row = jnp.pad(params["eps_in"], (0, Kp - K)).reshape(1, Kp)
        bsig = jnp.pad(params["bias_sigma"], (0, Np - N)).reshape(1, Np)
        beps = jnp.pad(params["eps_out"], (0, Np - N)).reshape(1, Np)  # bias_epsilon == eps_out

        yp = pl.pallas_call(
            _noisy_linear_train_kernel,
            out_shape=jax.ShapeDtypeStruct((Bp, Np), dtype),
            grid_spec=pltpu.PrefetchScalarGridSpec(
                num_scalar_prefetch=0,
                grid=grid,
                in_specs=[x_spec, w_spec, w_spec, col_n_spec, row_k_spec,
                          row_n_spec, row_n_spec, row_n_spec],
                out_specs=out_spec,
                scratch_shapes=[pltpu.VMEM((tb, tn), jnp.float32)]),
            compiler_params=compiler_params,
        )(xp, wmu, wsig, eps_out_col, eps_in_row, bmu, bsig, beps)
    else:
        yp = pl.pallas_call(
            _noisy_linear_eval_kernel,
            out_shape=jax.ShapeDtypeStruct((Bp, Np), dtype),
            grid_spec=pltpu.PrefetchScalarGridSpec(
                num_scalar_prefetch=0,
                grid=grid,
                in_specs=[x_spec, w_spec, row_n_spec],
                out_specs=out_spec,
                scratch_shapes=[pltpu.VMEM((tb, tn), jnp.float32)]),
            compiler_params=compiler_params,
        )(xp, wmu, bmu)

    return yp[:B, :N]


# ----------------------------- init / reference ----------------------------- #

def _scale_noise(key, size):
    # torch: x.sign() * x.abs().sqrt() with x ~ N(0, 1)
    x = jax.random.normal(key, (size,), dtype=jnp.float32)
    return jnp.sign(x) * jnp.sqrt(jnp.abs(x))


def init_noisy_linear(key, in_features, out_features, std_init=0.5):
    """Re-implementation of reset_parameters() + reset_noise().

    Noise is stored in factored form (eps_in, eps_out); the kernel relies on
    weight_epsilon == outer(eps_out, eps_in), which reset_noise() guarantees.
    """
    # TODO(synk): if a user overwrites weight_epsilon with a non-rank-1 buffer,
    # the factored in-kernel reconstruction no longer applies.
    k_wmu, k_bmu, k_ein, k_eout = jax.random.split(key, 4)
    mu_range = 1.0 / jnp.sqrt(jnp.float32(in_features))

    weight_mu = jax.random.uniform(k_wmu, (out_features, in_features),
                                   minval=-mu_range, maxval=mu_range,
                                   dtype=jnp.float32)
    weight_sigma = jnp.full((out_features, in_features),
                            std_init / jnp.sqrt(jnp.float32(in_features)),
                            dtype=jnp.float32)
    bias_mu = jax.random.uniform(k_bmu, (out_features,),
                                 minval=-mu_range, maxval=mu_range,
                                 dtype=jnp.float32)
    bias_sigma = jnp.full((out_features,),
                          std_init / jnp.sqrt(jnp.float32(out_features)),
                          dtype=jnp.float32)

    eps_in = _scale_noise(k_ein, in_features)
    eps_out = _scale_noise(k_eout, out_features)

    return {
        "weight_mu": weight_mu,
        "weight_sigma": weight_sigma,
        "bias_mu": bias_mu,
        "bias_sigma": bias_sigma,
        "eps_in": eps_in,
        "eps_out": eps_out,
    }


def _reference_forward(x, params, training=True):
    if training:
        weight_epsilon = jnp.outer(params["eps_out"], params["eps_in"])
        bias_epsilon = params["eps_out"]
        w = params["weight_mu"] + params["weight_sigma"] * weight_epsilon
        b = params["bias_mu"] + params["bias_sigma"] * bias_epsilon
    else:
        w = params["weight_mu"]
        b = params["bias_mu"]
    return x @ w.T + b


# ----------------------------- demo / self-test ------------------------------ #

if __name__ == "__main__":
    key = jax.random.PRNGKey(0)
    k_p1, k_x1, k_p2, k_x2 = jax.random.split(key, 4)

    # Case 1: aligned shapes that exercise the K-tiled accumulation path
    # (grid K dim = 2 with the 512 tile cap).
    B1, in1, out1 = 16, 1024, 512
    params1 = init_noisy_linear(k_p1, in1, out1, std_init=0.5)
    x1 = jax.random.normal(k_x1, (B1, in1), dtype=jnp.float32)

    y1_train = jax.block_until_ready(noisy_linear_forward(x1, params1, training=True))
    y1_eval = jax.block_until_ready(noisy_linear_forward(x1, params1, training=False))

    ref1_train = _reference_forward(x1, params1, training=True)
    ref1_eval = _reference_forward(x1, params1, training=False)
    assert jnp.allclose(y1_train, ref1_train, atol=1e-3, rtol=1e-3), "train mismatch (case 1)"
    assert jnp.allclose(y1_eval, ref1_eval, atol=1e-3, rtol=1e-3), "eval mismatch (case 1)"

    # Case 2: small unaligned shapes exercising the padding path.
    B2, in2, out2 = 3, 40, 72
    params2 = init_noisy_linear(k_p2, in2, out2, std_init=0.5)
    x2 = jax.random.normal(k_x2, (B2, in2), dtype=jnp.float32)

    y2_train = jax.block_until_ready(noisy_linear_forward(x2, params2, training=True))
    ref2_train = _reference_forward(x2, params2, training=True)
    assert y2_train.shape == (B2, out2)
    assert jnp.allclose(y2_train, ref2_train, atol=1e-3, rtol=1e-3), "train mismatch (case 2)"

    print("KERNEL_OK")
</pallas_src>

<mosaic_0001>
module attributes {stable_mosaic.version = 11 : i64} {
  func.func @_noisy_linear_train_kernel(%arg0: i32, %arg1: i32, %arg2: i32, %arg3: memref<16x512xf32, #tpu.memory_space<vmem>>, %arg4: memref<512x512xf32, #tpu.memory_space<vmem>>, %arg5: memref<512x512xf32, #tpu.memory_space<vmem>>, %arg6: memref<512x1xf32, #tpu.memory_space<vmem>>, %arg7: memref<1x512xf32, #tpu.memory_space<vmem>>, %arg8: memref<1x512xf32, #tpu.memory_space<vmem>>, %arg9: memref<1x512xf32, #tpu.memory_space<vmem>>, %arg10: memref<1x512xf32, #tpu.memory_space<vmem>>, %arg11: memref<16x512xf32, #tpu.memory_space<vmem>>, %arg12: memref<16x512xf32, #tpu.memory_space<vmem>>) attributes {dimension_semantics = [#tpu.dimension_semantics<parallel>, #tpu.dimension_semantics<parallel>, #tpu.dimension_semantics<arbitrary>], iteration_bounds = array<i64: 1, 1, 2>, scalar_prefetch = 0 : i64, scratch_operands = 1 : i64, tpu.core_type = #tpu.core_type<tc>, window_params = [{transform_indices = @transform_0, window_bounds = array<i64: 16, 512>}, {transform_indices = @transform_1, window_bounds = array<i64: 512, 512>}, {transform_indices = @transform_2, window_bounds = array<i64: 512, 512>}, {transform_indices = @transform_3, window_bounds = array<i64: 512, 1>}, {transform_indices = @transform_4, window_bounds = array<i64: 1, 512>}, {transform_indices = @transform_5, window_bounds = array<i64: 1, 512>}, {transform_indices = @transform_6, window_bounds = array<i64: 1, 512>}, {transform_indices = @transform_7, window_bounds = array<i64: 1, 512>}, {transform_indices = @transform_8, window_bounds = array<i64: 16, 512>}]} {
    %c0_i32 = arith.constant 0 : i32
    %0 = arith.cmpi eq, %arg2, %c0_i32 : i32
    %1 = arith.extui %0 : i1 to i32
    %c0_i32_0 = arith.constant 0 : i32
    %2 = arith.cmpi ne, %1, %c0_i32_0 : i32
    scf.if %2 {
      %cst_15 = arith.constant 0.000000e+00 : f32
      %20 = vector.broadcast %cst_15 : f32 to vector<16x512xf32>
      %c0_16 = arith.constant 0 : index
      %c0_17 = arith.constant 0 : index
      %21 = vector.load %arg12[%c0_16, %c0_17] : memref<16x512xf32, #tpu.memory_space<vmem>>, vector<16x512xf32>
      tpu.vector_store %arg12[%c0_16, %c0_17], %20 {strides = array<i32>} : memref<16x512xf32, #tpu.memory_space<vmem>>, vector<16x512xf32>,
    } else {
    }
    %c0 = arith.constant 0 : index
    %c0_1 = arith.constant 0 : index
    %3 = vector.load %arg6[%c0, %c0_1] : memref<512x1xf32, #tpu.memory_space<vmem>>, vector<512x1xf32>
    %c0_2 = arith.constant 0 : index
    %c0_3 = arith.constant 0 : index
    %4 = vector.load %arg7[%c0_2, %c0_3] : memref<1x512xf32, #tpu.memory_space<vmem>>, vector<1x512xf32>
    %5 = vector.broadcast %3 : vector<512x1xf32> to vector<512x512xf32>
    %6 = vector.broadcast %4 : vector<1x512xf32> to vector<512x512xf32>
    %7 = arith.mulf %5, %6 : vector<512x512xf32>
    %c0_4 = arith.constant 0 : index
    %c0_5 = arith.constant 0 : index
    %8 = vector.load %arg4[%c0_4, %c0_5] : memref<512x512xf32, #tpu.memory_space<vmem>>, vector<512x512xf32>
    %c0_6 = arith.constant 0 : index
    %c0_7 = arith.constant 0 : index
    %9 = vector.load %arg5[%c0_6, %c0_7] : memref<512x512xf32, #tpu.memory_space<vmem>>, vector<512x512xf32>
    %10 = arith.mulf %9, %7 : vector<512x512xf32>
    %11 = arith.addf %8, %10 : vector<512x512xf32>
    %c0_8 = arith.constant 0 : index
    %c0_9 = arith.constant 0 : index
    %12 = vector.load %arg12[%c0_8, %c0_9] : memref<16x512xf32, #tpu.memory_space<vmem>>, vector<16x512xf32>
    %c0_10 = arith.constant 0 : index
    %c0_11 = arith.constant 0 : index
    %13 = vector.load %arg3[%c0_10, %c0_11] : memref<16x512xf32, #tpu.memory_space<vmem>>, vector<16x512xf32>
    %cst = arith.constant dense<0.000000e+00> : vector<16x512xf32>
    %14 = tpu.matmul %13, %11, %cst {dimension_numbers = #tpu.dot_dimension_numbers<[1], [1], [0], [0], [0, 0, 1, 0], [], []>} : vector<16x512xf32>, vector<512x512xf32>, vector<16x512xf32> -> vector<16x512xf32>
    %15 = arith.addf %12, %14 : vector<16x512xf32>
    %c0_12 = arith.constant 0 : index
    %c0_13 = arith.constant 0 : index
    %16 = vector.load %arg12[%c0_12, %c0_13] : memref<16x512xf32, #tpu.memory_space<vmem>>, vector<16x512xf32>
    tpu.vector_store %arg12[%c0_12, %c0_13], %15 {strides = array<i32>} : memref<16x512xf32, #tpu.memory_space<vmem>>, vector<16x512xf32>,
    %c1_i32 = arith.constant 1 : i32
    %17 = arith.cmpi eq, %arg2, %c1_i32 : i32
    %18 = arith.extui %17 : i1 to i32
    %c0_i32_14 = arith.constant 0 : i32
    %19 = arith.cmpi ne, %18, %c0_i32_14 : i32
    scf.if %19 {
      %c0_15 = arith.constant 0 : index
      %c0_16 = arith.constant 0 : index
      %20 = vector.load %arg8[%c0_15, %c0_16] : memref<1x512xf32, #tpu.memory_space<vmem>>, vector<1x512xf32>
      %c0_17 = arith.constant 0 : index
      %c0_18 = arith.constant 0 : index
      %21 = vector.load %arg9[%c0_17, %c0_18] : memref<1x512xf32, #tpu.memory_space<vmem>>, vector<1x512xf32>
      %c0_19 = arith.constant 0 : index
      %c0_20 = arith.constant 0 : index
      %22 = vector.load %arg10[%c0_19, %c0_20] : memref<1x512xf32, #tpu.memory_space<vmem>>, vector<1x512xf32>
      %23 = arith.mulf %21, %22 : vector<1x512xf32>
      %24 = arith.addf %20, %23 : vector<1x512xf32>
      %c0_21 = arith.constant 0 : index
      %c0_22 = arith.constant 0 : index
      %25 = vector.load %arg12[%c0_21, %c0_22] : memref<16x512xf32, #tpu.memory_space<vmem>>, vector<16x512xf32>
      %26 = vector.broadcast %24 : vector<1x512xf32> to vector<16x512xf32>
      %27 = arith.addf %25, %26 : vector<16x512xf32>
      %c0_23 = arith.constant 0 : index
      %c0_24 = arith.constant 0 : index
      %28 = vector.load %arg11[%c0_23, %c0_24] : memref<16x512xf32, #tpu.memory_space<vmem>>, vector<16x512xf32>
      tpu.vector_store %arg11[%c0_23, %c0_24], %27 {strides = array<i32>} : memref<16x512xf32, #tpu.memory_space<vmem>>, vector<16x512xf32>,
    } else {
    }
    return
  }
  func.func @transform_0(%arg0: i32, %arg1: i32, %arg2: i32) -> (i32, i32) {
    %c0_i32 = arith.constant 0 : i32
    return %arg0, %arg2 : i32, i32
  }
  func.func @transform_1(%arg0: i32, %arg1: i32, %arg2: i32) -> (i32, i32) {
    %c0_i32 = arith.constant 0 : i32
    return %arg1, %arg2 : i32, i32
  }
  func.func @transform_2(%arg0: i32, %arg1: i32, %arg2: i32) -> (i32, i32) {
    %c0_i32 = arith.constant 0 : i32
    return %arg1, %arg2 : i32, i32
  }
  func.func @transform_3(%arg0: i32, %arg1: i32, %arg2: i32) -> (i32, i32) {
    %c0_i32 = arith.constant 0 : i32
    %c0_i32_0 = arith.constant 0 : i32
    return %arg1, %c0_i32 : i32, i32
  }
  func.func @transform_4(%arg0: i32, %arg1: i32, %arg2: i32) -> (i32, i32) {
    %c0_i32 = arith.constant 0 : i32
    %c0_i32_0 = arith.constant 0 : i32
    return %c0_i32, %arg2 : i32, i32
  }
  func.func @transform_5(%arg0: i32, %arg1: i32, %arg2: i32) -> (i32, i32) {
    %c0_i32 = arith.constant 0 : i32
    %c0_i32_0 = arith.constant 0 : i32
    return %c0_i32, %arg1 : i32, i32
  }
  func.func @transform_6(%arg0: i32, %arg1: i32, %arg2: i32) -> (i32, i32) {
    %c0_i32 = arith.constant 0 : i32
    %c0_i32_0 = arith.constant 0 : i32
    return %c0_i32, %arg1 : i32, i32
  }
  func.func @transform_7(%arg0: i32, %arg1: i32, %arg2: i32) -> (i32, i32) {
    %c0_i32 = arith.constant 0 : i32
    %c0_i32_0 = arith.constant 0 : i32
    return %c0_i32, %arg1 : i32, i32
  }
  func.func @transform_8(%arg0: i32, %arg1: i32, %arg2: i32) -> (i32, i32) {
    %c0_i32 = arith.constant 0 : i32
    return %arg0, %arg1 : i32, i32
  }
}

</mosaic_0001>

<bundles_post_ra>
// kernel: noisy_linear_forward.1
= control target key start
LH: loop header
LB: loop body
LE: loop exit
PB: predicated region body
PF: predicated region fallthrough
CT: control target
= control target key end

     0   :  { %s6424_s0 = inlined_call_operand.hbm [shape: f32[16,1024], index: 0, kind: input, shape index: {}]   ;;  %s6425_s1 = inlined_call_operand.hbm [shape: f32[512,1024], index: 1, kind: input, shape index: {}]   ;;  %s6426_s2 = inlined_call_operand.hbm [shape: f32[512,1024], index: 2, kind: input, shape index: {}]   ;;  %s6427_s3 = inlined_call_operand.vmem [shape: f32[512,1], index: 3, kind: input, shape index: {}]   ;;  %s6428_s4 = inlined_call_operand.hbm [shape: f32[1,1024], index: 4, kind: input, shape index: {}]   ;;  %s6429_s5 = inlined_call_operand.hbm [shape: f32[1,512], index: 5, kind: input, shape index: {}]   ;;  %s6430_s6 = inlined_call_operand.hbm [shape: f32[1,512], index: 6, kind: input, shape index: {}]   ;;  %s6431_s7 = inlined_call_operand.hbm [shape: f32[1,512], index: 7, kind: input, shape index: {}]   ;;  %s6432_s8 = inlined_call_operand.hbm [shape: f32[16,512], index: 8, kind: output, shape index: {}]  }
   0x1   :  { %6501 = sst [smem:[#allocation132_spill]] %s6425_s1 }
   0x2   :  { %6502 = sst [smem:[#allocation133_spill]] %s6427_s3 }
   0x3   :  { %6503 = sst [smem:[#allocation134_spill]] %s6429_s5 }
   0x4   :  { %6504 = sst [smem:[#allocation135_spill]] %s6430_s6 }
   0x5   :  { %6505 = sst [smem:[#allocation136_spill]] %s6432_s8 }
   0x6   :  { %13 = vsyncpa [#allocation4], 0 }
   0x7   :  { %15 = vsyncpa [#allocation4 + $0x1], 0 }
   0x8   :  { %16 = vsyncpa [#allocation7], 0 }
   0x9   :  { %18 = vsyncpa [#allocation7 + $0x1], 0 }
   0xa   :  { %19 = vsyncpa [#allocation10], 0 }
   0xb   :  { %21 = vsyncpa [#allocation10 + $0x1], 0 }
   0xc   :  { %22 = vsyncpa [#allocation13], 0 }
   0xd   :  { %23 = vsyncpa [#allocation5], 0  ;;  %s3641_s27 = smov 0   ;;  %s3643_s28 = smov 0  }
   0xe   :  { %s3645_s29 = smov 0   ;;  %s3647_s30 = smov 0  }
   0xf   :  { %s3649_s9 = smov 0   ;;  %s3651_s10 = smov 0  }
  0x10 LB: > { %6506 = sst [smem:[#allocation22_spill]] %s3567_s29  ;;  %s3670_s11 = sadd.s32 4294967295, %s3579_s10   ;;  %s3579_s10 = sphi %s3651_s10, %s29_s10   ;;  %s3575_s9 = sphi %s3649_s9, %s6894_s9   ;;  %s3571_s30 = sphi %s3647_s30, %s6893_s30   ;;  %s3567_s29 = sphi %s3645_s29, %s6889_s29   ;;  %s3563_s28 = sphi %s3643_s28, %s6892_s28   ;;  %s3559_s27 = sphi %s3641_s27, %s6891_s27  }
  0x11   : > { %6507 = sst [smem:[#allocation23_spill]] %s3571_s30  ;;  %p64_p0 = scmp.ne.s32.totalorder %s3567_s29, %s3563_s28 }
  0x12   : > { %6508 = sst [smem:[#allocation24_spill]] %s3670_s11  ;;  %p65_p1 = scmp.eq.s32.totalorder %s3579_s10, 0 }
  0x13   : > { %p70_p2 = scmp.ne.s32.totalorder %s3563_s28, %s3559_s27  ;;  %p6433_p3 = scmp.eq.s32.totalorder %s3670_s11, 0 }
  0x14   : > { %p66_p4 = por %p65_p1, %p64_p0  ;;  %p2862_p5 = scmp.ge.s32.totalorder %s3579_s10, 1 }
  0x15   : > { %p3681_p6 = por %p6433_p3, %p70_p2  ;;  %p295_p7 = scmp.lt.s32.totalorder %s3579_s10, 3 }
  0x16   : > { %s3581_s15 = smov [#allocation11]   ;;  %p3212_p10 = scmp.lt.s32.totalorder %s3579_s10, 2 }
  0x17   : > { %s6509_s13 = scalar_select %p3681_p6, 1, 0 }
  0x18   : > { %p3686_p8 = pnand %p2862_p5, %p295_p7  ;;  %s320_s16 = sshll.u32 %s3581_s15, 4  ;;  %s321_s16 = int_to_ptr.vmem [resolvable:$true] %s320_s16 }
  0x19   : > { %6510 = sst [smem:[#allocation25_spill]] %s6509_s13  ;;  %p3699_p12 = pnand %p3212_p10, %p66_p4 }
  0x1a   : > { %s6511_s14 = scalar_select %p3686_p8, 1, 0 }
  0x1b   : > { %p3186_p9 = pneg %p3686_p8  ;;  %s3582_s19 = smov [#allocation12]  }
  0x1c   : > { %s6513_s18 = scalar_select %p3699_p12, 1, 0 }
  0x1d   : > { %p3695_p11 = pnand %p3186_p9, %p6433_p3  ;;  %s334_s20 = sshll.u32 %s3582_s19, 4  ;;  %s335_s20 = int_to_ptr.vmem [resolvable:$true] %s334_s20 }
  0x1e   : > { %s6514_s5 = sld [smem:[#allocation134_spill]] }
  0x1f   : > { %s6512_s17 = scalar_select %p3695_p11, 1, 0 }
  0x20   : > { %p3711_p0 = pneg %p3695_p11 }
  0x22   : > { %s6515_s26 = scalar_select %p3711_p0, 1, 0 }
  0x24   : > { %s3279_s23 = scalar_lea.hbm %s6514_s5, 64 }
  0x25   : > { %p3280_p13 = scmp.ne.s32.totalorder %s6514_s5, %s3279_s23  ;;  %p3286_p4 = scmp.lt.u32.totalorder %s3279_s23, %s6514_s5 }
  0x27   : > { %p3282_p1 = pnand %p3711_p0, %p3280_p13 }
  0x29   : > { %p3283_p2 = pneg %p3282_p1 }
  0x2b   : > { %p3288_p5 = pnand %p3286_p4, %p3283_p2 }
  0x2d   : > { %3291 = shalt.err (!%p3288_p5)
}
  0x2e   : > { %s3292_s19 = scalar_lea.vmem %s321_s16, 64  ;;  %p3300_p3 = scmp.lt.s32.totalorder %s321_s16, %s321_s16 }
  0x2f   : > { %p3293_p7 = scmp.ne.s32.totalorder %s321_s16, %s3292_s19  ;;  %p3301_p6 = scmp.lt.s32.totalorder %s3292_s19, %s3292_s19 }
  0x31   : > { %p3295_p9 = pnand %p3293_p7, %p3711_p0  ;;  %p3302_p8 = por %p3301_p6, %p3300_p3 }
  0x33   : > { %p3296_p10 = pneg %p3295_p9 }
  0x35   : > { %p3303_p12 = pnand %p3302_p8, %p3296_p10 }
  0x37   : > { %3306 = shalt.err (!%p3303_p12)
}
  0x38   : > { %3189 = dma.hbm_to_vmem [thread:$0]  (!%p3695_p11), %s6514_s5, 64, %s321_s16, [#allocation10]  }
  0x39   : > { %s41_s23 = sadd.s32 1, %s3575_s9  ;;  %s6516_s6 = sld [smem:[#allocation135_spill]] }
  0x3f   : > { %s3307_s27 = scalar_lea.hbm %s6516_s6, 64 }
  0x40   : > { %p3308_p3 = scmp.ne.s32.totalorder %s6516_s6, %s3307_s27  ;;  %p3314_p12 = scmp.lt.u32.totalorder %s3307_s27, %s6516_s6 }
  0x42   : > { %p3310_p6 = pnand %p3308_p3, %p3711_p0 }
  0x44   : > { %p3311_p8 = pneg %p3310_p6 }
  0x46   : > { %p3316_p13 = pnand %p3314_p12, %p3311_p8 }
  0x48   : > { %3319 = shalt.err (!%p3316_p13)
}
  0x49   : > { %s3320_s16 = scalar_lea.vmem %s335_s20, 64  ;;  %p3328_p5 = scmp.lt.s32.totalorder %s335_s20, %s335_s20 }
  0x4a   : > { %p3321_p1 = scmp.ne.s32.totalorder %s335_s20, %s3320_s16  ;;  %p3329_p7 = scmp.lt.s32.totalorder %s3320_s16, %s3320_s16 }
  0x4c   : > { %p3323_p2 = pnand %p3321_p1, %p3711_p0  ;;  %p3330_p9 = por %p3329_p7, %p3328_p5 }
  0x4e   : > { %p3324_p4 = pneg %p3323_p2 }
  0x50   : > { %p3331_p10 = pnand %p3330_p9, %p3324_p4 }
  0x52   : > { %3334 = shalt.err (!%p3331_p10)
}
  0x53   : > { %3192 = dma.hbm_to_vmem [thread:$0]  (!%p3695_p11), %s6516_s6, 64, %s335_s20, [#allocation13]  }
  0x54   : > { %p42_p3 = scmp.ge.s32.totalorder %s41_s23, 2  ;;  %s3747_s8 = sand.u32 1, %s3567_s29  }
  0x55   : > { %s3750_s22 = sshll.u32 %s3575_s9, 9  ;;  %s6440_s25 = sand.u32 1, %s3579_s10  }
  0x56   : > { %s6896_s23 = smov (%p42_p3, %s41_s23), 0  ;;  %s2871_s27 = sshll.u32 %s3747_s8, 11 }
  0x57   : > { %6517 = sst [smem:[#allocation26_spill]] %s6896_s23  ;;  %s53_s24 = ssub.s32 %s3575_s9, %s6896_s23 }
  0x58   : > { %p55_p6 = scmp.eq.s32.totalorder %s53_s24, 0  ;;  %s6518_s1 = sld [smem:[#allocation132_spill]] }
  0x59   : > { %s6519_s16 = sadd.s32 1, %s3567_s29  ;;  %s387_s21 = scalar_lea.vmem [#allocation6], %s2871_s27 }
  0x5a   : > { %s3767_s12 = scalar_select %p55_p6, %s3567_s29, %s6519_s16  }
  0x5b   : > { %s397_s5 = sshll.u32 %s387_s21, 4  ;;  %s411_s6 = scalar_lea.vmem [#allocation8], %s2871_s27  ;;  %s3769_s5 = int_to_ptr.vmem [resolvable:$true] %s397_s5 }
  0x5c   : > { %6520 = sst [smem:[#allocation27_spill]] %s3767_s12  ;;  %s421_s3 = sshll.u32 %s411_s6, 4  ;;  %s3771_s3 = int_to_ptr.vmem [resolvable:$true] %s421_s3 }
  0x5d   : > { %s3775_s24 = scalar_lea.sflag [#allocation7], %s6440_s25  ;;  %p6521_p12 = scmp.ne.s32.totalorder %s6513_s18, 0 }
  0x5e   : > { %s3762_s20 = scalar_lea.hbm %s6518_s1, %s3750_s22  ;;  %s3340_s16 = scalar_lea.hbm %s6518_s1, 65536 }
  0x5f   : > { %s3335_s15 = scalar_lea.hbm %s3762_s20, 32768  ;;  %p3781_p13 = pneg %p6521_p12 }
  0x60   : > { %p3336_p8 = scmp.ne.s32.totalorder %s3762_s20, %s3335_s15  ;;  %p3341_p4 = scmp.lt.u32.totalorder %s3762_s20, %s6518_s1 }
  0x61   : > { %p3342_p5 = scmp.lt.u32.totalorder %s3340_s16, %s3335_s15  ;;  %p3344_p9 = scmp.lt.u32.totalorder %s3335_s15, %s3762_s20 }
  0x62   : > { %p3338_p1 = pnand %p3781_p13, %p3336_p8 }
  0x63   : > { %p3343_p7 = por %p3342_p5, %p3341_p4 }
  0x64   : > { %p3339_p2 = pneg %p3338_p1 }
  0x65   : > { %p3345_p10 = por %p3344_p9, %p3343_p7 }
  0x67   : > { %p3346_p3 = pnand %p3345_p10, %p3339_p2 }
  0x69   : > { %3349 = shalt.err (!%p3346_p3)
}
  0x6a   : > { %s3350_s25 = scalar_lea.vmem %s3769_s5, 32768  ;;  %s3583_s27 = smov [#allocation6]  }
  0x6b   : > { %p3351_p6 = scmp.ne.s32.totalorder %s3769_s5, %s3350_s25  ;;  %s3355_s6 = sshll.u32 %s3583_s27, 4  ;;  %s3356_s6 = int_to_ptr.vmem [resolvable:$false] %s3355_s6 }
  0x6c   : > { %s3357_s23 = scalar_lea.vmem %s3356_s6, 65536  ;;  %p3358_p11 = scmp.lt.s32.totalorder %s3769_s5, %s3356_s6 }
  0x6d   : > { %p3353_p8 = pnand %p3351_p6, %p3781_p13  ;;  %p3359_p0 = scmp.lt.s32.totalorder %s3357_s23, %s3350_s25 }
  0x6f   : > { %p3354_p1 = pneg %p3353_p8  ;;  %p3360_p4 = por %p3359_p0, %p3358_p11 }
  0x71   : > { %p3361_p5 = pnand %p3360_p4, %p3354_p1 }
  0x73   : > { %3364 = shalt.err (!%p3361_p5)
}
  0x74   : > { %s3584_s15 = smov 1024   ;;  %s3585_s16 = smov 512  }
  0x75   : > { %s3586_s21 = smov 32   ;;  %s3587_s27 = smov [#allocation14]  }
  0x76   : > { %3202 = dma.hbm_to_vmem [thread:$0]  (!%p6521_p12), %s3762_s20, 32768, %s3769_s5, %s3775_s24, %s3584_s15, %s3585_s16, %s3586_s21  }
  0x77   : > { %s348_s6 = sshll.u32 %s3587_s27, 4  ;;  %s2868_s25 = sshll.u32 %s3747_s8, 6  ;;  %s349_s6 = int_to_ptr.vmem [resolvable:$true] %s348_s6 }
  0x78   : > { %s3365_s12 = scalar_lea.hbm %s6431_s7, 64  ;;  %p6523_p0 = scmp.ne.s32.totalorder %s6515_s26, 0 }
  0x79   : > { %p3366_p11 = scmp.ne.s32.totalorder %s6431_s7, %s3365_s12  ;;  %p3372_p9 = scmp.lt.u32.totalorder %s3365_s12, %s6431_s7 }
  0x7b   : > { %p3368_p2 = pnand %p3366_p11, %p6523_p0 }
  0x7d   : > { %p3369_p7 = pneg %p3368_p2 }
  0x7f   : > { %p3374_p10 = pnand %p3372_p9, %p3369_p7 }
  0x81   : > { %3377 = shalt.err (!%p3374_p10)
}
  0x82   : > { %s3378_s5 = scalar_lea.vmem %s349_s6, 64  ;;  %p3386_p1 = scmp.lt.s32.totalorder %s349_s6, %s349_s6 }
  0x83   : > { %p3379_p3 = scmp.ne.s32.totalorder %s349_s6, %s3378_s5  ;;  %p3387_p4 = scmp.lt.s32.totalorder %s3378_s5, %s3378_s5 }
  0x85   : > { %p3381_p6 = pnand %p3379_p3, %p6523_p0  ;;  %p3388_p5 = por %p3387_p4, %p3386_p1 }
  0x87   : > { %p3382_p8 = pneg %p3381_p6 }
  0x89   : > { %p3389_p12 = pnand %p3388_p5, %p3382_p8 }
  0x8b   : > { %3392 = shalt.err (!%p3389_p12)
}
  0x8c   : > { %p6524_p11 = scmp.ne.s32.totalorder %s6512_s17, 0  ;;  %s3831_s13 = scalar_lea.hbm %s6424_s0, %s3750_s22 }
  0x8d   : > { %s363_s26 = scalar_lea.vmem [#allocation3], %s2868_s25  ;;  %s3839_s27 = scalar_lea.hbm %s6426_s2, %s3750_s22 }
  0x8e   : > { %3195 = dma.hbm_to_vmem [thread:$0]  (!%p6524_p11), %s6431_s7, 64, %s349_s6, [#allocation13]  }
  0x8f   : > { %s373_s20 = sshll.u32 %s363_s26, 4  ;;  %s360_s23 = scalar_lea.sflag [#allocation4], %s3747_s8  ;;  %s3833_s20 = int_to_ptr.vmem [resolvable:$true] %s373_s20 }
  0x90   : > { %s3393_s6 = scalar_lea.hbm %s3831_s13, 1024  ;;  %s3398_s29 = scalar_lea.hbm %s6424_s0, 2048 }
  0x91   : > { %p3394_p12 = scmp.ne.s32.totalorder %s3831_s13, %s3393_s6  ;;  %p3399_p7 = scmp.lt.u32.totalorder %s3831_s13, %s6424_s0 }
  0x92   : > { %p3400_p9 = scmp.lt.u32.totalorder %s3398_s29, %s3393_s6  ;;  %p3402_p3 = scmp.lt.u32.totalorder %s3393_s6, %s3831_s13 }
  0x93   : > { %p3396_p0 = pnand %p3394_p12, %p3781_p13 }
  0x94   : > { %p3401_p10 = por %p3400_p9, %p3399_p7 }
  0x95   : > { %p3397_p2 = pneg %p3396_p0 }
  0x96   : > { %p3403_p6 = por %p3402_p3, %p3401_p10 }
  0x98   : > { %p3404_p8 = pnand %p3403_p6, %p3397_p2 }
  0x9a   : > { %3407 = shalt.err (!%p3404_p8)
}
  0x9b   : > { %s3408_s22 = scalar_lea.vmem %s3833_s20, 1024  ;;  %s3588_s11 = smov [#allocation3]  }
  0x9c   : > { %p3409_p1 = scmp.ne.s32.totalorder %s3833_s20, %s3408_s22  ;;  %s3413_s26 = sshll.u32 %s3588_s11, 4  ;;  %s3414_s26 = int_to_ptr.vmem [resolvable:$false] %s3413_s26 }
  0x9d   : > { %s3415_s17 = scalar_lea.vmem %s3414_s26, 2048  ;;  %p3416_p11 = scmp.lt.s32.totalorder %s3833_s20, %s3414_s26 }
  0x9e   : > { %p3411_p4 = pnand %p3409_p1, %p3781_p13  ;;  %p3417_p12 = scmp.lt.s32.totalorder %s3415_s17, %s3408_s22 }
  0xa0   : > { %p3412_p5 = pneg %p3411_p4  ;;  %p3418_p0 = por %p3417_p12, %p3416_p11 }
  0xa2   : > { %p3419_p7 = pnand %p3418_p0, %p3412_p5 }
  0xa4   : > { %3422 = shalt.err (!%p3419_p7)
}
  0xa5   : > { %p6525_p2 = scmp.ne.s32.totalorder %s6513_s18, 0  ;;  %s3423_s12 = scalar_lea.hbm %s3839_s27, 32768 }
  0xa6   : > { %p3424_p9 = scmp.ne.s32.totalorder %s3839_s27, %s3423_s12  ;;  %s3428_s1 = scalar_lea.hbm %s6426_s2, 65536 }
  0xa7   : > { %3199 = dma.hbm_to_vmem [thread:$0]  (!%p6525_p2), %s3831_s13, 1024, %s3833_s20, %s360_s23, %s3584_s15, %s3585_s16, %s3586_s21  }
  0xa8   : > { %p3426_p10 = pnand %p3424_p9, %p3781_p13  ;;  %p3429_p6 = scmp.lt.u32.totalorder %s3839_s27, %s6426_s2 }
  0xa9   : > { %p3430_p8 = scmp.lt.u32.totalorder %s3428_s1, %s3423_s12  ;;  %p3432_p4 = scmp.lt.u32.totalorder %s3423_s12, %s3839_s27 }
  0xaa   : > { %p3427_p3 = pneg %p3426_p10 }
  0xab   : > { %p3431_p1 = por %p3430_p8, %p3429_p6 }
  0xad   : > { %p3433_p5 = por %p3432_p4, %p3431_p1 }
  0xaf   : > { %p3434_p11 = pnand %p3433_p5, %p3427_p3 }
  0xb1   : > { %3437 = shalt.err (!%p3434_p11)
}
  0xb2   : > { %s3438_s13 = scalar_lea.vmem %s3771_s3, 32768  ;;  %s3589_s20 = smov [#allocation8]  }
  0xb3   : > { %p3439_p12 = scmp.ne.s32.totalorder %s3771_s3, %s3438_s13  ;;  %s3443_s23 = sshll.u32 %s3589_s20, 4  ;;  %s3444_s23 = int_to_ptr.vmem [resolvable:$false] %s3443_s23 }
  0xb4   : > { %s3445_s25 = scalar_lea.vmem %s3444_s23, 65536  ;;  %p3446_p9 = scmp.lt.s32.totalorder %s3771_s3, %s3444_s23 }
  0xb5   : > { %p3441_p0 = pnand %p3439_p12, %p3781_p13  ;;  %p3447_p10 = scmp.lt.s32.totalorder %s3445_s25, %s3438_s13 }
  0xb7   : > { %p3442_p7 = pneg %p3441_p0  ;;  %p3448_p6 = por %p3447_p10, %p3446_p9 }
  0xb9   : > { %p3449_p8 = pnand %p3448_p6, %p3442_p7 }
  0xbb   : > { %3452 = shalt.err (!%p3449_p8)
}
  0xbc   : > { %3205 = dma.hbm_to_vmem [thread:$0]  (!%p6525_p2), %s3839_s27, 32768, %s3771_s3, %s3775_s24, %s3584_s15, %s3585_s16, %s3586_s21  }
  0xbd   : > { %s2877_s22 = sshll.u32 %s3747_s8, 2  ;;  %s2897_s11 = sshll.u32 %s3575_s9, 6 }
  0xbe   : > { %s3898_s12 = scalar_lea.hbm %s6428_s4, %s2897_s11  ;;  %s435_s6 = scalar_lea.vmem [#allocation9], %s2877_s22 }
  0xbf   : > { %s443_s5 = sshll.u32 %s435_s6, 4  ;;  %s6526_s1 = sand.u32 1, %s3579_s10   ;;  %s444_s5 = int_to_ptr.vmem [resolvable:$true] %s443_s5 }
  0xc0   : > { %s432_s29 = scalar_lea.sflag [#allocation10], %s6526_s1  ;;  %s3453_s30 = scalar_lea.hbm %s3898_s12, 64 }
  0xc1   : > { %p3454_p3 = scmp.ne.s32.totalorder %s3898_s12, %s3453_s30  ;;  %s3458_s24 = scalar_lea.hbm %s6428_s4, 128 }
  0xc2   : > { %p3459_p5 = scmp.lt.u32.totalorder %s3898_s12, %s6428_s4  ;;  %p3460_p11 = scmp.lt.u32.totalorder %s3458_s24, %s3453_s30 }
  0xc3   : > { %p3456_p1 = pnand %p3454_p3, %p3781_p13  ;;  %p3462_p0 = scmp.lt.u32.totalorder %s3453_s30, %s3898_s12 }
  0xc4   : > { %p3461_p12 = por %p3460_p11, %p3459_p5 }
  0xc5   : > { %p3457_p4 = pneg %p3456_p1 }
  0xc6   : > { %p3463_p7 = por %p3462_p0, %p3461_p12 }
  0xc8   : > { %p3464_p9 = pnand %p3463_p7, %p3457_p4 }
  0xca   : > { %3467 = shalt.err (!%p3464_p9)
}
  0xcb   : > { %s3468_s21 = scalar_lea.vmem %s444_s5, 64  ;;  %s3590_s27 = smov [#allocation9]  }
  0xcc   : > { %p3469_p10 = scmp.ne.s32.totalorder %s444_s5, %s3468_s21  ;;  %s3473_s13 = sshll.u32 %s3590_s27, 4  ;;  %s3474_s13 = int_to_ptr.vmem [resolvable:$false] %s3473_s13 }
  0xcd   : > { %s3475_s20 = scalar_lea.vmem %s3474_s13, 128  ;;  %p3476_p3 = scmp.lt.s32.totalorder %s444_s5, %s3474_s13 }
  0xce   : > { %p3471_p6 = pnand %p3469_p10, %p3781_p13  ;;  %p3477_p1 = scmp.lt.s32.totalorder %s3475_s20, %s3468_s21 }
  0xd0   : > { %p3472_p8 = pneg %p3471_p6  ;;  %p3478_p2 = por %p3477_p1, %p3476_p3 }
  0xd2   : > { %p3479_p5 = pnand %p3478_p2, %p3472_p8 }
  0xd4   : > { %3482 = shalt.err (!%p3479_p5)
}
  0xd5   : > { %p6527_p11 = scmp.ne.s32.totalorder %s6513_s18, 0  ;;  %p6528_p4 = scmp.ne.s32.totalorder %s6511_s14, 0 }
  0xd7   : > { %3208 = dma.hbm_to_vmem [thread:$0]  (!%p6527_p11), %s3898_s12, 64, %s444_s5, %s432_s29  }
  0xd8   : > { %452 = sbr.rel (%p6528_p4) target bundleno = 1040 (0x410), region = 52 }
  0xdf   : > { %s6529_s19 = sld [smem:[#allocation25_spill]]  ;;  %s454_s23 = sand.u32 1, %s3563_s28  }
  0xe0   : > { %s2881_s25 = sshll.u32 %s454_s23, 6  ;;  %s455_s22 = scalar_lea.sflag [#allocation4], %s454_s23 }
  0xe1   : > { %s3922_s11 = scalar_lea.vmem [#allocation3], %s2881_s25 }
  0xe5   : > { %p6530_p13 = scmp.ne.s32.totalorder %s6529_s19, 0 }
  0xe7   : > { %3534 = dma.done.wait (%p6530_p13), %s455_s22, 1024  }
  0xe8   : > { %3536 = vsyncadd (%p6530_p13), %s455_s22, 4294966272  ;;  %s6531_s26 = sld [smem:[#allocation24_spill]]  ;;  %s2882_s17 = sshll.u32 %s454_s23, 11 }
  0xe9   : > { %s3929_s6 = scalar_lea.vmem [#allocation6], %s2882_s17 }
  0xee   : > { %s463_s18 = sand.u32 1, %s6531_s26  }
  0xef   : > { %s464_s12 = scalar_lea.sflag [#allocation7], %s463_s18 }
  0xf0   : > { %3538 = dma.done.wait (%p6530_p13), %s464_s12, 65536  }
  0xf1   : > { %3540 = vsyncadd (%p6530_p13), %s464_s12, 4294901760  ;;  %s2884_s14 = sshll.u32 %s454_s23, 2  ;;  %s3935_s5 = scalar_lea.vmem [#allocation8], %s2882_s17 }
  0xf2   : > { %s482_s1 = scalar_lea.sflag [#allocation10], %s463_s18  ;;  %s3937_s29 = scalar_lea.vmem [#allocation9], %s2884_s14 }
  0xf3   : > { %3542 = dma.done.wait (%p6530_p13), %s482_s1, 64  }
  0xf4   : > { %3544 = vsyncadd (%p6530_p13), %s482_s1, 4294967232  ;;  %p6532_p2 = scmp.eq.s32.totalorder %s6531_s26, 0 }
  0xf6   : > { %3546 = dma.done.wait (%p6532_p2), [#allocation10], 64   ;;  %p6533_p12 = pmov %p6532_p2 }
  0xf7   : > { %p6534_p0 = pmov %p6532_p2 }
  0xf8   : > { %3548 = vsyncadd (%p6533_p12), [#allocation10], 4294967232 }
  0xf9   : > { %3550 = dma.done.wait (%p6534_p0), [#allocation13], 128   ;;  %p6535_p7 = pmov %p6534_p0 }
  0xfa   : > { %s6536_s30 = sld [smem:[#allocation23_spill]] }
  0xfb   : > { %3552 = vsyncadd (%p6535_p7), [#allocation13], 4294967168 }
 0x100   : > { %p2888_p9 = scmp.ne.s32.totalorder %s6536_s30, 0 }
 0x101   : > { %v3591_v0 = vmov (!%p2888_p9), 0.0  }
 0x102   : > { %566 = sbr.rel (%p2888_p9) target bundleno = 265 (0x109), region = 84  ;;  %567 = vst [vmem:[#allocation2] sm:$0xff] (!%p2888_p9), %v3591_v0  ;;  %568 = vst [vmem:[#allocation2 + $0x8] sm:$0xff] (!%p2888_p9), %v3591_v0 }
 0x103   : > { %569 = vst [vmem:[#allocation2 + $0x10] sm:$0xff] (!%p2888_p9), %v3591_v0  ;;  %570 = vst [vmem:[#allocation2 + $0x18] sm:$0xff] (!%p2888_p9), %v3591_v0 }
 0x104   : > { %571 = vst [vmem:[#allocation2 + $0x20] sm:$0xff] (!%p2888_p9), %v3591_v0  ;;  %572 = vst [vmem:[#allocation2 + $0x28] sm:$0xff] (!%p2888_p9), %v3591_v0 }
 0x105   : > { %573 = vst [vmem:[#allocation2 + $0x30] sm:$0xff] (!%p2888_p9), %v3591_v0  ;;  %574 = vst [vmem:[#allocation2 + $0x38] sm:$0xff] (!%p2888_p9), %v3591_v0 }
 0x109 PF: > { %s6537_s24 = sld [smem:[#allocation133_spill]]  ;;  %v3592_v3 = vmov 0   ;;  %v961_v8 = vlaneseq  ;;  %v3993_v18 = vld [vmem:[%s3937_s29] sm:$0xf] }
 0x10a   : > { %3278 = vset.pattern.permute.xlu1 %v3592_v3  ;;  %3277 = vset.pattern.permute.xlu0 %v3592_v3 }
 0x10b   : > { %v3976_v11 = vshrl.u32 %v961_v8, 7 }
 0x10d   : > { %6538 = vst [vmem:[#allocation28_spill] sm:$0xff] %v3976_v11  ;;  %v6453_v14 = vsub.s32 2, %v3976_v11  ;;  %v6452_v17 = vsub.s32 3, %v3976_v11  ;;  %v6454_v8 = vsub.s32 1, %v3976_v11 }
 0x10f   : > { %v607_v1 = vld [vmem:[%s6537_s24 + $0x100] sm:$0xff]  ;;  %v608_v4 = vld [vmem:[%s6537_s24 + $0x108] sm:$0xff]  ;;  %v578_v6 = vld [vmem:[%s6537_s24 + $0x18] sm:$0xff]  ;;  %v3998_v19 = vrot.slane %v3993_v18, %v6453_v14  ;;  %v4009_v22 = vrot.slane %v3993_v18, %v6452_v17 }
 0x110   : > { %v575_v2 = vld [vmem:[%s6537_s24] sm:$0xff]  ;;  %802 = vperm.xlu1 %3278, %v607_v1   ;;  %v576_v5 = vld [vmem:[%s6537_s24 + $0x8] sm:$0xff]  ;;  %v577_v7 = vld [vmem:[%s6537_s24 + $0x10] sm:$0xff] }
 0x111   : > { %642 = vperm.xlu0 %3277, %v575_v2   ;;  %v610_v9 = vld [vmem:[%s6537_s24 + $0x118] sm:$0xff]  ;;  %v609_v10 = vld [vmem:[%s6537_s24 + $0x110] sm:$0xff]  ;;  %v580_v12 = vld [vmem:[%s6537_s24 + $0x28] sm:$0xff] }
 0x112   : > { %v579_v13 = vld [vmem:[%s6537_s24 + $0x20] sm:$0xff]  ;;  %v612_v15 = vld [vmem:[%s6537_s24 + $0x128] sm:$0xff]  ;;  %v582_v20 = vld [vmem:[%s6537_s24 + $0x38] sm:$0xff] }
 0x113   : > { %v611_v16 = vld [vmem:[%s6537_s24 + $0x120] sm:$0xff]  ;;  %v581_v21 = vld [vmem:[%s6537_s24 + $0x30] sm:$0xff]  ;;  %v614_v23 = vld [vmem:[%s6537_s24 + $0x138] sm:$0xff] }
 0x114   : > { %807 = vperm.xlu1 %3278, %v608_v4   ;;  %v613_v24 = vld [vmem:[%s6537_s24 + $0x130] sm:$0xff]  ;;  %v584_v25 = vld [vmem:[%s6537_s24 + $0x48] sm:$0xff]  ;;  %v583_v26 = vld [vmem:[%s6537_s24 + $0x40] sm:$0xff] }
 0x115   : > { %647 = vperm.xlu0 %3277, %v576_v5   ;;  %v616_v27 = vld [vmem:[%s6537_s24 + $0x148] sm:$0xff]  ;;  %v615_v28 = vld [vmem:[%s6537_s24 + $0x140] sm:$0xff]  ;;  %v586_v29 = vld [vmem:[%s6537_s24 + $0x58] sm:$0xff] }
 0x116   : > { %v585_v30 = vld [vmem:[%s6537_s24 + $0x50] sm:$0xff]  ;;  %v618_v31 = vld [vmem:[%s6537_s24 + $0x158] sm:$0xff]  ;;  %v588_v33 = vld [vmem:[%s6537_s24 + $0x68] sm:$0xff] }
 0x117   : > { %v617_v32 = vld [vmem:[%s6537_s24 + $0x150] sm:$0xff]  ;;  %v587_v34 = vld [vmem:[%s6537_s24 + $0x60] sm:$0xff]  ;;  %v620_v35 = vld [vmem:[%s6537_s24 + $0x168] sm:$0xff] }
 0x118   : > { %657 = vperm.xlu1 %3278, %v578_v6   ;;  %v619_v36 = vld [vmem:[%s6537_s24 + $0x160] sm:$0xff]  ;;  %v590_v37 = vld [vmem:[%s6537_s24 + $0x78] sm:$0xff]  ;;  %v589_v38 = vld [vmem:[%s6537_s24 + $0x70] sm:$0xff] }
 0x119   : > { %652 = vperm.xlu0 %3277, %v577_v7   ;;  %v622_v39 = vld [vmem:[%s6537_s24 + $0x178] sm:$0xff]  ;;  %v621_v40 = vld [vmem:[%s6537_s24 + $0x170] sm:$0xff]  ;;  %v592_v41 = vld [vmem:[%s6537_s24 + $0x88] sm:$0xff]  ;;  %v6455_v7 = vsub.s32 0, %v3976_v11 }
 0x11a   : > { %v591_v42 = vld [vmem:[%s6537_s24 + $0x80] sm:$0xff]  ;;  %v624_v43 = vld [vmem:[%s6537_s24 + $0x188] sm:$0xff]  ;;  %v594_v45 = vld [vmem:[%s6537_s24 + $0x98] sm:$0xff] }
 0x11b   : > { %v623_v44 = vld [vmem:[%s6537_s24 + $0x180] sm:$0xff]  ;;  %v593_v46 = vld [vmem:[%s6537_s24 + $0x90] sm:$0xff]  ;;  %v626_v47 = vld [vmem:[%s6537_s24 + $0x198] sm:$0xff] }
 0x11c   : > { %817 = vperm.xlu1 %3278, %v610_v9   ;;  %v625_v48 = vld [vmem:[%s6537_s24 + $0x190] sm:$0xff]  ;;  %v596_v49 = vld [vmem:[%s6537_s24 + $0xa8] sm:$0xff]  ;;  %v595_v50 = vld [vmem:[%s6537_s24 + $0xa0] sm:$0xff] }
 0x11d   : > { %812 = vperm.xlu0 %3277, %v609_v10   ;;  %v628_v51 = vld [vmem:[%s6537_s24 + $0x1a8] sm:$0xff]  ;;  %v627_v52 = vld [vmem:[%s6537_s24 + $0x1a0] sm:$0xff]  ;;  %v598_v53 = vld [vmem:[%s6537_s24 + $0xb8] sm:$0xff] }
 0x11e   : > { %v597_v54 = vld [vmem:[%s6537_s24 + $0xb0] sm:$0xff]  ;;  %v630_v55 = vld [vmem:[%s6537_s24 + $0x1b8] sm:$0xff]  ;;  %v600_v57 = vld [vmem:[%s6537_s24 + $0xc8] sm:$0xff] }
 0x11f   : > { %v629_v56 = vld [vmem:[%s6537_s24 + $0x1b0] sm:$0xff]  ;;  %v599_v58 = vld [vmem:[%s6537_s24 + $0xc0] sm:$0xff]  ;;  %v632_v59 = vld [vmem:[%s6537_s24 + $0x1c8] sm:$0xff] }
 0x120   : > { %667 = vperm.xlu1 %3278, %v580_v12   ;;  %v631_v60 = vld [vmem:[%s6537_s24 + $0x1c0] sm:$0xff]  ;;  %v602_v61 = vld [vmem:[%s6537_s24 + $0xd8] sm:$0xff]  ;;  %v601_v62 = vld [vmem:[%s6537_s24 + $0xd0] sm:$0xff]  ;;  %v4166_v12 = vrot.slane %v3993_v18, %v6455_v7 }
 0x121   : > { %662 = vperm.xlu0 %3277, %v579_v13   ;;  %v634_v63 = vld [vmem:[%s6537_s24 + $0x1d8] sm:$0xff]  ;;  %v633_v0 = vld [vmem:[%s6537_s24 + $0x1d0] sm:$0xff]  ;;  %v604_v1 = vld [vmem:[%s6537_s24 + $0xe8] sm:$0xff]  ;;  %v4171_v13 = vrot.slane %v3993_v18, %v6454_v8 }
 0x122   : > { %v603_v2 = vld [vmem:[%s6537_s24 + $0xe0] sm:$0xff]  ;;  %v636_v3 = vld [vmem:[%s6537_s24 + $0x1e8] sm:$0xff]  ;;  %v606_v5 = vld [vmem:[%s6537_s24 + $0xf8] sm:$0xff] }
 0x123   : > { %v635_v4 = vld [vmem:[%s6537_s24 + $0x1e0] sm:$0xff]  ;;  %v605_v6 = vld [vmem:[%s6537_s24 + $0xf0] sm:$0xff]  ;;  %v638_v9 = vld [vmem:[%s6537_s24 + $0x1f8] sm:$0xff] }
 0x124   : > { %827 = vperm.xlu1 %3278, %v612_v15   ;;  %v637_v10 = vld [vmem:[%s6537_s24 + $0x1f0] sm:$0xff]  ;;  %v1494_v18 = vld [vmem:[%s3935_s5 + $0x8] sm:$0xff] }
 0x125   : > { %822 = vperm.xlu0 %3277, %v611_v16   ;;  %v1623_v15 = vld [vmem:[%s3935_s5 + $0x410] sm:$0xff]  ;;  %v1624_v16 = vld [vmem:[%s3935_s5 + $0x418] sm:$0xff] }
 0x128   : > { %677 = vperm.xlu1 %3278, %v582_v20  }
 0x129   : > { %672 = vperm.xlu0 %3277, %v581_v21   ;;  %v1495_v21 = vld [vmem:[%s3935_s5 + $0x10] sm:$0xff] }
 0x12c   : > { %837 = vperm.xlu1 %3278, %v614_v23  }
 0x12d   : > { %832 = vperm.xlu0 %3277, %v613_v24   ;;  %v1622_v24 = vld [vmem:[%s3935_s5 + $0x408] sm:$0xff] }
 0x130   : > { %687 = vperm.xlu1 %3278, %v584_v25   ;;  %v1621_v25 = vld [vmem:[%s3935_s5 + $0x400] sm:$0xff] }
 0x131   : > { %682 = vperm.xlu0 %3277, %v583_v26  }
 0x134   : > { %847 = vperm.xlu1 %3278, %v616_v27  }
 0x135   : > { %842 = vperm.xlu0 %3277, %v615_v28  }
 0x138   : > { %697 = vperm.xlu1 %3278, %v586_v29  }
 0x139   : > { %692 = vperm.xlu0 %3277, %v585_v30   ;;  %v1496_v30 = vld [vmem:[%s3935_s5 + $0x18] sm:$0xff] }
 0x13c   : > { %857 = vperm.xlu1 %3278, %v618_v31   ;;  %v1493_v31 = vld [vmem:[%s3935_s5] sm:$0xff] }
 0x13d   : > { %852 = vperm.xlu0 %3277, %v617_v32  }
 0x140   : > { %707 = vperm.xlu1 %3278, %v588_v33  }
 0x141   : > { %702 = vperm.xlu0 %3277, %v587_v34  }
 0x144   : > { %867 = vperm.xlu1 %3278, %v620_v35  }
 0x145   : > { %862 = vperm.xlu0 %3277, %v619_v36  }
 0x148   : > { %717 = vperm.xlu1 %3278, %v590_v37  }
 0x149   : > { %712 = vperm.xlu0 %3277, %v589_v38   ;;  %v1627_v38 = vld [vmem:[%s3935_s5 + $0x430] sm:$0xff] }
 0x14c   : > { %877 = vperm.xlu1 %3278, %v622_v39   ;;  %v1628_v39 = vld [vmem:[%s3935_s5 + $0x438] sm:$0xff] }
 0x14d   : > { %872 = vperm.xlu0 %3277, %v621_v40  }
 0x150   : > { %727 = vperm.xlu1 %3278, %v592_v41  }
 0x151   : > { %722 = vperm.xlu0 %3277, %v591_v42  }
 0x154   : > { %887 = vperm.xlu1 %3278, %v624_v43  }
 0x155   : > { %882 = vperm.xlu0 %3277, %v623_v44  }
 0x158   : > { %737 = vperm.xlu1 %3278, %v594_v45   ;;  %v1499_v45 = vld [vmem:[%s3935_s5 + $0x30] sm:$0xff] }
 0x159   : > { %732 = vperm.xlu0 %3277, %v593_v46  }
 0x15c   : > { %897 = vperm.xlu1 %3278, %v626_v47   ;;  %v1238_v47 = vld [vmem:[%s3929_s6 + $0x8] sm:$0xff] }
 0x15d   : > { %892 = vperm.xlu0 %3277, %v625_v48  }
 0x160   : > { %747 = vperm.xlu1 %3278, %v596_v49   ;;  %v1626_v49 = vld [vmem:[%s3935_s5 + $0x428] sm:$0xff] }
 0x161   : > { %742 = vperm.xlu0 %3277, %v595_v50  }
 0x164   : > { %907 = vperm.xlu1 %3278, %v628_v51  }
 0x165   : > { %902 = vperm.xlu0 %3277, %v627_v52  }
 0x168   : > { %757 = vperm.xlu1 %3278, %v598_v53  }
 0x169   : > { %752 = vperm.xlu0 %3277, %v597_v54  }
 0x16c   : > { %917 = vperm.xlu1 %3278, %v630_v55   ;;  %v1500_v55 = vld [vmem:[%s3935_s5 + $0x38] sm:$0xff] }
 0x16d   : > { %912 = vperm.xlu0 %3277, %v629_v56   ;;  %v1498_v56 = vld [vmem:[%s3935_s5 + $0x28] sm:$0xff] }
 0x170   : > { %767 = vperm.xlu1 %3278, %v600_v57   ;;  %v1366_v57 = vld [vmem:[%s3929_s6 + $0x408] sm:$0xff] }
 0x171   : > { %762 = vperm.xlu0 %3277, %v599_v58  }
 0x174   : > { %927 = vperm.xlu1 %3278, %v632_v59  }
 0x175   : > { %922 = vperm.xlu0 %3277, %v631_v60  }
 0x178   : > { %777 = vperm.xlu1 %3278, %v602_v61  }
 0x179   : > { %772 = vperm.xlu0 %3277, %v601_v62  }
 0x17c   : > { %937 = vperm.xlu1 %3278, %v634_v63  }
 0x17d   : > { %932 = vperm.xlu0 %3277, %v633_v0   ;;  %v1505_v0 = vld [vmem:[%s3935_s5 + $0x60] sm:$0xff] }
 0x180   : > { %787 = vperm.xlu1 %3278, %v604_v1   ;;  %v1506_v1 = vld [vmem:[%s3935_s5 + $0x68] sm:$0xff] }
 0x181   : > { %782 = vperm.xlu0 %3277, %v603_v2  }
 0x184   : > { %947 = vperm.xlu1 %3278, %v636_v3  }
 0x185   : > { %942 = vperm.xlu0 %3277, %v635_v4  }
 0x188   : > { %797 = vperm.xlu1 %3278, %v606_v5  }
 0x189   : > { %792 = vperm.xlu0 %3277, %v605_v6   ;;  %v1507_v6 = vld [vmem:[%s3935_s5 + $0x70] sm:$0xff] }
 0x18c   : > { %957 = vperm.xlu1 %3278, %v638_v9   ;;  %v1508_v9 = vld [vmem:[%s3935_s5 + $0x78] sm:$0xff] }
 0x18d   : > { %952 = vperm.xlu0 %3277, %v637_v10  }
 0x18f   : > { %v803_v20 = vpop.permute.xlu1 %802 }
 0x190   : > { %v643_v23 = vpop.permute.xlu0 %642  ;;  %v1109_v26 = vmul.f32 %v4166_v12, %v803_v20  ;;  %v1110_v27 = vmul.f32 %v4171_v13, %v803_v20  ;;  %v1111_v28 = vmul.f32 %v3998_v19, %v803_v20  ;;  %v1112_v29 = vmul.f32 %v4009_v22, %v803_v20 }
 0x191   : > { %v981_v32 = vmul.f32 %v4166_v12, %v643_v23  ;;  %v982_v33 = vmul.f32 %v4171_v13, %v643_v23  ;;  %v983_v34 = vmul.f32 %v3998_v19, %v643_v23  ;;  %v984_v35 = vmul.f32 %v4009_v22, %v643_v23 }
 0x192   : > { %v4189_v36 = vmul.f32 %v1623_v15, %v1111_v28  ;;  %v4191_v37 = vmul.f32 %v1624_v16, %v1112_v29  ;;  %v1878_v40 = vmul.f32 %v1622_v24, %v1110_v27  ;;  %v4195_v41 = vmul.f32 %v1621_v25, %v1109_v26  ;;  %v1501_v15 = vld [vmem:[%s3935_s5 + $0x40] sm:$0xff]  ;;  %v1502_v27 = vld [vmem:[%s3935_s5 + $0x48] sm:$0xff]  ;;  %v1503_v28 = vld [vmem:[%s3935_s5 + $0x50] sm:$0xff] }
 0x193   : > { %v4197_v42 = vmul.f32 %v1495_v21, %v983_v34  ;;  %v4199_v43 = vmul.f32 %v1496_v30, %v984_v35  ;;  %v808_v44 = vpop.permute.xlu1 %807  ;;  %v1750_v48 = vmul.f32 %v1494_v18, %v982_v33  ;;  %v4204_v50 = vmul.f32 %v1493_v31, %v981_v32  ;;  %v1504_v29 = vld [vmem:[%s3935_s5 + $0x58] sm:$0xff] }
 0x194   : > { %v648_v46 = vpop.permute.xlu0 %647  ;;  %v4207_v51 = vmul.f32 %v4166_v12, %v808_v44  ;;  %v1114_v52 = vmul.f32 %v4171_v13, %v808_v44  ;;  %v1115_v53 = vmul.f32 %v3998_v19, %v808_v44  ;;  %v1116_v54 = vmul.f32 %v4009_v22, %v808_v44  ;;  %v1635_v44 = vld [vmem:[%s3935_s5 + $0x470] sm:$0xff] }
 0x195   : > { %v4216_v58 = vmul.f32 %v4166_v12, %v648_v46  ;;  %v986_v59 = vmul.f32 %v4171_v13, %v648_v46  ;;  %v987_v60 = vmul.f32 %v3998_v19, %v648_v46  ;;  %v988_v61 = vmul.f32 %v4009_v22, %v648_v46 }
 0x196   : > { %v4221_v62 = vmul.f32 %v1627_v38, %v1115_v53  ;;  %v4223_v63 = vmul.f32 %v1628_v39, %v1116_v54  ;;  %v4227_v2 = vadd.f32 %v1750_v48, %v1238_v47  ;;  %v4229_v3 = vmul.f32 %v1626_v49, %v1114_v52  ;;  %v1633_v39 = vld [vmem:[%s3935_s5 + $0x460] sm:$0xff]  ;;  %v1636_v49 = vld [vmem:[%s3935_s5 + $0x478] sm:$0xff]  ;;  %v1630_v54 = vld [vmem:[%s3935_s5 + $0x448] sm:$0xff] }
 0x197   : > { %v4231_v4 = vmul.f32 %v1499_v45, %v987_v60  ;;  %v4233_v5 = vmul.f32 %v1500_v55, %v988_v61  ;;  %v658_v10 = vpop.permute.xlu1 %657  ;;  %v1754_v20 = vmul.f32 %v1498_v56, %v986_v59  ;;  %v4238_v21 = vadd.f32 %v1878_v40, %v1366_v57  ;;  %v1634_v40 = vld [vmem:[%s3935_s5 + $0x468] sm:$0xff]  ;;  %v1629_v53 = vld [vmem:[%s3935_s5 + $0x440] sm:$0xff]  ;;  %v1631_v61 = vld [vmem:[%s3935_s5 + $0x450] sm:$0xff] }
 0x198   : > { %v653_v16 = vpop.permute.xlu0 %652  ;;  %v993_v23 = vmul.f32 %v4166_v12, %v658_v10  ;;  %v994_v24 = vmul.f32 %v4171_v13, %v658_v10  ;;  %v995_v25 = vmul.f32 %v3998_v19, %v658_v10  ;;  %v996_v26 = vmul.f32 %v4009_v22, %v658_v10 }
 0x199   : > { %v989_v30 = vmul.f32 %v4166_v12, %v653_v16  ;;  %v990_v18 = vmul.f32 %v4171_v13, %v653_v16  ;;  %v991_v31 = vmul.f32 %v3998_v19, %v653_v16  ;;  %v992_v32 = vmul.f32 %v4009_v22, %v653_v16  ;;  %v1370_v16 = vld [vmem:[%s3929_s6 + $0x428] sm:$0xff] }
 0x19a   : > { %v4251_v33 = vmul.f32 %v1505_v0, %v993_v23  ;;  %v4253_v34 = vmul.f32 %v1506_v1, %v994_v24  ;;  %v4255_v35 = vmul.f32 %v1507_v6, %v995_v25  ;;  %v4257_v38 = vmul.f32 %v1508_v9, %v996_v26  ;;  %v1632_v0 = vld [vmem:[%s3935_s5 + $0x458] sm:$0xff]  ;;  %v1242_v1 = vld [vmem:[%s3929_s6 + $0x28] sm:$0xff]  ;;  %v1237_v23 = vld [vmem:[%s3929_s6] sm:$0xff] }
 0x19b   : > { %v4262_v45 = vmul.f32 %v1501_v15, %v989_v30  ;;  %v4264_v46 = vmul.f32 %v1502_v27, %v990_v18  ;;  %v4266_v47 = vmul.f32 %v1503_v28, %v991_v31  ;;  %v4268_v48 = vmul.f32 %v1504_v29, %v992_v32  ;;  %v818_v52 = vpop.permute.xlu1 %817  ;;  %v1497_v24 = vld [vmem:[%s3935_s5 + $0x20] sm:$0xff] }
 0x19c   : > { %v813_v55 = vpop.permute.xlu0 %812  ;;  %v1121_v56 = vmul.f32 %v4166_v12, %v818_v52  ;;  %v1122_v57 = vmul.f32 %v4171_v13, %v818_v52  ;;  %v1123_v59 = vmul.f32 %v3998_v19, %v818_v52  ;;  %v1124_v60 = vmul.f32 %v4009_v22, %v818_v52  ;;  %v1365_v29 = vld [vmem:[%s3929_s6 + $0x400] sm:$0xff] }
 0x19d   : > { %v1117_v6 = vmul.f32 %v4166_v12, %v813_v55  ;;  %v1118_v9 = vmul.f32 %v4171_v13, %v813_v55  ;;  %v1119_v10 = vmul.f32 %v3998_v19, %v813_v55  ;;  %v1120_v15 = vmul.f32 %v4009_v22, %v813_v55  ;;  %v1625_v30 = vld [vmem:[%s3935_s5 + $0x420] sm:$0xff] }
 0x19e   : > { %v4287_v25 = vmul.f32 %v1633_v39, %v1121_v56  ;;  %v4289_v26 = vmul.f32 %v1634_v40, %v1122_v57  ;;  %v4291_v27 = vmul.f32 %v1635_v44, %v1123_v59  ;;  %v4293_v28 = vmul.f32 %v1636_v49, %v1124_v60  ;;  %v1241_v40 = vld [vmem:[%s3929_s6 + $0x20] sm:$0xff] }
 0x19f   : > { %v4297_v18 = vmul.f32 %v1629_v53, %v1117_v6  ;;  %v4299_v31 = vmul.f32 %v1630_v54, %v1118_v9  ;;  %v4301_v32 = vmul.f32 %v1631_v61, %v1119_v10  ;;  %v4303_v39 = vmul.f32 %v1632_v0, %v1120_v15  ;;  %v668_v52 = vpop.permute.xlu1 %667  ;;  %v1369_v53 = vld [vmem:[%s3929_s6 + $0x420] sm:$0xff]  ;;  %v1514_v54 = vld [vmem:[%s3935_s5 + $0xa8] sm:$0xff]  ;;  %v1515_v0 = vld [vmem:[%s3935_s5 + $0xb0] sm:$0xff] }
 0x1a0   : > { %v663_v55 = vpop.permute.xlu0 %662  ;;  %v2010_v44 = vadd.f32 %v1754_v20, %v1242_v1  ;;  %v2138_v49 = vadd.f32 %v4229_v3, %v1370_v16  ;;  %v1753_v56 = vmul.f32 %v1497_v24, %v4216_v58  ;;  %v2005_v57 = vadd.f32 %v4204_v50, %v1237_v23  ;;  %v1513_v59 = vld [vmem:[%s3935_s5 + $0xa0] sm:$0xff]  ;;  %v1516_v1 = vld [vmem:[%s3935_s5 + $0xb8] sm:$0xff]  ;;  %v1246_v23 = vld [vmem:[%s3929_s6 + $0x48] sm:$0xff] }
 0x1a1   : > { %v1881_v60 = vmul.f32 %v1625_v30, %v4207_v51  ;;  %v2133_v61 = vadd.f32 %v4195_v41, %v1365_v29  ;;  %v1001_v6 = vmul.f32 %v4166_v12, %v668_v52  ;;  %v1002_v20 = vmul.f32 %v4171_v13, %v668_v52  ;;  %v1509_v16 = vld [vmem:[%s3935_s5 + $0x80] sm:$0xff]  ;;  %v1250_v24 = vld [vmem:[%s3929_s6 + $0x68] sm:$0xff] }
 0x1a2   : > { %v2898_v3 = vpack.c.bf16 %v2010_v44, %v4227_v2  ;;  %v3026_v58 = vpack.c.bf16 %v2138_v49, %v4238_v21  ;;  %v2009_v50 = vadd.f32 %v1753_v56, %v1241_v40  ;;  %v1003_v9 = vmul.f32 %v3998_v19, %v668_v52  ;;  %v1510_v40 = vld [vmem:[%s3935_s5 + $0x88] sm:$0xff] }
 0x1a3   : > { %v2137_v10 = vadd.f32 %v1881_v60, %v1369_v53  ;;  %v1004_v51 = vmul.f32 %v4009_v22, %v668_v52  ;;  %v4322_v15 = vmul.f32 %v1513_v59, %v1001_v6  ;;  %v4324_v41 = vmul.f32 %v1514_v54, %v1002_v20  ;;  %v828_v2 = vpop.permute.xlu1 %827  ;;  %v1511_v52 = vld [vmem:[%s3935_s5 + $0x90] sm:$0xff]  ;;  %v1512_v53 = vld [vmem:[%s3935_s5 + $0x98] sm:$0xff]  ;;  %v1642_v20 = vld [vmem:[%s3935_s5 + $0x4a8] sm:$0xff] }
 0x1a4   : > { %v823_v29 = vpop.permute.xlu0 %822  ;;  %2899 = vmatprep.subr.bf16.mxu0 %v2898_v3  ;;  %3027 = vmatprep.subr.bf16.mxu1 %v3026_v58  ;;  %v2900_v21 = vpack.c.bf16 %v2009_v50, %v2005_v57  ;;  %v4329_v30 = vmul.f32 %v1515_v0, %v1003_v9  ;;  %v997_v44 = vmul.f32 %v4166_v12, %v663_v55  ;;  %v1643_v3 = vld [vmem:[%s3935_s5 + $0x4b0] sm:$0xff] }
 0x1a5   : > { %v3028_v49 = vpack.c.bf16 %v2137_v10, %v2133_v61  ;;  %v4334_v56 = vmul.f32 %v1516_v1, %v1004_v51  ;;  %v998_v59 = vmul.f32 %v4171_v13, %v663_v55  ;;  %v999_v54 = vmul.f32 %v3998_v19, %v663_v55  ;;  %v1641_v61 = vld [vmem:[%s3935_s5 + $0x4a0] sm:$0xff]  ;;  %v1644_v1 = vld [vmem:[%s3935_s5 + $0x4b8] sm:$0xff] }
 0x1a6   : > { %6539 = vst [vmem:[#allocation29_spill] sm:$0xff] %v4329_v30  ;;  %2901 = vmatpush1.bf16.xpose.msra.mxu0 %v2900_v21  ;;  %v1000_v57 = vmul.f32 %v4009_v22, %v663_v55  ;;  %v4340_v60 = vmul.f32 %v1509_v16, %v997_v44  ;;  %v2014_v0 = vadd.f32 %v4264_v46, %v1246_v23  ;;  %v1637_v46 = vld [vmem:[%s3935_s5 + $0x480] sm:$0xff]  ;;  %v1378_v44 = vld [vmem:[%s3929_s6 + $0x468] sm:$0xff] }
 0x1a7   : > { %v2018_v6 = vadd.f32 %v4253_v34, %v1250_v24  ;;  %3029 = vmatpush1.bf16.xpose.msra.mxu1 %v3028_v49  ;;  %v4347_v58 = vmul.f32 %v1510_v40, %v998_v59  ;;  %v4349_v50 = vmul.f32 %v1511_v52, %v999_v54  ;;  %v1129_v55 = vmul.f32 %v4166_v12, %v828_v2  ;;  %v1638_v34 = vld [vmem:[%s3935_s5 + $0x488] sm:$0xff]  ;;  %v678_v10 = vpop.permute.xlu1 %677  ;;  %v1639_v40 = vld [vmem:[%s3935_s5 + $0x490] sm:$0xff]  ;;  %v1640_v54 = vld [vmem:[%s3935_s5 + $0x498] sm:$0xff] }
 0x1a8   : > { %v1130_v9 = vmul.f32 %v4171_v13, %v828_v2  ;;  %v4356_v51 = vpop.permute.xlu0 %672  ;;  %v4358_v16 = vmul.f32 %v1512_v53, %v1000_v57  ;;  %v1131_v24 = vmul.f32 %v3998_v19, %v828_v2  ;;  %v1132_v21 = vmul.f32 %v4009_v22, %v828_v2  ;;  %v1374_v52 = vld [vmem:[%s3929_s6 + $0x448] sm:$0xff]  ;;  %v1245_v57 = vld [vmem:[%s3929_s6 + $0x40] sm:$0xff] }
 0x1a9   : > { %6540 = vst [vmem:[#allocation30_spill] sm:$0xff] %v4349_v50  ;;  %v2902_v23 = vpack.c.bf16 %v2018_v6, %v2014_v0  ;;  %v4365_v49 = vmul.f32 %v1641_v61, %v1129_v55  ;;  %v1125_v17 = vmul.f32 %v4166_v12, %v823_v29  ;;  %v1126_v53 = vmul.f32 %v4171_v13, %v823_v29  ;;  %v1249_v0 = vld [vmem:[%s3929_s6 + $0x60] sm:$0xff] }
 0x1aa   : > { %v4367_v59 = vmul.f32 %v1642_v20, %v1130_v9  ;;  %v4374_v6 = vmul.f32 %v1643_v3, %v1131_v24  ;;  %v4376_v2 = vmul.f32 %v1644_v1, %v1132_v21  ;;  %v1127_v14 = vmul.f32 %v3998_v19, %v823_v29  ;;  %v1373_v55 = vld [vmem:[%s3929_s6 + $0x440] sm:$0xff] }
 0x1ab   : > { %2903 = vmatprep.subr.bf16.mxu0 %v2902_v23  ;;  %v1128_v61 = vmul.f32 %v4009_v22, %v823_v29  ;;  %v1377_v20 = vld [vmem:[%s3929_s6 + $0x460] sm:$0xff]  ;;  %v4382_v9 = vmul.f32 %v1637_v46, %v1125_v17  ;;  %v4384_v8 = vmul.f32 %v1638_v34, %v1126_v53  ;;  %v2142_v23 = vadd.f32 %v4299_v31, %v1374_v52  ;;  %v838_v24 = vpop.permute.xlu1 %837  ;;  %v1522_v52 = vld [vmem:[%s3935_s5 + $0xe8] sm:$0xff] }
 0x1ac   : > { %6541 = vst [vmem:[#allocation31_spill] sm:$0xff] %v4374_v6  ;;  %6542 = vst [vmem:[#allocation32_spill] sm:$0xff] %v4376_v2  ;;  %v2146_v3 = vadd.f32 %v4289_v26, %v1378_v44  ;;  %v4388_v1 = vpop.permute.xlu0 %832  ;;  %v4390_v21 = vmul.f32 %v1639_v40, %v1127_v14  ;;  %v2013_v7 = vadd.f32 %v4262_v45, %v1245_v57  ;;  %v1521_v46 = vld [vmem:[%s3935_s5 + $0xe0] sm:$0xff]  ;;  %v1523_v44 = vld [vmem:[%s3935_s5 + $0xf0] sm:$0xff] }
 0x1ad   : > { %v4392_v29 = vmul.f32 %v1640_v54, %v1128_v61  ;;  %v2017_v17 = vadd.f32 %v4251_v33, %v1249_v0  ;;  %v2141_v31 = vadd.f32 %v4297_v18, %v1373_v55  ;;  %v2145_v26 = vadd.f32 %v4287_v25, %v1377_v20  ;;  %v1524_v14 = vld [vmem:[%s3935_s5 + $0xf8] sm:$0xff]  ;;  %v1517_v57 = vld [vmem:[%s3935_s5 + $0xc0] sm:$0xff]  ;;  %v1518_v0 = vld [vmem:[%s3935_s5 + $0xc8] sm:$0xff] }
 0x1ae   : > { %6543 = vst [vmem:[#allocation33_spill] sm:$0xff] %v4390_v21  ;;  %v3030_v34 = vpack.c.bf16 %v2146_v3, %v2142_v23  ;;  %v1009_v40 = vmul.f32 %v4166_v12, %v678_v10  ;;  %v1010_v53 = vmul.f32 %v4171_v13, %v678_v10  ;;  %v1011_v45 = vmul.f32 %v3998_v19, %v678_v10  ;;  %v1254_v18 = vld [vmem:[%s3929_s6 + $0x88] sm:$0xff]  ;;  %v1519_v55 = vld [vmem:[%s3935_s5 + $0xd0] sm:$0xff]  ;;  %v1257_v21 = vld [vmem:[%s3929_s6 + $0xa0] sm:$0xff] }
 0x1af   : > { %6544 = vst [vmem:[#allocation34_spill] sm:$0xff] %v4392_v29  ;;  %v2904_v54 = vpack.c.bf16 %v2017_v17, %v2013_v7  ;;  %v1012_v33 = vmul.f32 %v4009_v22, %v678_v10  ;;  %v3032_v61 = vpack.c.bf16 %v2145_v26, %v2141_v31  ;;  %v1005_v20 = vmul.f32 %v4166_v12, %v4356_v51  ;;  %v1258_v23 = vld [vmem:[%s3929_s6 + $0xa8] sm:$0xff]  ;;  %v4417_v10 = vpop.permute.xlu1 %687  ;;  %v1520_v31 = vld [vmem:[%s3935_s5 + $0xd8] sm:$0xff] }
 0x1b0   : > { %3031 = vmatprep.subr.bf16.mxu1 %v3030_v34  ;;  %v4409_v25 = vmul.f32 %v1521_v46, %v1009_v40  ;;  %v1006_v7 = vmul.f32 %v4171_v13, %v4356_v51  ;;  %v4419_v3 = vpop.permute.xlu0 %682  ;;  %v4421_v17 = vmul.f32 %v1522_v52, %v1010_v53  ;;  %v4423_v46 = vmul.f32 %v1523_v44, %v1011_v45  ;;  %v1649_v44 = vld [vmem:[%s3935_s5 + $0x4e0] sm:$0xff]  ;;  %v1651_v53 = vld [vmem:[%s3935_s5 + $0x4f0] sm:$0xff] }
 0x1b1   : > { %2905 = vmatpush1.bf16.xpose.msra.mxu0 %v2904_v54  ;;  %v4425_v34 = vmul.f32 %v1524_v14, %v1012_v33  ;;  %v1007_v26 = vmul.f32 %v3998_v19, %v4356_v51  ;;  %3033 = vmatpush1.bf16.xpose.msra.mxu1 %v3032_v61  ;;  %v1008_v40 = vmul.f32 %v4009_v22, %v4356_v51  ;;  %v1650_v14 = vld [vmem:[%s3935_s5 + $0x4e8] sm:$0xff]  ;;  %v1652_v61 = vld [vmem:[%s3935_s5 + $0x4f8] sm:$0xff] }
 0x1b2   : > { %6545 = vst [vmem:[#allocation35_spill] sm:$0xff] %v4423_v46  ;;  %v4432_v11 = vmul.f32 %v1517_v57, %v1005_v20  ;;  %v4434_v54 = vmul.f32 %v1518_v0, %v1006_v7  ;;  %v2022_v52 = vadd.f32 %v4347_v58, %v1254_v18  ;;  %v2026_v33 = vadd.f32 %v4324_v41, %v1258_v23  ;;  %v1645_v57 = vld [vmem:[%s3935_s5 + $0x4c0] sm:$0xff]  ;;  %v1646_v0 = vld [vmem:[%s3935_s5 + $0x4c8] sm:$0xff] }
 0x1b3   : > { %6546 = vst [vmem:[#allocation36_spill] sm:$0xff] %v4425_v34  ;;  %v4440_v45 = vmul.f32 %v1519_v55, %v1007_v26  ;;  %v1137_v46 = vmul.f32 %v4166_v12, %v838_v24  ;;  %v1138_v51 = vmul.f32 %v4171_v13, %v838_v24  ;;  %v4448_v58 = vmul.f32 %v1520_v31, %v1008_v40  ;;  %v1647_v55 = vld [vmem:[%s3935_s5 + $0x4d0] sm:$0xff]  ;;  %v1382_v7 = vld [vmem:[%s3929_s6 + $0x488] sm:$0xff]  ;;  %v4457_v26 = vpop.permute.xlu1 %847  ;;  %v1648_v40 = vld [vmem:[%s3935_s5 + $0x4d8] sm:$0xff] }
 0x1b4   : > { %v1139_v18 = vmul.f32 %v3998_v19, %v838_v24  ;;  %v1140_v20 = vmul.f32 %v4009_v22, %v838_v24  ;;  %v1133_v41 = vmul.f32 %v4166_v12, %v4388_v1  ;;  %v1386_v23 = vld [vmem:[%s3929_s6 + $0x4a8] sm:$0xff]  ;;  %v2906_v34 = vpack.c.bf16 %v2026_v33, %v2022_v52  ;;  %v1381_v52 = vld [vmem:[%s3929_s6 + $0x480] sm:$0xff] }
 0x1b5   : > { %6547 = vst [vmem:[#allocation37_spill] sm:$0xff] %v4440_v45  ;;  %6548 = vst [vmem:[#allocation38_spill] sm:$0xff] %v4448_v58  ;;  %v4459_v45 = vpop.permute.xlu0 %842  ;;  %v4461_v6 = vmul.f32 %v1649_v44, %v1137_v46  ;;  %v4463_v31 = vmul.f32 %v1650_v14, %v1138_v51  ;;  %v1134_v24 = vmul.f32 %v4171_v13, %v4388_v1  ;;  %v1253_v58 = vld [vmem:[%s3929_s6 + $0x80] sm:$0xff] }
 0x1b6   : > { %v4470_v30 = vmul.f32 %v1651_v53, %v1139_v18  ;;  %v4472_v50 = vmul.f32 %v1652_v61, %v1140_v20  ;;  %v1135_v2 = vmul.f32 %v3998_v19, %v4388_v1  ;;  %v1136_v46 = vmul.f32 %v4009_v22, %v4388_v1  ;;  %v1385_v44 = vld [vmem:[%s3929_s6 + $0x4a0] sm:$0xff]  ;;  %2907 = vmatprep.subr.bf16.mxu0 %v2906_v34 }
 0x1b7   : > { %v4480_v14 = vmul.f32 %v1645_v57, %v1133_v41  ;;  %v4482_v33 = vmul.f32 %v1646_v0, %v1134_v24  ;;  %v2150_v53 = vadd.f32 %v4384_v8, %v1382_v7  ;;  %v2154_v61 = vadd.f32 %v4367_v59, %v1386_v23  ;;  %v1529_v34 = vld [vmem:[%s3935_s5 + $0x120] sm:$0xff]  ;;  %v4493_v57 = vpop.permute.xlu1 %697 }
 0x1b8   : > { %6549 = vst [vmem:[#allocation39_spill] sm:$0xff] %v4470_v30  ;;  %6550 = vst [vmem:[#allocation40_spill] sm:$0xff] %v4472_v50  ;;  %v4486_v51 = vmul.f32 %v1647_v55, %v1135_v2  ;;  %v4488_v18 = vmul.f32 %v1648_v40, %v1136_v46  ;;  %v2021_v1 = vadd.f32 %v4340_v60, %v1253_v58  ;;  %v1530_v2 = vld [vmem:[%s3935_s5 + $0x128] sm:$0xff]  ;;  %v1531_v55 = vld [vmem:[%s3935_s5 + $0x130] sm:$0xff] }
 0x1b9   : > { %v2025_v20 = vadd.f32 %v4322_v15, %v1257_v21  ;;  %v4495_v0 = vpop.permute.xlu0 %692  ;;  %v3034_v41 = vpack.c.bf16 %v2154_v61, %v2150_v53  ;;  %v2149_v8 = vadd.f32 %v4382_v9, %v1381_v52  ;;  %v2153_v59 = vadd.f32 %v4365_v49, %v1385_v44  ;;  %v1532_v60 = vld [vmem:[%s3935_s5 + $0x138] sm:$0xff]  ;;  %v1525_v23 = vld [vmem:[%s3935_s5 + $0x100] sm:$0xff]  ;;  %v1526_v49 = vld [vmem:[%s3935_s5 + $0x108] sm:$0xff] }
 0x1ba   : > { %6551 = vst [vmem:[#allocation41_spill] sm:$0xff] %v4486_v51  ;;  %6552 = vst [vmem:[#allocation42_spill] sm:$0xff] %v4488_v18  ;;  %v1017_v15 = vmul.f32 %v4166_v12, %v4417_v10  ;;  %v1018_v58 = vmul.f32 %v4171_v13, %v4417_v10  ;;  %v1019_v7 = vmul.f32 %v3998_v19, %v4417_v10  ;;  %v1262_v40 = vld [vmem:[%s3929_s6 + $0xc8] sm:$0xff]  ;;  %v1527_v52 = vld [vmem:[%s3935_s5 + $0x110] sm:$0xff] }
 0x1bb   : > { %v2908_v21 = vpack.c.bf16 %v2025_v20, %v2021_v1  ;;  %v1020_v9 = vmul.f32 %v4009_v22, %v4417_v10  ;;  %3035 = vmatprep.subr.bf16.mxu1 %v3034_v41  ;;  %v3036_v24 = vpack.c.bf16 %v2153_v59, %v2149_v8  ;;  %v1013_v44 = vmul.f32 %v4166_v12, %v4419_v3  ;;  %v1266_v61 = vld [vmem:[%s3929_s6 + $0xe8] sm:$0xff]  ;;  %v4530_v8 = vpop.permute.xlu1 %857  ;;  %v1265_v51 = vld [vmem:[%s3929_s6 + $0xe0] sm:$0xff] }
 0x1bc   : > { %v4513_v46 = vmul.f32 %v1529_v34, %v1017_v15  ;;  %v1014_v53 = vmul.f32 %v4171_v13, %v4419_v3  ;;  %v4521_v10 = vmul.f32 %v1530_v2, %v1018_v58  ;;  %v4523_v1 = vmul.f32 %v1531_v55, %v1019_v7  ;;  %v1528_v34 = vld [vmem:[%s3935_s5 + $0x118] sm:$0xff]  ;;  %v1659_v58 = vld [vmem:[%s3935_s5 + $0x530] sm:$0xff] }
 0x1bd   : > { %2909 = vmatpush1.bf16.xpose.msra.mxu0 %v2908_v21  ;;  %v4525_v20 = vmul.f32 %v1532_v60, %v1020_v9  ;;  %v1015_v41 = vmul.f32 %v3998_v19, %v4419_v3  ;;  %3037 = vmatpush1.bf16.xpose.msra.mxu1 %v3036_v24  ;;  %v1016_v59 = vmul.f32 %v4009_v22, %v4419_v3  ;;  %v1657_v60 = vld [vmem:[%s3935_s5 + $0x520] sm:$0xff]  ;;  %v1658_v21 = vld [vmem:[%s3935_s5 + $0x528] sm:$0xff]  ;;  %v4542_v7 = vpop.permute.xlu0 %852  ;;  %v1660_v3 = vld [vmem:[%s3935_s5 + $0x538] sm:$0xff] }
 0x1be   : > { %6553 = vst [vmem:[#allocation43_spill] sm:$0xff] %v4523_v1  ;;  %v4534_v15 = vmul.f32 %v1525_v23, %v1013_v44  ;;  %v4536_v2 = vmul.f32 %v1526_v49, %v1014_v53  ;;  %v2030_v55 = vadd.f32 %v4434_v54, %v1262_v40  ;;  %v2034_v24 = vadd.f32 %v4421_v17, %v1266_v61  ;;  %v1653_v49 = vld [vmem:[%s3935_s5 + $0x500] sm:$0xff]  ;;  %v1654_v40 = vld [vmem:[%s3935_s5 + $0x508] sm:$0xff]  ;;  %v1655_v53 = vld [vmem:[%s3935_s5 + $0x510] sm:$0xff] }
 0x1bf   : > { %6554 = vst [vmem:[#allocation44_spill] sm:$0xff] %v4525_v20  ;;  %v4544_v9 = vmul.f32 %v1527_v52, %v1015_v41  ;;  %v1145_v23 = vmul.f32 %v4166_v12, %v4457_v26  ;;  %v1146_v54 = vmul.f32 %v4171_v13, %v4457_v26  ;;  %v4554_v44 = vmul.f32 %v1528_v34, %v1016_v59  ;;  %v1390_v41 = vld [vmem:[%s3929_s6 + $0x4c8] sm:$0xff]  ;;  %v1656_v34 = vld [vmem:[%s3935_s5 + $0x518] sm:$0xff] }
 0x1c0   : > { %v1147_v52 = vmul.f32 %v3998_v19, %v4457_v26  ;;  %v1148_v17 = vmul.f32 %v4009_v22, %v4457_v26  ;;  %v1141_v61 = vmul.f32 %v4166_v12, %v4459_v45  ;;  %v1394_v1 = vld [vmem:[%s3929_s6 + $0x4e8] sm:$0xff]  ;;  %v1142_v59 = vmul.f32 %v4171_v13, %v4459_v45 }
 0x1c1   : > { %6555 = vst [vmem:[#allocation45_spill] sm:$0xff] %v4544_v9  ;;  %6556 = vst [vmem:[#allocation46_spill] sm:$0xff] %v4554_v44  ;;  %v2910_v9 = vpack.c.bf16 %v2034_v24, %v2030_v55  ;;  %v4565_v20 = vmul.f32 %v1657_v60, %v1145_v23  ;;  %v4567_v30 = vmul.f32 %v1658_v21, %v1146_v54  ;;  %v1261_v44 = vld [vmem:[%s3929_s6 + $0xc0] sm:$0xff]  ;;  %v4590_v54 = vpop.permute.xlu1 %707 }
 0x1c2   : > { %v4574_v26 = vmul.f32 %v1659_v58, %v1147_v52  ;;  %v4576_v50 = vmul.f32 %v1660_v3, %v1148_v17  ;;  %v1143_v18 = vmul.f32 %v3998_v19, %v4459_v45  ;;  %v1144_v55 = vmul.f32 %v4009_v22, %v4459_v45  ;;  %v1389_v60 = vld [vmem:[%s3929_s6 + $0x4c0] sm:$0xff] }
 0x1c3   : > { %v1393_v21 = vld [vmem:[%s3929_s6 + $0x4e0] sm:$0xff]  ;;  %2911 = vmatprep.subr.bf16.mxu0 %v2910_v9  ;;  %v4584_v24 = vmul.f32 %v1653_v49, %v1141_v61  ;;  %v4586_v23 = vmul.f32 %v1654_v40, %v1142_v59  ;;  %v2158_v58 = vadd.f32 %v4482_v33, %v1390_v41  ;;  %v2162_v3 = vadd.f32 %v4463_v31, %v1394_v1  ;;  %v4599_v40 = vpop.permute.xlu0 %702  ;;  %v1539_v1 = vld [vmem:[%s3935_s5 + $0x170] sm:$0xff] }
 0x1c4   : > { %6557 = vst [vmem:[#allocation47_spill] sm:$0xff] %v4574_v26  ;;  %6558 = vst [vmem:[#allocation48_spill] sm:$0xff] %v4576_v50  ;;  %v4592_v52 = vmul.f32 %v1655_v53, %v1143_v18  ;;  %v4594_v17 = vmul.f32 %v1656_v34, %v1144_v55  ;;  %v2029_v45 = vadd.f32 %v4432_v11, %v1261_v44  ;;  %v1537_v49 = vld [vmem:[%s3935_s5 + $0x160] sm:$0xff]  ;;  %v1538_v18 = vld [vmem:[%s3935_s5 + $0x168] sm:$0xff] }
 0x1c5   : > { %v2033_v9 = vadd.f32 %v4409_v25, %v1265_v51  ;;  %v3038_v61 = vpack.c.bf16 %v2162_v3, %v2158_v58  ;;  %v2157_v33 = vadd.f32 %v4480_v14, %v1389_v60  ;;  %v2161_v31 = vadd.f32 %v4461_v6, %v1393_v21  ;;  %v1540_v53 = vld [vmem:[%s3935_s5 + $0x178] sm:$0xff]  ;;  %v1533_v41 = vld [vmem:[%s3935_s5 + $0x140] sm:$0xff]  ;;  %v1534_v6 = vld [vmem:[%s3935_s5 + $0x148] sm:$0xff] }
 0x1c6   : > { %6559 = vst [vmem:[#allocation49_spill] sm:$0xff] %v4592_v52  ;;  %6560 = vst [vmem:[#allocation50_spill] sm:$0xff] %v4594_v17  ;;  %v1025_v11 = vmul.f32 %v4166_v12, %v4493_v57  ;;  %v1026_v25 = vmul.f32 %v4171_v13, %v4493_v57  ;;  %v1027_v51 = vmul.f32 %v3998_v19, %v4493_v57  ;;  %v1270_v34 = vld [vmem:[%s3929_s6 + $0x108] sm:$0xff]  ;;  %v1535_v60 = vld [vmem:[%s3935_s5 + $0x150] sm:$0xff] }
 0x1c7   : > { %v2912_v44 = vpack.c.bf16 %v2033_v9, %v2029_v45  ;;  %v1028_v14 = vmul.f32 %v4009_v22, %v4493_v57  ;;  %3039 = vmatprep.subr.bf16.mxu1 %v3038_v61  ;;  %v3040_v59 = vpack.c.bf16 %v2161_v31, %v2157_v33  ;;  %v1021_v21 = vmul.f32 %v4166_v12, %v4495_v0  ;;  %v1274_v3 = vld [vmem:[%s3929_s6 + $0x128] sm:$0xff]  ;;  %v1665_v33 = vld [vmem:[%s3935_s5 + $0x560] sm:$0xff] }
 0x1c8   : > { %v4617_v55 = vmul.f32 %v1537_v49, %v1025_v11  ;;  %v1022_v58 = vmul.f32 %v4171_v13, %v4495_v0  ;;  %v4625_v57 = vmul.f32 %v1538_v18, %v1026_v25  ;;  %v4627_v45 = vmul.f32 %v1539_v1, %v1027_v51  ;;  %v1536_v49 = vld [vmem:[%s3935_s5 + $0x158] sm:$0xff]  ;;  %v4645_v51 = vpop.permute.xlu1 %867  ;;  %v1273_v50 = vld [vmem:[%s3929_s6 + $0x120] sm:$0xff] }
 0x1c9   : > { %2913 = vmatpush1.bf16.xpose.msra.mxu0 %v2912_v44  ;;  %v4629_v9 = vmul.f32 %v1540_v53, %v1028_v14  ;;  %v1023_v61 = vmul.f32 %v3998_v19, %v4495_v0  ;;  %3041 = vmatpush1.bf16.xpose.msra.mxu1 %v3040_v59  ;;  %v1024_v31 = vmul.f32 %v4009_v22, %v4495_v0  ;;  %v1666_v53 = vld [vmem:[%s3935_s5 + $0x568] sm:$0xff]  ;;  %v1667_v44 = vld [vmem:[%s3935_s5 + $0x570] sm:$0xff]  ;;  %v1668_v25 = vld [vmem:[%s3935_s5 + $0x578] sm:$0xff] }
 0x1ca   : > { %6561 = vst [vmem:[#allocation51_spill] sm:$0xff] %v4627_v45  ;;  %v4637_v11 = vmul.f32 %v1533_v41, %v1021_v21  ;;  %v4639_v18 = vmul.f32 %v1534_v6, %v1022_v58  ;;  %v2038_v1 = vadd.f32 %v4536_v2, %v1270_v34  ;;  %v2042_v59 = vadd.f32 %v4521_v10, %v1274_v3  ;;  %v1661_v2 = vld [vmem:[%s3935_s5 + $0x540] sm:$0xff]  ;;  %v1662_v6 = vld [vmem:[%s3935_s5 + $0x548] sm:$0xff]  ;;  %v1663_v34 = vld [vmem:[%s3935_s5 + $0x550] sm:$0xff]  ;;  %v4657_v21 = vpop.permute.xlu0 %862 }
 0x1cb   : > { %6562 = vst [vmem:[#allocation52_spill] sm:$0xff] %v4629_v9  ;;  %v4647_v14 = vmul.f32 %v1535_v60, %v1023_v61  ;;  %v1153_v0 = vmul.f32 %v4166_v12, %v4530_v8  ;;  %v1154_v41 = vmul.f32 %v4171_v13, %v4530_v8  ;;  %v4659_v58 = vmul.f32 %v1536_v49, %v1024_v31  ;;  %v1398_v61 = vld [vmem:[%s3929_s6 + $0x508] sm:$0xff]  ;;  %v1664_v49 = vld [vmem:[%s3935_s5 + $0x558] sm:$0xff] }
 0x1cc   : > { %v1155_v60 = vmul.f32 %v3998_v19, %v4530_v8  ;;  %v1156_v10 = vmul.f32 %v4009_v22, %v4530_v8  ;;  %v1149_v3 = vmul.f32 %v4166_v12, %v4542_v7  ;;  %v1402_v45 = vld [vmem:[%s3929_s6 + $0x528] sm:$0xff]  ;;  %v2914_v9 = vpack.c.bf16 %v2042_v59, %v2038_v1  ;;  %v1397_v1 = vld [vmem:[%s3929_s6 + $0x500] sm:$0xff] }
 0x1cd   : > { %6563 = vst [vmem:[#allocation53_spill] sm:$0xff] %v4647_v14  ;;  %6564 = vst [vmem:[#allocation54_spill] sm:$0xff] %v4659_v58  ;;  %v2270_v14 = vld [vmem:[%s3922_s11 + $0x8] sm:$0xff]  ;;  %v4670_v26 = vmul.f32 %v1665_v33, %v1153_v0  ;;  %v4672_v52 = vmul.f32 %v1666_v53, %v1154_v41  ;;  %v1150_v31 = vmul.f32 %v4171_v13, %v4542_v7  ;;  %v1269_v58 = vld [vmem:[%s3929_s6 + $0x100] sm:$0xff] }
 0x1ce   : > { %2341 = vmatprep.mubr.f32.mxu0 %v2270_v14  ;;  %v4679_v8 = vmul.f32 %v1667_v44, %v1155_v60  ;;  %v4681_v17 = vmul.f32 %v1668_v25, %v1156_v10  ;;  %v1151_v29 = vmul.f32 %v3998_v19, %v4542_v7  ;;  %v1152_v33 = vmul.f32 %v4009_v22, %v4542_v7  ;;  %v1401_v53 = vld [vmem:[%s3929_s6 + $0x520] sm:$0xff] }
 0x1cf   : > { %2495 = vmatprep.mubr.f32.mxu1 %v2270_v14  ;;  %2915 = vmatprep.subr.bf16.mxu0 %v2914_v9  ;;  %v4689_v59 = vmul.f32 %v1661_v2, %v1149_v3  ;;  %v4691_v44 = vmul.f32 %v1662_v6, %v1150_v31  ;;  %v2166_v25 = vadd.f32 %v4586_v23, %v1398_v61  ;;  %v1545_v9 = vld [vmem:[%s3935_s5 + $0x1a0] sm:$0xff]  ;;  %v4702_v2 = vpop.permute.xlu1 %717  ;;  %v1542_v3 = vld [vmem:[%s3935_s5 + $0x188] sm:$0xff] }
 0x1d0   : > { %6565 = vst [vmem:[#allocation55_spill] sm:$0xff] %v4679_v8  ;;  %6566 = vst [vmem:[#allocation56_spill] sm:$0xff] %v4681_v17  ;;  %v2170_v0 = vadd.f32 %v4567_v30, %v1402_v45  ;;  %v4695_v41 = vmul.f32 %v1663_v34, %v1151_v29  ;;  %v4697_v60 = vmul.f32 %v1664_v49, %v1152_v33  ;;  %v1546_v30 = vld [vmem:[%s3935_s5 + $0x1a8] sm:$0xff]  ;;  %v1547_v29 = vld [vmem:[%s3935_s5 + $0x1b0] sm:$0xff]  ;;  %v4711_v34 = vpop.permute.xlu0 %712 }
 0x1d1   : > { %v2037_v7 = vadd.f32 %v4534_v15, %v1269_v58  ;;  %v2041_v14 = vadd.f32 %v4513_v46, %v1273_v50  ;;  %v2165_v10 = vadd.f32 %v4584_v24, %v1397_v1  ;;  %v2169_v23 = vadd.f32 %v4565_v20, %v1401_v53  ;;  %v1548_v45 = vld [vmem:[%s3935_s5 + $0x1b8] sm:$0xff]  ;;  %v1541_v24 = vld [vmem:[%s3935_s5 + $0x180] sm:$0xff]  ;;  %v1278_v61 = vld [vmem:[%s3929_s6 + $0x148] sm:$0xff] }
 0x1d2   : > { %6567 = vst [vmem:[#allocation57_spill] sm:$0xff] %v4695_v41  ;;  %v3042_v6 = vpack.c.bf16 %v2170_v0, %v2166_v25  ;;  %v1033_v15 = vmul.f32 %v4166_v12, %v4590_v54  ;;  %v1034_v46 = vmul.f32 %v4171_v13, %v4590_v54  ;;  %v1035_v58 = vmul.f32 %v3998_v19, %v4590_v54  ;;  %v1543_v33 = vld [vmem:[%s3935_s5 + $0x190] sm:$0xff]  ;;  %v1282_v25 = vld [vmem:[%s3929_s6 + $0x168] sm:$0xff] }
 0x1d3   : > { %v2916_v50 = vpack.c.bf16 %v2041_v14, %v2037_v7  ;;  %v1036_v20 = vmul.f32 %v4009_v22, %v4590_v54  ;;  %v3044_v49 = vpack.c.bf16 %v2169_v23, %v2165_v10  ;;  %v1029_v1 = vmul.f32 %v4166_v12, %v4599_v40  ;;  %v1544_v14 = vld [vmem:[%s3935_s5 + $0x198] sm:$0xff] }
 0x1d4   : > { %3043 = vmatprep.subr.bf16.mxu1 %v3042_v6  ;;  %v4722_v31 = vmul.f32 %v1545_v9, %v1033_v15  ;;  %v1030_v53 = vmul.f32 %v4171_v13, %v4599_v40  ;;  %v4730_v54 = vmul.f32 %v1546_v30, %v1034_v46  ;;  %v4732_v0 = vmul.f32 %v1547_v29, %v1035_v58  ;;  %v1673_v29 = vld [vmem:[%s3935_s5 + $0x5a0] sm:$0xff]  ;;  %v1675_v46 = vld [vmem:[%s3935_s5 + $0x5b0] sm:$0xff]  ;;  %v1676_v58 = vld [vmem:[%s3935_s5 + $0x5b8] sm:$0xff] }
 0x1d5   : > { %2917 = vmatpush1.bf16.xpose.msra.mxu0 %v2916_v50  ;;  %v4734_v7 = vmul.f32 %v1548_v45, %v1036_v20  ;;  %v1031_v9 = vmul.f32 %v3998_v19, %v4599_v40  ;;  %3045 = vmatpush1.bf16.xpose.msra.mxu1 %v3044_v49  ;;  %v1032_v6 = vmul.f32 %v4009_v22, %v4599_v40  ;;  %v1674_v45 = vld [vmem:[%s3935_s5 + $0x5a8] sm:$0xff] }
 0x1d6   : > { %6568 = vst [vmem:[#allocation58_spill] sm:$0xff] %v4732_v0  ;;  %v4741_v10 = vmul.f32 %v1541_v24, %v1029_v1  ;;  %v4743_v23 = vmul.f32 %v1542_v3, %v1030_v53  ;;  %v2046_v30 = vadd.f32 %v4639_v18, %v1278_v61  ;;  %v2050_v50 = vadd.f32 %v4625_v57, %v1282_v25  ;;  %v1669_v24 = vld [vmem:[%s3935_s5 + $0x580] sm:$0xff]  ;;  %v4759_v3 = vpop.permute.xlu1 %877  ;;  %v1406_v53 = vld [vmem:[%s3929_s6 + $0x548] sm:$0xff] }
 0x1d7   : > { %6569 = vst [vmem:[#allocation59_spill] sm:$0xff] %v4734_v7  ;;  %v4748_v15 = vmul.f32 %v1543_v33, %v1031_v9  ;;  %v1161_v40 = vmul.f32 %v4166_v12, %v4645_v51  ;;  %v1162_v20 = vmul.f32 %v4171_v13, %v4645_v51  ;;  %v1277_v18 = vld [vmem:[%s3929_s6 + $0x140] sm:$0xff]  ;;  %v4761_v61 = vmul.f32 %v1544_v14, %v1032_v6  ;;  %v1670_v33 = vld [vmem:[%s3935_s5 + $0x588] sm:$0xff]  ;;  %v4772_v9 = vpop.permute.xlu0 %872  ;;  %v1671_v6 = vld [vmem:[%s3935_s5 + $0x590] sm:$0xff] }
 0x1d8   : > { %v1163_v57 = vmul.f32 %v3998_v19, %v4645_v51  ;;  %v1164_v49 = vmul.f32 %v4009_v22, %v4645_v51  ;;  %v1157_v1 = vmul.f32 %v4166_v12, %v4657_v21  ;;  %v1410_v25 = vld [vmem:[%s3929_s6 + $0x568] sm:$0xff]  ;;  %v2918_v0 = vpack.c.bf16 %v2050_v50, %v2046_v30  ;;  %v1672_v7 = vld [vmem:[%s3935_s5 + $0x598] sm:$0xff] }
 0x1d9   : > { %6570 = vst [vmem:[#allocation60_spill] sm:$0xff] %v4748_v15  ;;  %6571 = vst [vmem:[#allocation61_spill] sm:$0xff] %v4761_v61  ;;  %v4774_v15 = vmul.f32 %v1673_v29, %v1161_v40  ;;  %v4776_v14 = vmul.f32 %v1674_v45, %v1162_v20  ;;  %v1158_v51 = vmul.f32 %v4171_v13, %v4657_v21  ;;  %v1281_v61 = vld [vmem:[%s3929_s6 + $0x160] sm:$0xff] }
 0x1da   : > { %v4783_v8 = vmul.f32 %v1675_v46, %v1163_v57  ;;  %v4785_v41 = vmul.f32 %v1676_v58, %v1164_v49  ;;  %v1159_v17 = vmul.f32 %v3998_v19, %v4657_v21  ;;  %v1160_v30 = vmul.f32 %v4009_v22, %v4657_v21  ;;  %v1405_v29 = vld [vmem:[%s3929_s6 + $0x540] sm:$0xff]  ;;  %2919 = vmatprep.subr.bf16.mxu0 %v2918_v0 }
 0x1db   : > { %v1409_v45 = vld [vmem:[%s3929_s6 + $0x560] sm:$0xff]  ;;  %v4793_v50 = vmul.f32 %v1669_v24, %v1157_v1  ;;  %v4795_v40 = vmul.f32 %v1670_v33, %v1158_v51  ;;  %v2174_v46 = vadd.f32 %v4691_v44, %v1406_v53  ;;  %v2178_v58 = vadd.f32 %v4672_v52, %v1410_v25  ;;  %v1554_v44 = vld [vmem:[%s3935_s5 + $0x1e8] sm:$0xff]  ;;  %v1555_v52 = vld [vmem:[%s3935_s5 + $0x1f0] sm:$0xff]  ;;  %v4813_v53 = vpop.permute.xlu1 %727 }
 0x1dc   : > { %6572 = vst [vmem:[#allocation62_spill] sm:$0xff] %v4783_v8  ;;  %6573 = vst [vmem:[#allocation63_spill] sm:$0xff] %v4785_v41  ;;  %v4799_v20 = vmul.f32 %v1671_v6, %v1159_v17  ;;  %v4801_v57 = vmul.f32 %v1672_v7, %v1160_v30  ;;  %v2045_v21 = vadd.f32 %v4637_v11, %v1277_v18  ;;  %v1553_v0 = vld [vmem:[%s3935_s5 + $0x1e0] sm:$0xff]  ;;  %v1556_v17 = vld [vmem:[%s3935_s5 + $0x1f8] sm:$0xff]  ;;  %v4824_v6 = vpop.permute.xlu0 %722 }
 0x1dd   : > { %v2049_v49 = vadd.f32 %v4617_v55, %v1281_v61  ;;  %v3046_v24 = vpack.c.bf16 %v2178_v58, %v2174_v46  ;;  %v2173_v33 = vadd.f32 %v4689_v59, %v1405_v29  ;;  %v2177_v1 = vadd.f32 %v4670_v26, %v1409_v45  ;;  %v1549_v59 = vld [vmem:[%s3935_s5 + $0x1c0] sm:$0xff]  ;;  %v1550_v61 = vld [vmem:[%s3935_s5 + $0x1c8] sm:$0xff]  ;;  %v1551_v29 = vld [vmem:[%s3935_s5 + $0x1d0] sm:$0xff] }
 0x1de   : > { %6574 = vst [vmem:[#allocation64_spill] sm:$0xff] %v4799_v20  ;;  %6575 = vst [vmem:[#allocation65_spill] sm:$0xff] %v4801_v57  ;;  %v1041_v7 = vmul.f32 %v4166_v12, %v4702_v2  ;;  %v1042_v55 = vmul.f32 %v4171_v13, %v4702_v2  ;;  %v1043_v18 = vmul.f32 %v3998_v19, %v4702_v2  ;;  %v1286_v25 = vld [vmem:[%s3929_s6 + $0x188] sm:$0xff]  ;;  %v1445_v57 = vld [vmem:[%s3929_s6 + $0x680] sm:$0xff] }
 0x1df   : > { %v2920_v11 = vpack.c.bf16 %v2049_v49, %v2045_v21  ;;  %v1044_v26 = vmul.f32 %v4009_v22, %v4702_v2  ;;  %3047 = vmatprep.subr.bf16.mxu1 %v3046_v24  ;;  %v3048_v51 = vpack.c.bf16 %v2177_v1, %v2173_v33  ;;  %v1037_v45 = vmul.f32 %v4166_v12, %v4711_v34  ;;  %v1290_v2 = vld [vmem:[%s3929_s6 + $0x1a8] sm:$0xff] }
 0x1e0   : > { %v4826_v30 = vmul.f32 %v1553_v0, %v1041_v7  ;;  %v1038_v46 = vmul.f32 %v4171_v13, %v4711_v34  ;;  %v4834_v58 = vmul.f32 %v1554_v44, %v1042_v55  ;;  %v4836_v21 = vmul.f32 %v1555_v52, %v1043_v18  ;;  %v1552_v0 = vld [vmem:[%s3935_s5 + $0x1d8] sm:$0xff]  ;;  %v1681_v52 = vld [vmem:[%s3935_s5 + $0x5e0] sm:$0xff]  ;;  %v1683_v18 = vld [vmem:[%s3935_s5 + $0x5f0] sm:$0xff]  ;;  %v4885_v8 = vpop.permute.xlu0 %882 }
 0x1e1   : > { %2921 = vmatpush1.bf16.xpose.msra.mxu0 %v2920_v11  ;;  %v4838_v49 = vmul.f32 %v1556_v17, %v1044_v26  ;;  %v1039_v24 = vmul.f32 %v3998_v19, %v4711_v34  ;;  %3049 = vmatpush1.bf16.xpose.msra.mxu1 %v3048_v51  ;;  %v1040_v33 = vmul.f32 %v4009_v22, %v4711_v34  ;;  %v1682_v17 = vld [vmem:[%s3935_s5 + $0x5e8] sm:$0xff]  ;;  %v1684_v26 = vld [vmem:[%s3935_s5 + $0x5f8] sm:$0xff] }
 0x1e2   : > { %6576 = vst [vmem:[#allocation66_spill] sm:$0xff] %v4836_v21  ;;  %v4845_v1 = vmul.f32 %v1549_v59, %v1037_v45  ;;  %v4847_v7 = vmul.f32 %v1550_v61, %v1038_v46  ;;  %v2054_v44 = vadd.f32 %v4743_v23, %v1286_v25  ;;  %v2058_v55 = vadd.f32 %v4730_v54, %v1290_v2  ;;  %v1677_v61 = vld [vmem:[%s3935_s5 + $0x5c0] sm:$0xff]  ;;  %v1414_v46 = vld [vmem:[%s3929_s6 + $0x588] sm:$0xff] }
 0x1e3   : > { %6577 = vst [vmem:[#allocation67_spill] sm:$0xff] %v4838_v49  ;;  %v4852_v11 = vmul.f32 %v1551_v29, %v1039_v24  ;;  %v1169_v34 = vmul.f32 %v4166_v12, %v4759_v3  ;;  %v1170_v59 = vmul.f32 %v4171_v13, %v4759_v3  ;;  %v1285_v23 = vld [vmem:[%s3929_s6 + $0x180] sm:$0xff]  ;;  %v4863_v25 = vmul.f32 %v1552_v0, %v1040_v33  ;;  %v1678_v29 = vld [vmem:[%s3935_s5 + $0x5c8] sm:$0xff]  ;;  %v4874_v24 = vpop.permute.xlu1 %887  ;;  %v1679_v33 = vld [vmem:[%s3935_s5 + $0x5d0] sm:$0xff] }
 0x1e4   : > { %v1171_v51 = vmul.f32 %v3998_v19, %v4759_v3  ;;  %v1172_v54 = vmul.f32 %v4009_v22, %v4759_v3  ;;  %v1165_v45 = vmul.f32 %v4166_v12, %v4772_v9  ;;  %v1418_v2 = vld [vmem:[%s3929_s6 + $0x5a8] sm:$0xff]  ;;  %v2922_v21 = vpack.c.bf16 %v2058_v55, %v2054_v44  ;;  %v1680_v49 = vld [vmem:[%s3935_s5 + $0x5d8] sm:$0xff]  ;;  %v1417_v55 = vld [vmem:[%s3929_s6 + $0x5a0] sm:$0xff] }
 0x1e5   : > { %6578 = vst [vmem:[#allocation68_spill] sm:$0xff] %v4852_v11  ;;  %6579 = vst [vmem:[#allocation69_spill] sm:$0xff] %v4863_v25  ;;  %v4876_v11 = vmul.f32 %v1681_v52, %v1169_v34  ;;  %v4878_v0 = vmul.f32 %v1682_v17, %v1170_v59  ;;  %v1166_v3 = vmul.f32 %v4171_v13, %v4772_v9  ;;  %v1289_v25 = vld [vmem:[%s3929_s6 + $0x1a0] sm:$0xff] }
 0x1e6   : > { %v4887_v20 = vmul.f32 %v1683_v18, %v1171_v51  ;;  %v4889_v41 = vmul.f32 %v1684_v26, %v1172_v54  ;;  %v1167_v44 = vmul.f32 %v3998_v19, %v4772_v9  ;;  %v1168_v52 = vmul.f32 %v4009_v22, %v4772_v9  ;;  %v1413_v17 = vld [vmem:[%s3929_s6 + $0x580] sm:$0xff]  ;;  %2923 = vmatprep.subr.bf16.mxu0 %v2922_v21 }
 0x1e7   : > { %v4897_v34 = vmul.f32 %v1677_v61, %v1165_v45  ;;  %v4899_v59 = vmul.f32 %v1678_v29, %v1166_v3  ;;  %v2182_v18 = vadd.f32 %v4795_v40, %v1414_v46  ;;  %v2186_v26 = vadd.f32 %v4776_v14, %v1418_v2  ;;  %v1561_v21 = vld [vmem:[%s3935_s5 + $0x220] sm:$0xff]  ;;  %v1562_v40 = vld [vmem:[%s3935_s5 + $0x228] sm:$0xff]  ;;  %v1563_v14 = vld [vmem:[%s3935_s5 + $0x230] sm:$0xff] }
 0x1e8   : > { %6580 = vst [vmem:[#allocation70_spill] sm:$0xff] %v4887_v20  ;;  %6581 = vst [vmem:[#allocation71_spill] sm:$0xff] %v4889_v41  ;;  %v4903_v51 = vmul.f32 %v1679_v33, %v1167_v44  ;;  %v4905_v54 = vmul.f32 %v1680_v49, %v1168_v52  ;;  %v2053_v9 = vadd.f32 %v4741_v10, %v1285_v23  ;;  %v1564_v46 = vld [vmem:[%s3935_s5 + $0x238] sm:$0xff]  ;;  %v1557_v23 = vld [vmem:[%s3935_s5 + $0x200] sm:$0xff]  ;;  %v4926_v33 = vpop.permute.xlu1 %737 }
 0x1e9   : > { %v2057_v20 = vadd.f32 %v4722_v31, %v1289_v25  ;;  %v3050_v61 = vpack.c.bf16 %v2186_v26, %v2182_v18  ;;  %v2181_v29 = vadd.f32 %v4793_v50, %v1413_v17  ;;  %v2185_v45 = vadd.f32 %v4774_v15, %v1417_v55  ;;  %v1558_v15 = vld [vmem:[%s3935_s5 + $0x208] sm:$0xff]  ;;  %v4936_v55 = vpop.permute.xlu0 %732 }
 0x1ea   : > { %6582 = vst [vmem:[#allocation72_spill] sm:$0xff] %v4903_v51  ;;  %6583 = vst [vmem:[#allocation73_spill] sm:$0xff] %v4905_v54  ;;  %v1049_v49 = vmul.f32 %v4166_v12, %v4813_v53  ;;  %v1050_v10 = vmul.f32 %v4171_v13, %v4813_v53  ;;  %v1051_v31 = vmul.f32 %v3998_v19, %v4813_v53  ;;  %v1294_v25 = vld [vmem:[%s3929_s6 + $0x1c8] sm:$0xff] }
 0x1eb   : > { %v2924_v2 = vpack.c.bf16 %v2057_v20, %v2053_v9  ;;  %v1052_v50 = vmul.f32 %v4009_v22, %v4813_v53  ;;  %3051 = vmatprep.subr.bf16.mxu1 %v3050_v61  ;;  %v3052_v3 = vpack.c.bf16 %v2185_v45, %v2181_v29  ;;  %v1559_v20 = vld [vmem:[%s3935_s5 + $0x210] sm:$0xff]  ;;  %v1045_v52 = vmul.f32 %v4166_v12, %v4824_v6  ;;  %v1298_v53 = vld [vmem:[%s3929_s6 + $0x1e8] sm:$0xff] }
 0x1ec   : > { %v4928_v44 = vmul.f32 %v1561_v21, %v1049_v49  ;;  %v1046_v17 = vmul.f32 %v4171_v13, %v4824_v6  ;;  %v4938_v18 = vmul.f32 %v1562_v40, %v1050_v10  ;;  %v4940_v26 = vmul.f32 %v1563_v14, %v1051_v31  ;;  %v1560_v21 = vld [vmem:[%s3935_s5 + $0x218] sm:$0xff]  ;;  %v1689_v14 = vld [vmem:[%s3935_s5 + $0x620] sm:$0xff]  ;;  %v1691_v31 = vld [vmem:[%s3935_s5 + $0x630] sm:$0xff] }
 0x1ed   : > { %2925 = vmatpush1.bf16.xpose.msra.mxu0 %v2924_v2  ;;  %v4942_v9 = vmul.f32 %v1564_v46, %v1052_v50  ;;  %v1047_v61 = vmul.f32 %v3998_v19, %v4824_v6  ;;  %3053 = vmatpush1.bf16.xpose.msra.mxu1 %v3052_v3  ;;  %v1048_v29 = vmul.f32 %v4009_v22, %v4824_v6  ;;  %v1690_v46 = vld [vmem:[%s3935_s5 + $0x628] sm:$0xff]  ;;  %v1692_v50 = vld [vmem:[%s3935_s5 + $0x638] sm:$0xff] }
 0x1ee   : > { %6584 = vst [vmem:[#allocation74_spill] sm:$0xff] %v4940_v26  ;;  %v4949_v45 = vmul.f32 %v1557_v23, %v1045_v52  ;;  %v4951_v49 = vmul.f32 %v1558_v15, %v1046_v17  ;;  %v2062_v40 = vadd.f32 %v4847_v7, %v1294_v25  ;;  %v2066_v10 = vadd.f32 %v4834_v58, %v1298_v53  ;;  %v1685_v7 = vld [vmem:[%s3935_s5 + $0x600] sm:$0xff]  ;;  %v1422_v17 = vld [vmem:[%s3929_s6 + $0x5c8] sm:$0xff] }
 0x1ef   : > { %6585 = vst [vmem:[#allocation75_spill] sm:$0xff] %v4942_v9  ;;  %v4956_v2 = vmul.f32 %v1559_v20, %v1047_v61  ;;  %v1177_v6 = vmul.f32 %v4166_v12, %v4874_v24  ;;  %v1178_v23 = vmul.f32 %v4171_v13, %v4874_v24  ;;  %v1293_v15 = vld [vmem:[%s3929_s6 + $0x1c0] sm:$0xff]  ;;  %v4967_v25 = vmul.f32 %v1560_v21, %v1048_v29  ;;  %v1686_v20 = vld [vmem:[%s3935_s5 + $0x608] sm:$0xff]  ;;  %v1687_v21 = vld [vmem:[%s3935_s5 + $0x610] sm:$0xff] }
 0x1f0   : > { %v1179_v3 = vmul.f32 %v3998_v19, %v4874_v24  ;;  %v1180_v58 = vmul.f32 %v4009_v22, %v4874_v24  ;;  %v1173_v52 = vmul.f32 %v4166_v12, %v4885_v8  ;;  %v1426_v53 = vld [vmem:[%s3929_s6 + $0x5e8] sm:$0xff]  ;;  %v2926_v61 = vpack.c.bf16 %v2066_v10, %v2062_v40  ;;  %v1688_v29 = vld [vmem:[%s3935_s5 + $0x618] sm:$0xff]  ;;  %v4987_v24 = vpop.permute.xlu1 %897  ;;  %v1425_v10 = vld [vmem:[%s3929_s6 + $0x5e0] sm:$0xff] }
 0x1f1   : > { %6586 = vst [vmem:[#allocation76_spill] sm:$0xff] %v4956_v2  ;;  %6587 = vst [vmem:[#allocation77_spill] sm:$0xff] %v4967_v25  ;;  %v4978_v26 = vmul.f32 %v1689_v14, %v1177_v6  ;;  %v4980_v2 = vmul.f32 %v1690_v46, %v1178_v23  ;;  %v1174_v9 = vmul.f32 %v4171_v13, %v4885_v8  ;;  %v1297_v25 = vld [vmem:[%s3929_s6 + $0x1e0] sm:$0xff]  ;;  %v4999_v6 = vpop.permute.xlu0 %892 }
 0x1f2   : > { %v4989_v51 = vmul.f32 %v1691_v31, %v1179_v3  ;;  %v4991_v41 = vmul.f32 %v1692_v50, %v1180_v58  ;;  %v1175_v40 = vmul.f32 %v3998_v19, %v4885_v8  ;;  %v1176_v14 = vmul.f32 %v4009_v22, %v4885_v8  ;;  %v1421_v46 = vld [vmem:[%s3929_s6 + $0x5c0] sm:$0xff]  ;;  %2927 = vmatprep.subr.bf16.mxu0 %v2926_v61 }
 0x1f3   : > { %v5001_v23 = vmul.f32 %v1685_v7, %v1173_v52  ;;  %v5003_v31 = vmul.f32 %v1686_v20, %v1174_v9  ;;  %v2190_v50 = vadd.f32 %v4899_v59, %v1422_v17  ;;  %v2194_v3 = vadd.f32 %v4878_v0, %v1426_v53  ;;  %v1569_v61 = vld [vmem:[%s3935_s5 + $0x260] sm:$0xff]  ;;  %v1570_v20 = vld [vmem:[%s3935_s5 + $0x268] sm:$0xff]  ;;  %v1571_v0 = vld [vmem:[%s3935_s5 + $0x270] sm:$0xff] }
 0x1f4   : > { %6588 = vst [vmem:[#allocation78_spill] sm:$0xff] %v4989_v51  ;;  %6589 = vst [vmem:[#allocation79_spill] sm:$0xff] %v4991_v41  ;;  %v5007_v58 = vmul.f32 %v1687_v21, %v1175_v40  ;;  %v5009_v8 = vmul.f32 %v1688_v29, %v1176_v14  ;;  %v2061_v51 = vadd.f32 %v4845_v1, %v1293_v15  ;;  %v1572_v52 = vld [vmem:[%s3935_s5 + $0x278] sm:$0xff]  ;;  %v1565_v15 = vld [vmem:[%s3935_s5 + $0x240] sm:$0xff] }
 0x1f5   : > { %v2065_v41 = vadd.f32 %v4826_v30, %v1297_v25  ;;  %v3054_v7 = vpack.c.bf16 %v2194_v3, %v2190_v50  ;;  %v2189_v9 = vadd.f32 %v4897_v34, %v1421_v46  ;;  %v2193_v59 = vadd.f32 %v4876_v11, %v1425_v10  ;;  %v1566_v11 = vld [vmem:[%s3935_s5 + $0x248] sm:$0xff]  ;;  %v1567_v40 = vld [vmem:[%s3935_s5 + $0x250] sm:$0xff]  ;;  %v5038_v46 = vpop.permute.xlu1 %747  ;;  %v1568_v3 = vld [vmem:[%s3935_s5 + $0x258] sm:$0xff] }
 0x1f6   : > { %6590 = vst [vmem:[#allocation80_spill] sm:$0xff] %v5007_v58  ;;  %6591 = vst [vmem:[#allocation81_spill] sm:$0xff] %v5009_v8  ;;  %v1057_v17 = vmul.f32 %v4166_v12, %v4926_v33  ;;  %v1058_v1 = vmul.f32 %v4171_v13, %v4926_v33  ;;  %v1059_v30 = vmul.f32 %v3998_v19, %v4926_v33  ;;  %v1302_v25 = vld [vmem:[%s3929_s6 + $0x208] sm:$0xff] }
 0x1f7   : > { %v2928_v53 = vpack.c.bf16 %v2065_v41, %v2061_v51  ;;  %v1060_v34 = vmul.f32 %v4009_v22, %v4926_v33  ;;  %3055 = vmatprep.subr.bf16.mxu1 %v3054_v7  ;;  %v3056_v21 = vpack.c.bf16 %v2193_v59, %v2189_v9  ;;  %v1053_v41 = vmul.f32 %v4166_v12, %v4936_v55  ;;  %v1306_v14 = vld [vmem:[%s3929_s6 + $0x228] sm:$0xff]  ;;  %v5049_v7 = vpop.permute.xlu0 %742 }
 0x1f8   : > { %v5030_v29 = vmul.f32 %v1569_v61, %v1057_v17  ;;  %v1054_v51 = vmul.f32 %v4171_v13, %v4936_v55  ;;  %v5040_v33 = vmul.f32 %v1570_v20, %v1058_v1  ;;  %v5042_v10 = vmul.f32 %v1571_v0, %v1059_v30  ;;  %v1698_v17 = vld [vmem:[%s3935_s5 + $0x668] sm:$0xff]  ;;  %v1699_v30 = vld [vmem:[%s3935_s5 + $0x670] sm:$0xff] }
 0x1f9   : > { %2929 = vmatpush1.bf16.xpose.msra.mxu0 %v2928_v53  ;;  %v5044_v50 = vmul.f32 %v1572_v52, %v1060_v34  ;;  %v1055_v61 = vmul.f32 %v3998_v19, %v4936_v55  ;;  %3057 = vmatpush1.bf16.xpose.msra.mxu1 %v3056_v21  ;;  %v1056_v9 = vmul.f32 %v4009_v22, %v4936_v55  ;;  %v1697_v52 = vld [vmem:[%s3935_s5 + $0x660] sm:$0xff]  ;;  %v1700_v34 = vld [vmem:[%s3935_s5 + $0x678] sm:$0xff] }
 0x1fa   : > { %6592 = vst [vmem:[#allocation82_spill] sm:$0xff] %v5042_v10  ;;  %v5053_v59 = vmul.f32 %v1565_v15, %v1053_v41  ;;  %v5055_v20 = vmul.f32 %v1566_v11, %v1054_v51  ;;  %v2070_v0 = vadd.f32 %v4951_v49, %v1302_v25  ;;  %v2074_v1 = vadd.f32 %v4938_v18, %v1306_v14  ;;  %v1693_v49 = vld [vmem:[%s3935_s5 + $0x640] sm:$0xff]  ;;  %v1430_v51 = vld [vmem:[%s3929_s6 + $0x608] sm:$0xff] }
 0x1fb   : > { %6593 = vst [vmem:[#allocation83_spill] sm:$0xff] %v5044_v50  ;;  %v5060_v53 = vmul.f32 %v1567_v40, %v1055_v61  ;;  %v1185_v55 = vmul.f32 %v4166_v12, %v4987_v24  ;;  %v1186_v15 = vmul.f32 %v4171_v13, %v4987_v24  ;;  %v1301_v11 = vld [vmem:[%s3929_s6 + $0x200] sm:$0xff]  ;;  %v5071_v25 = vmul.f32 %v1568_v3, %v1056_v9  ;;  %v1694_v40 = vld [vmem:[%s3935_s5 + $0x648] sm:$0xff]  ;;  %v1695_v3 = vld [vmem:[%s3935_s5 + $0x650] sm:$0xff] }
 0x1fc   : > { %v1187_v21 = vmul.f32 %v3998_v19, %v4987_v24  ;;  %v1188_v18 = vmul.f32 %v4009_v22, %v4987_v24  ;;  %v1181_v41 = vmul.f32 %v4166_v12, %v4999_v6  ;;  %v1434_v14 = vld [vmem:[%s3929_s6 + $0x628] sm:$0xff]  ;;  %v2930_v61 = vpack.c.bf16 %v2074_v1, %v2070_v0  ;;  %v1696_v9 = vld [vmem:[%s3935_s5 + $0x658] sm:$0xff]  ;;  %v908_v1 = vpop.permute.xlu1 %907 }
 0x1fd   : > { %6594 = vst [vmem:[#allocation84_spill] sm:$0xff] %v5060_v53  ;;  %6595 = vst [vmem:[#allocation85_spill] sm:$0xff] %v5071_v25  ;;  %v5082_v10 = vmul.f32 %v1697_v52, %v1185_v55  ;;  %v5084_v53 = vmul.f32 %v1698_v17, %v1186_v15  ;;  %v1182_v50 = vmul.f32 %v4171_v13, %v4999_v6  ;;  %v1305_v25 = vld [vmem:[%s3929_s6 + $0x220] sm:$0xff] }
 0x1fe   : > { %v5091_v24 = vmul.f32 %v1699_v30, %v1187_v21  ;;  %v5093_v58 = vmul.f32 %v1700_v34, %v1188_v18  ;;  %v1183_v8 = vmul.f32 %v3998_v19, %v4999_v6  ;;  %v1184_v0 = vmul.f32 %v4009_v22, %v4999_v6  ;;  %v1429_v52 = vld [vmem:[%s3929_s6 + $0x600] sm:$0xff]  ;;  %2931 = vmatprep.subr.bf16.mxu0 %v2930_v61  ;;  %v5107_v21 = vpop.permute.xlu0 %902 }
 0x1ff   : > { %v1433_v17 = vld [vmem:[%s3929_s6 + $0x620] sm:$0xff]  ;;  %v5101_v55 = vmul.f32 %v1693_v49, %v1181_v41  ;;  %v5103_v30 = vmul.f32 %v1694_v40, %v1182_v50  ;;  %v2198_v34 = vadd.f32 %v5003_v31, %v1430_v51  ;;  %v2202_v15 = vadd.f32 %v4980_v2, %v1434_v14  ;;  %v1578_v31 = vld [vmem:[%s3935_s5 + $0x2a8] sm:$0xff]  ;;  %v1579_v51 = vld [vmem:[%s3935_s5 + $0x2b0] sm:$0xff] }
 0x200   : > { %6596 = vst [vmem:[#allocation86_spill] sm:$0xff] %v5091_v24  ;;  %6597 = vst [vmem:[#allocation87_spill] sm:$0xff] %v5093_v58  ;;  %v5109_v18 = vmul.f32 %v1695_v3, %v1183_v8  ;;  %v5111_v6 = vmul.f32 %v1696_v9, %v1184_v0  ;;  %v2069_v24 = vadd.f32 %v4949_v45, %v1301_v11  ;;  %v1577_v41 = vld [vmem:[%s3935_s5 + $0x2a0] sm:$0xff]  ;;  %v1580_v8 = vld [vmem:[%s3935_s5 + $0x2b8] sm:$0xff] }
 0x201   : > { %v2073_v49 = vadd.f32 %v4928_v44, %v1305_v25  ;;  %v3058_v50 = vpack.c.bf16 %v2202_v15, %v2198_v34  ;;  %v2197_v40 = vadd.f32 %v5001_v23, %v1429_v52  ;;  %v2201_v2 = vadd.f32 %v4978_v26, %v1433_v17  ;;  %v1573_v11 = vld [vmem:[%s3935_s5 + $0x280] sm:$0xff]  ;;  %v1574_v26 = vld [vmem:[%s3935_s5 + $0x288] sm:$0xff]  ;;  %v1575_v0 = vld [vmem:[%s3935_s5 + $0x290] sm:$0xff] }
 0x202   : > { %6598 = vst [vmem:[#allocation88_spill] sm:$0xff] %v5109_v18  ;;  %6599 = vst [vmem:[#allocation89_spill] sm:$0xff] %v5111_v6  ;;  %v1065_v14 = vmul.f32 %v4166_v12, %v5038_v46  ;;  %v1066_v45 = vmul.f32 %v4171_v13, %v5038_v46  ;;  %v1067_v44 = vmul.f32 %v3998_v19, %v5038_v46  ;;  %v1310_v25 = vld [vmem:[%s3929_s6 + $0x248] sm:$0xff]  ;;  %v1703_v18 = vld [vmem:[%s3935_s5 + $0x690] sm:$0xff] }
 0x203   : > { %v2932_v61 = vpack.c.bf16 %v2073_v49, %v2069_v24  ;;  %v1068_v23 = vmul.f32 %v4009_v22, %v5038_v46  ;;  %3059 = vmatprep.subr.bf16.mxu1 %v3058_v50  ;;  %v3060_v3 = vpack.c.bf16 %v2201_v2, %v2197_v40  ;;  %v1061_v24 = vmul.f32 %v4166_v12, %v5049_v7  ;;  %v1314_v17 = vld [vmem:[%s3929_s6 + $0x268] sm:$0xff]  ;;  %v1576_v49 = vld [vmem:[%s3935_s5 + $0x298] sm:$0xff]  ;;  %v758_v50 = vpop.permute.xlu1 %757 }
 0x204   : > { %v5132_v9 = vmul.f32 %v1577_v41, %v1065_v14  ;;  %v1062_v52 = vmul.f32 %v4171_v13, %v5049_v7  ;;  %v5140_v34 = vmul.f32 %v1578_v31, %v1066_v45  ;;  %v5142_v46 = vmul.f32 %v1579_v51, %v1067_v44  ;;  %v1706_v14 = vld [vmem:[%s3935_s5 + $0x6a8] sm:$0xff] }
 0x205   : > { %2933 = vmatpush1.bf16.xpose.msra.mxu0 %v2932_v61  ;;  %v5144_v15 = vmul.f32 %v1580_v8, %v1068_v23  ;;  %v1063_v41 = vmul.f32 %v3998_v19, %v5049_v7  ;;  %3061 = vmatpush1.bf16.xpose.msra.mxu1 %v3060_v3  ;;  %v1064_v40 = vmul.f32 %v4009_v22, %v5049_v7  ;;  %v1705_v8 = vld [vmem:[%s3935_s5 + $0x6a0] sm:$0xff]  ;;  %v5158_v61 = vpop.permute.xlu0 %752  ;;  %v1707_v23 = vld [vmem:[%s3935_s5 + $0x6b0] sm:$0xff]  ;;  %v1708_v7 = vld [vmem:[%s3935_s5 + $0x6b8] sm:$0xff] }
 0x206   : > { %6600 = vst [vmem:[#allocation90_spill] sm:$0xff] %v5142_v46  ;;  %v5151_v2 = vmul.f32 %v1573_v11, %v1061_v24  ;;  %v5153_v31 = vmul.f32 %v1574_v26, %v1062_v52  ;;  %v2078_v51 = vadd.f32 %v5055_v20, %v1310_v25  ;;  %v2082_v44 = vadd.f32 %v5040_v33, %v1314_v17  ;;  %v1701_v20 = vld [vmem:[%s3935_s5 + $0x680] sm:$0xff]  ;;  %v1702_v52 = vld [vmem:[%s3935_s5 + $0x688] sm:$0xff] }
 0x207   : > { %6601 = vst [vmem:[#allocation91_spill] sm:$0xff] %v5144_v15  ;;  %v5160_v45 = vmul.f32 %v1575_v0, %v1063_v41  ;;  %v1193_v11 = vmul.f32 %v4166_v12, %v908_v1  ;;  %v1194_v26 = vmul.f32 %v4171_v13, %v908_v1  ;;  %v1309_v25 = vld [vmem:[%s3929_s6 + $0x240] sm:$0xff]  ;;  %v5169_v3 = vmul.f32 %v1576_v49, %v1064_v40  ;;  %v1438_v17 = vld [vmem:[%s3929_s6 + $0x648] sm:$0xff]  ;;  %v1704_v49 = vld [vmem:[%s3935_s5 + $0x698] sm:$0xff] }
 0x208   : > { %v1195_v24 = vmul.f32 %v3998_v19, %v908_v1  ;;  %v1196_v0 = vmul.f32 %v4009_v22, %v908_v1  ;;  %v1189_v33 = vmul.f32 %v4166_v12, %v5107_v21  ;;  %v1442_v41 = vld [vmem:[%s3929_s6 + $0x668] sm:$0xff]  ;;  %v2934_v46 = vpack.c.bf16 %v2082_v44, %v2078_v51 }
 0x209   : > { %6602 = vst [vmem:[#allocation92_spill] sm:$0xff] %v5160_v45  ;;  %6603 = vst [vmem:[#allocation93_spill] sm:$0xff] %v5169_v3  ;;  %v5178_v45 = vmul.f32 %v1705_v8, %v1193_v11  ;;  %v5180_v15 = vmul.f32 %v1706_v14, %v1194_v26  ;;  %v1190_v40 = vmul.f32 %v4171_v13, %v5107_v21  ;;  %v1313_v3 = vld [vmem:[%s3929_s6 + $0x260] sm:$0xff]  ;;  %v918_v26 = vpop.permute.xlu1 %917 }
 0x20a   : > { %v5187_v1 = vmul.f32 %v1707_v23, %v1195_v24  ;;  %v5189_v58 = vmul.f32 %v1708_v7, %v1196_v0  ;;  %v1191_v6 = vmul.f32 %v3998_v19, %v5107_v21  ;;  %v1192_v51 = vmul.f32 %v4009_v22, %v5107_v21  ;;  %v1437_v8 = vld [vmem:[%s3929_s6 + $0x640] sm:$0xff]  ;;  %2935 = vmatprep.subr.bf16.mxu0 %v2934_v46 }
 0x20b   : > { %v1441_v14 = vld [vmem:[%s3929_s6 + $0x660] sm:$0xff]  ;;  %v5197_v44 = vmul.f32 %v1701_v20, %v1189_v33  ;;  %v5199_v11 = vmul.f32 %v1702_v52, %v1190_v40  ;;  %v2206_v23 = vadd.f32 %v5103_v30, %v1438_v17  ;;  %v2210_v7 = vadd.f32 %v5084_v53, %v1442_v41  ;;  %v913_v33 = vpop.permute.xlu0 %912  ;;  %v1586_v30 = vld [vmem:[%s3935_s5 + $0x2e8] sm:$0xff] }
 0x20c   : > { %6604 = vst [vmem:[#allocation94_spill] sm:$0xff] %v5187_v1  ;;  %6605 = vst [vmem:[#allocation95_spill] sm:$0xff] %v5189_v58  ;;  %v5203_v24 = vmul.f32 %v1703_v18, %v1191_v6  ;;  %v5205_v0 = vmul.f32 %v1704_v49, %v1192_v51  ;;  %v2077_v21 = vadd.f32 %v5053_v59, %v1309_v25  ;;  %v1585_v20 = vld [vmem:[%s3935_s5 + $0x2e0] sm:$0xff]  ;;  %v1587_v18 = vld [vmem:[%s3935_s5 + $0x2f0] sm:$0xff] }
 0x20d   : > { %v2081_v46 = vadd.f32 %v5030_v29, %v1313_v3  ;;  %v3062_v52 = vpack.c.bf16 %v2210_v7, %v2206_v23  ;;  %v2205_v40 = vadd.f32 %v5101_v55, %v1437_v8  ;;  %v2209_v53 = vadd.f32 %v5082_v10, %v1441_v14  ;;  %v1588_v6 = vld [vmem:[%s3935_s5 + $0x2f8] sm:$0xff]  ;;  %v1581_v3 = vld [vmem:[%s3935_s5 + $0x2c0] sm:$0xff]  ;;  %v1582_v49 = vld [vmem:[%s3935_s5 + $0x2c8] sm:$0xff] }
 0x20e   : > { %6606 = vst [vmem:[#allocation96_spill] sm:$0xff] %v5203_v24  ;;  %6607 = vst [vmem:[#allocation97_spill] sm:$0xff] %v5205_v0  ;;  %v1073_v17 = vmul.f32 %v4166_v12, %v758_v50  ;;  %v1074_v59 = vmul.f32 %v4171_v13, %v758_v50  ;;  %v1075_v29 = vmul.f32 %v3998_v19, %v758_v50  ;;  %v1318_v55 = vld [vmem:[%s3929_s6 + $0x288] sm:$0xff]  ;;  %v1583_v8 = vld [vmem:[%s3935_s5 + $0x2d0] sm:$0xff] }
 0x20f   : > { %v2936_v41 = vpack.c.bf16 %v2081_v46, %v2077_v21  ;;  %v1076_v25 = vmul.f32 %v4009_v22, %v758_v50  ;;  %3063 = vmatprep.subr.bf16.mxu1 %v3062_v52  ;;  %v3064_v51 = vpack.c.bf16 %v2209_v53, %v2205_v40  ;;  %v1069_v14 = vmul.f32 %v4166_v12, %v5158_v61  ;;  %v1322_v7 = vld [vmem:[%s3929_s6 + $0x2a8] sm:$0xff]  ;;  %v1711_v24 = vld [vmem:[%s3935_s5 + $0x6d0] sm:$0xff]  ;;  %v1712_v58 = vld [vmem:[%s3935_s5 + $0x6d8] sm:$0xff] }
 0x210   : > { %v5222_v10 = vmul.f32 %v1585_v20, %v1073_v17  ;;  %v1070_v23 = vmul.f32 %v4171_v13, %v5158_v61  ;;  %v5230_v50 = vmul.f32 %v1586_v30, %v1074_v59  ;;  %v5232_v21 = vmul.f32 %v1587_v18, %v1075_v29  ;;  %v1584_v20 = vld [vmem:[%s3935_s5 + $0x2d8] sm:$0xff]  ;;  %v1713_v18 = vld [vmem:[%s3935_s5 + $0x6e0] sm:$0xff] }
 0x211   : > { %2937 = vmatpush1.bf16.xpose.msra.mxu0 %v2936_v41  ;;  %v5234_v46 = vmul.f32 %v1588_v6, %v1076_v25  ;;  %v1071_v52 = vmul.f32 %v3998_v19, %v5158_v61  ;;  %3065 = vmatpush1.bf16.xpose.msra.mxu1 %v3064_v51  ;;  %v1072_v40 = vmul.f32 %v4009_v22, %v5158_v61  ;;  %v1714_v6 = vld [vmem:[%s3935_s5 + $0x6e8] sm:$0xff]  ;;  %v768_v41 = vpop.permute.xlu1 %767  ;;  %v1715_v25 = vld [vmem:[%s3935_s5 + $0x6f0] sm:$0xff]  ;;  %v1716_v51 = vld [vmem:[%s3935_s5 + $0x6f8] sm:$0xff] }
 0x212   : > { %6608 = vst [vmem:[#allocation98_spill] sm:$0xff] %v5232_v21  ;;  %v5241_v53 = vmul.f32 %v1581_v3, %v1069_v14  ;;  %v5243_v17 = vmul.f32 %v1582_v49, %v1070_v23  ;;  %v2086_v30 = vadd.f32 %v5153_v31, %v1318_v55  ;;  %v2090_v29 = vadd.f32 %v5140_v34, %v1322_v7  ;;  %v1709_v49 = vld [vmem:[%s3935_s5 + $0x6c0] sm:$0xff]  ;;  %v763_v55 = vpop.permute.xlu0 %762  ;;  %v1710_v34 = vld [vmem:[%s3935_s5 + $0x6c8] sm:$0xff] }
 0x213   : > { %6609 = vst [vmem:[#allocation99_spill] sm:$0xff] %v5234_v46  ;;  %v5248_v59 = vmul.f32 %v1583_v8, %v1071_v52  ;;  %v1201_v61 = vmul.f32 %v4166_v12, %v918_v26  ;;  %v1202_v3 = vmul.f32 %v4171_v13, %v918_v26  ;;  %v1317_v31 = vld [vmem:[%s3929_s6 + $0x280] sm:$0xff]  ;;  %v5257_v14 = vmul.f32 %v1584_v20, %v1072_v40  ;;  %v1446_v52 = vld [vmem:[%s3929_s6 + $0x688] sm:$0xff] }
 0x214   : > { %v1203_v23 = vmul.f32 %v3998_v19, %v918_v26  ;;  %v1204_v8 = vmul.f32 %v4009_v22, %v918_v26  ;;  %v1197_v7 = vmul.f32 %v4166_v12, %v913_v33  ;;  %v1450_v21 = vld [vmem:[%s3929_s6 + $0x6a8] sm:$0xff]  ;;  %v1198_v20 = vmul.f32 %v4171_v13, %v913_v33  ;;  %v1321_v40 = vld [vmem:[%s3929_s6 + $0x2a0] sm:$0xff] }
 0x215   : > { %6610 = vst [vmem:[#allocation100_spill] sm:$0xff] %v5248_v59  ;;  %6611 = vst [vmem:[#allocation101_spill] sm:$0xff] %v5257_v14  ;;  %v2938_v59 = vpack.c.bf16 %v2090_v29, %v2086_v30  ;;  %v5265_v46 = vmul.f32 %v1713_v18, %v1201_v61  ;;  %v5267_v1 = vmul.f32 %v1714_v6, %v1202_v3  ;;  %v1449_v30 = vld [vmem:[%s3929_s6 + $0x6a0] sm:$0xff] }
 0x216   : > { %v5273_v14 = vmul.f32 %v1715_v25, %v1203_v23  ;;  %v5275_v26 = vmul.f32 %v1716_v51, %v1204_v8  ;;  %v1199_v0 = vmul.f32 %v3998_v19, %v913_v33  ;;  %v1200_v54 = vmul.f32 %v4009_v22, %v913_v33 }
 0x217   : > { %2939 = vmatprep.subr.bf16.mxu0 %v2938_v59  ;;  %v5281_v18 = vmul.f32 %v1709_v49, %v1197_v7  ;;  %v5283_v6 = vmul.f32 %v1710_v34, %v1198_v20  ;;  %v2214_v29 = vadd.f32 %v5199_v11, %v1446_v52  ;;  %v2218_v25 = vadd.f32 %v5180_v15, %v1450_v21  ;;  %v1593_v59 = vld [vmem:[%s3935_s5 + $0x320] sm:$0xff]  ;;  %v928_v49 = vpop.permute.xlu1 %927  ;;  %v1594_v15 = vld [vmem:[%s3935_s5 + $0x328] sm:$0xff]  ;;  %v1591_v52 = vld [vmem:[%s3935_s5 + $0x310] sm:$0xff] }
 0x218   : > { %6612 = vst [vmem:[#allocation102_spill] sm:$0xff] %v5273_v14  ;;  %6613 = vst [vmem:[#allocation103_spill] sm:$0xff] %v5275_v26  ;;  %v5287_v51 = vmul.f32 %v1711_v24, %v1199_v0  ;;  %v5289_v61 = vmul.f32 %v1712_v58, %v1200_v54  ;;  %v2085_v33 = vadd.f32 %v5151_v2, %v1317_v31  ;;  %v1595_v24 = vld [vmem:[%s3935_s5 + $0x330] sm:$0xff]  ;;  %v1596_v0 = vld [vmem:[%s3935_s5 + $0x338] sm:$0xff]  ;;  %v923_v58 = vpop.permute.xlu0 %922 }
 0x219   : > { %v2089_v3 = vadd.f32 %v5132_v9, %v1321_v40  ;;  %v3066_v23 = vpack.c.bf16 %v2218_v25, %v2214_v29  ;;  %v2213_v8 = vadd.f32 %v5197_v44, %v1445_v57  ;;  %v2217_v11 = vadd.f32 %v5178_v45, %v1449_v30  ;;  %v1589_v34 = vld [vmem:[%s3935_s5 + $0x300] sm:$0xff]  ;;  %v1590_v57 = vld [vmem:[%s3935_s5 + $0x308] sm:$0xff] }
 0x21a   : > { %6614 = vst [vmem:[#allocation104_spill] sm:$0xff] %v5287_v51  ;;  %v1081_v54 = vmul.f32 %v4166_v12, %v768_v41  ;;  %v1082_v9 = vmul.f32 %v4171_v13, %v768_v41  ;;  %v1083_v21 = vmul.f32 %v3998_v19, %v768_v41  ;;  %v1084_v31 = vmul.f32 %v4009_v22, %v768_v41  ;;  %v1326_v44 = vld [vmem:[%s3929_s6 + $0x2c8] sm:$0xff] }
 0x21b   : > { %v2940_v2 = vpack.c.bf16 %v2089_v3, %v2085_v33  ;;  %3067 = vmatprep.subr.bf16.mxu1 %v3066_v23  ;;  %v3068_v45 = vpack.c.bf16 %v2217_v11, %v2213_v8  ;;  %v1077_v20 = vmul.f32 %v4166_v12, %v763_v55  ;;  %v1078_v40 = vmul.f32 %v4171_v13, %v763_v55  ;;  %v1330_v30 = vld [vmem:[%s3929_s6 + $0x2e8] sm:$0xff]  ;;  %v1592_v33 = vld [vmem:[%s3935_s5 + $0x318] sm:$0xff] }
 0x21c   : > { %v5306_v7 = vmul.f32 %v1593_v59, %v1081_v54  ;;  %v5312_v29 = vmul.f32 %v1594_v15, %v1082_v9  ;;  %v5314_v41 = vmul.f32 %v1595_v24, %v1083_v21  ;;  %v5316_v25 = vmul.f32 %v1596_v0, %v1084_v31  ;;  %v1721_v15 = vld [vmem:[%s3935_s5 + $0x720] sm:$0xff]  ;;  %v1722_v24 = vld [vmem:[%s3935_s5 + $0x728] sm:$0xff]  ;;  %v1724_v9 = vld [vmem:[%s3935_s5 + $0x738] sm:$0xff] }
 0x21d   : > { %2941 = vmatpush1.bf16.xpose.msra.mxu0 %v2940_v2  ;;  %v1079_v3 = vmul.f32 %v3998_v19, %v763_v55  ;;  %3069 = vmatpush1.bf16.xpose.msra.mxu1 %v3068_v45  ;;  %v1080_v59 = vmul.f32 %v4009_v22, %v763_v55  ;;  %v5321_v23 = vmul.f32 %v1589_v34, %v1077_v20  ;;  %v1723_v2 = vld [vmem:[%s3935_s5 + $0x730] sm:$0xff]  ;;  %v1717_v31 = vld [vmem:[%s3935_s5 + $0x700] sm:$0xff]  ;;  %v1454_v20 = vld [vmem:[%s3929_s6 + $0x6c8] sm:$0xff] }
 0x21e   : > { %6615 = vst [vmem:[#allocation105_spill] sm:$0xff] %v5314_v41  ;;  %6616 = vst [vmem:[#allocation106_spill] sm:$0xff] %v5316_v25  ;;  %v5323_v8 = vmul.f32 %v1590_v57, %v1078_v40  ;;  %v2094_v11 = vadd.f32 %v5243_v17, %v1326_v44  ;;  %v2098_v54 = vadd.f32 %v5230_v50, %v1330_v30  ;;  %v1325_v34 = vld [vmem:[%s3929_s6 + $0x2c0] sm:$0xff]  ;;  %v778_v17 = vpop.permute.xlu1 %777  ;;  %v1458_v40 = vld [vmem:[%s3929_s6 + $0x6e8] sm:$0xff]  ;;  %v773_v30 = vpop.permute.xlu0 %772 }
 0x21f   : > { %v5328_v0 = vmul.f32 %v1591_v52, %v1079_v3  ;;  %v1209_v21 = vmul.f32 %v4166_v12, %v928_v49  ;;  %v1210_v55 = vmul.f32 %v4171_v13, %v928_v49  ;;  %v5337_v57 = vmul.f32 %v1592_v33, %v1080_v59  ;;  %v1718_v52 = vld [vmem:[%s3935_s5 + $0x708] sm:$0xff]  ;;  %v1719_v25 = vld [vmem:[%s3935_s5 + $0x710] sm:$0xff]  ;;  %v1720_v33 = vld [vmem:[%s3935_s5 + $0x718] sm:$0xff] }
 0x220   : > { %v1211_v44 = vmul.f32 %v3998_v19, %v928_v49  ;;  %v1212_v45 = vmul.f32 %v4009_v22, %v928_v49  ;;  %v1205_v50 = vmul.f32 %v4166_v12, %v923_v58  ;;  %v2942_v3 = vpack.c.bf16 %v2098_v54, %v2094_v11  ;;  %v1453_v11 = vld [vmem:[%s3929_s6 + $0x6c0] sm:$0xff] }
 0x221   : > { %6617 = vst [vmem:[#allocation107_spill] sm:$0xff] %v5328_v0  ;;  %6618 = vst [vmem:[#allocation108_spill] sm:$0xff] %v5337_v57  ;;  %v5345_v41 = vmul.f32 %v1721_v15, %v1209_v21  ;;  %v5347_v0 = vmul.f32 %v1722_v24, %v1210_v55  ;;  %v1206_v59 = vmul.f32 %v4171_v13, %v923_v58  ;;  %v1329_v57 = vld [vmem:[%s3929_s6 + $0x2e0] sm:$0xff] }
 0x222   : > { %v5353_v49 = vmul.f32 %v1723_v2, %v1211_v44  ;;  %v5355_v14 = vmul.f32 %v1724_v9, %v1212_v45  ;;  %v1207_v51 = vmul.f32 %v3998_v19, %v923_v58  ;;  %v1208_v26 = vmul.f32 %v4009_v22, %v923_v58  ;;  %v1457_v15 = vld [vmem:[%s3929_s6 + $0x6e0] sm:$0xff]  ;;  %2943 = vmatprep.subr.bf16.mxu0 %v2942_v3 }
 0x223   : > { %v5361_v24 = vmul.f32 %v1717_v31, %v1205_v50  ;;  %v5363_v54 = vmul.f32 %v1718_v52, %v1206_v59  ;;  %v2222_v21 = vadd.f32 %v5283_v6, %v1454_v20  ;;  %v2226_v2 = vadd.f32 %v5267_v1, %v1458_v40  ;;  %v1601_v45 = vld [vmem:[%s3935_s5 + $0x360] sm:$0xff]  ;;  %v1602_v6 = vld [vmem:[%s3935_s5 + $0x368] sm:$0xff]  ;;  %v1603_v1 = vld [vmem:[%s3935_s5 + $0x370] sm:$0xff] }
 0x224   : > { %6619 = vst [vmem:[#allocation109_spill] sm:$0xff] %v5353_v49  ;;  %6620 = vst [vmem:[#allocation110_spill] sm:$0xff] %v5355_v14  ;;  %v5367_v9 = vmul.f32 %v1719_v25, %v1207_v51  ;;  %v5369_v55 = vmul.f32 %v1720_v33, %v1208_v26  ;;  %v2093_v58 = vadd.f32 %v5241_v53, %v1325_v34  ;;  %v1604_v51 = vld [vmem:[%s3935_s5 + $0x378] sm:$0xff]  ;;  %v938_v25 = vpop.permute.xlu1 %937  ;;  %v1334_v40 = vld [vmem:[%s3929_s6 + $0x308] sm:$0xff] }
 0x225   : > { %v2097_v44 = vadd.f32 %v5222_v10, %v1329_v57  ;;  %v3070_v31 = vpack.c.bf16 %v2226_v2, %v2222_v21  ;;  %v2221_v52 = vadd.f32 %v5281_v18, %v1453_v11  ;;  %v2225_v50 = vadd.f32 %v5265_v46, %v1457_v15  ;;  %v1597_v57 = vld [vmem:[%s3935_s5 + $0x340] sm:$0xff]  ;;  %v1598_v18 = vld [vmem:[%s3935_s5 + $0x348] sm:$0xff]  ;;  %v933_v46 = vpop.permute.xlu0 %932  ;;  %v1599_v59 = vld [vmem:[%s3935_s5 + $0x350] sm:$0xff] }
 0x226   : > { %6621 = vst [vmem:[#allocation111_spill] sm:$0xff] %v5367_v9  ;;  %6622 = vst [vmem:[#allocation112_spill] sm:$0xff] %v5369_v55  ;;  %v1089_v26 = vmul.f32 %v4166_v12, %v778_v17  ;;  %v1090_v53 = vmul.f32 %v4171_v13, %v778_v17  ;;  %v1091_v10 = vmul.f32 %v3998_v19, %v778_v17  ;;  %v1338_v21 = vld [vmem:[%s3929_s6 + $0x328] sm:$0xff] }
 0x227   : > { %v2944_v20 = vpack.c.bf16 %v2097_v44, %v2093_v58  ;;  %v1092_v34 = vmul.f32 %v4009_v22, %v778_v17  ;;  %3071 = vmatprep.subr.bf16.mxu1 %v3070_v31  ;;  %v3072_v3 = vpack.c.bf16 %v2225_v50, %v2221_v52  ;;  %v1085_v11 = vmul.f32 %v4166_v12, %v773_v30  ;;  %v1600_v44 = vld [vmem:[%s3935_s5 + $0x358] sm:$0xff] }
 0x228   : > { %v5386_v33 = vmul.f32 %v1601_v45, %v1089_v26  ;;  %v1086_v15 = vmul.f32 %v4171_v13, %v773_v30  ;;  %v5392_v17 = vmul.f32 %v1602_v6, %v1090_v53  ;;  %v5394_v2 = vmul.f32 %v1603_v1, %v1091_v10  ;;  %v1729_v1 = vld [vmem:[%s3935_s5 + $0x760] sm:$0xff]  ;;  %v1731_v53 = vld [vmem:[%s3935_s5 + $0x770] sm:$0xff]  ;;  %v1732_v10 = vld [vmem:[%s3935_s5 + $0x778] sm:$0xff] }
 0x229   : > { %2945 = vmatpush1.bf16.xpose.msra.mxu0 %v2944_v20  ;;  %v5396_v58 = vmul.f32 %v1604_v51, %v1092_v34  ;;  %v1087_v45 = vmul.f32 %v3998_v19, %v773_v30  ;;  %3073 = vmatpush1.bf16.xpose.msra.mxu1 %v3072_v3  ;;  %v1088_v31 = vmul.f32 %v4009_v22, %v773_v30  ;;  %v1730_v51 = vld [vmem:[%s3935_s5 + $0x768] sm:$0xff]  ;;  %v783_v49 = vpop.permute.xlu0 %782 }
 0x22a   : > { %6623 = vst [vmem:[#allocation113_spill] sm:$0xff] %v5394_v2  ;;  %v5401_v52 = vmul.f32 %v1597_v57, %v1085_v11  ;;  %v5403_v50 = vmul.f32 %v1598_v18, %v1086_v15  ;;  %v2102_v6 = vadd.f32 %v5323_v8, %v1334_v40  ;;  %v2106_v20 = vadd.f32 %v5312_v29, %v1338_v21  ;;  %v1725_v57 = vld [vmem:[%s3935_s5 + $0x740] sm:$0xff]  ;;  %v1462_v11 = vld [vmem:[%s3929_s6 + $0x708] sm:$0xff]  ;;  %v788_v21 = vpop.permute.xlu1 %787 }
 0x22b   : > { %6624 = vst [vmem:[#allocation114_spill] sm:$0xff] %v5396_v58  ;;  %v5408_v26 = vmul.f32 %v1599_v59, %v1087_v45  ;;  %v1217_v30 = vmul.f32 %v4166_v12, %v938_v25  ;;  %v1218_v34 = vmul.f32 %v4171_v13, %v938_v25  ;;  %v1333_v18 = vld [vmem:[%s3929_s6 + $0x300] sm:$0xff]  ;;  %v5417_v8 = vmul.f32 %v1600_v44, %v1088_v31  ;;  %v1726_v59 = vld [vmem:[%s3935_s5 + $0x748] sm:$0xff]  ;;  %v1727_v58 = vld [vmem:[%s3935_s5 + $0x750] sm:$0xff] }
 0x22c   : > { %v1219_v40 = vmul.f32 %v3998_v19, %v938_v25  ;;  %v1220_v3 = vmul.f32 %v4009_v22, %v938_v25  ;;  %v1213_v29 = vmul.f32 %v4166_v12, %v933_v46  ;;  %v1466_v15 = vld [vmem:[%s3929_s6 + $0x728] sm:$0xff]  ;;  %v2946_v45 = vpack.c.bf16 %v2106_v20, %v2102_v6  ;;  %v1728_v44 = vld [vmem:[%s3935_s5 + $0x758] sm:$0xff]  ;;  %v1461_v6 = vld [vmem:[%s3929_s6 + $0x700] sm:$0xff] }
 0x22d   : > { %6625 = vst [vmem:[#allocation115_spill] sm:$0xff] %v5408_v26  ;;  %6626 = vst [vmem:[#allocation116_spill] sm:$0xff] %v5417_v8  ;;  %v5425_v2 = vmul.f32 %v1729_v1, %v1217_v30  ;;  %v5427_v26 = vmul.f32 %v1730_v51, %v1218_v34  ;;  %v1214_v31 = vmul.f32 %v4171_v13, %v933_v46  ;;  %v1337_v8 = vld [vmem:[%s3929_s6 + $0x320] sm:$0xff] }
 0x22e   : > { %v5433_v25 = vmul.f32 %v1731_v53, %v1219_v40  ;;  %v5435_v9 = vmul.f32 %v1732_v10, %v1220_v3  ;;  %v1215_v14 = vmul.f32 %v3998_v19, %v933_v46  ;;  %v1216_v55 = vmul.f32 %v4009_v22, %v933_v46  ;;  %v1465_v1 = vld [vmem:[%s3929_s6 + $0x720] sm:$0xff]  ;;  %2947 = vmatprep.subr.bf16.mxu0 %v2946_v45 }
 0x22f   : > { %v5441_v51 = vmul.f32 %v1725_v57, %v1213_v29  ;;  %v5443_v20 = vmul.f32 %v1726_v59, %v1214_v31  ;;  %v2230_v30 = vadd.f32 %v5363_v54, %v1462_v11  ;;  %v2234_v53 = vadd.f32 %v5347_v0, %v1466_v15  ;;  %v1609_v3 = vld [vmem:[%s3935_s5 + $0x3a0] sm:$0xff]  ;;  %v1610_v54 = vld [vmem:[%s3935_s5 + $0x3a8] sm:$0xff]  ;;  %v1611_v0 = vld [vmem:[%s3935_s5 + $0x3b0] sm:$0xff]  ;;  %v948_v15 = vpop.permute.xlu1 %947 }
 0x230   : > { %6627 = vst [vmem:[#allocation117_spill] sm:$0xff] %v5433_v25  ;;  %6628 = vst [vmem:[#allocation118_spill] sm:$0xff] %v5435_v9  ;;  %v5447_v10 = vmul.f32 %v1727_v58, %v1215_v14  ;;  %v5449_v34 = vmul.f32 %v1728_v44, %v1216_v55  ;;  %v2101_v46 = vadd.f32 %v5321_v23, %v1333_v18  ;;  %v1612_v14 = vld [vmem:[%s3935_s5 + $0x3b8] sm:$0xff]  ;;  %v1605_v18 = vld [vmem:[%s3935_s5 + $0x380] sm:$0xff] }
 0x231   : > { %v2105_v40 = vadd.f32 %v5306_v7, %v1337_v8  ;;  %v3074_v57 = vpack.c.bf16 %v2234_v53, %v2230_v30  ;;  %v2229_v59 = vadd.f32 %v5361_v24, %v1461_v6  ;;  %v2233_v29 = vadd.f32 %v5345_v41, %v1465_v1  ;;  %v1606_v8 = vld [vmem:[%s3935_s5 + $0x388] sm:$0xff]  ;;  %v1607_v44 = vld [vmem:[%s3935_s5 + $0x390] sm:$0xff]  ;;  %v943_v30 = vpop.permute.xlu0 %942 }
 0x232   : > { %6629 = vst [vmem:[#allocation119_spill] sm:$0xff] %v5447_v10  ;;  %v1097_v55 = vmul.f32 %v4166_v12, %v788_v21  ;;  %v1098_v11 = vmul.f32 %v4171_v13, %v788_v21  ;;  %v1099_v23 = vmul.f32 %v3998_v19, %v788_v21  ;;  %v1100_v7 = vmul.f32 %v4009_v22, %v788_v21  ;;  %v1342_v24 = vld [vmem:[%s3929_s6 + $0x348] sm:$0xff] }
 0x233   : > { %v2948_v58 = vpack.c.bf16 %v2105_v40, %v2101_v46  ;;  %3075 = vmatprep.subr.bf16.mxu1 %v3074_v57  ;;  %v3076_v41 = vpack.c.bf16 %v2233_v29, %v2229_v59  ;;  %v1093_v31 = vmul.f32 %v4166_v12, %v783_v49  ;;  %v1094_v6 = vmul.f32 %v4171_v13, %v783_v49  ;;  %v1346_v1 = vld [vmem:[%s3929_s6 + $0x368] sm:$0xff]  ;;  %v1608_v40 = vld [vmem:[%s3935_s5 + $0x398] sm:$0xff] }
 0x234   : > { %v5466_v45 = vmul.f32 %v1609_v3, %v1097_v55  ;;  %v5472_v21 = vmul.f32 %v1610_v54, %v1098_v11  ;;  %v5474_v53 = vmul.f32 %v1611_v0, %v1099_v23  ;;  %v5476_v46 = vmul.f32 %v1612_v14, %v1100_v7  ;;  %v1737_v0 = vld [vmem:[%s3935_s5 + $0x7a0] sm:$0xff]  ;;  %v1738_v14 = vld [vmem:[%s3935_s5 + $0x7a8] sm:$0xff]  ;;  %v1739_v11 = vld [vmem:[%s3935_s5 + $0x7b0] sm:$0xff] }
 0x235   : > { %2949 = vmatpush1.bf16.xpose.msra.mxu0 %v2948_v58  ;;  %v1095_v3 = vmul.f32 %v3998_v19, %v783_v49  ;;  %3077 = vmatpush1.bf16.xpose.msra.mxu1 %v3076_v41  ;;  %v1096_v57 = vmul.f32 %v4009_v22, %v783_v49  ;;  %v5481_v59 = vmul.f32 %v1605_v18, %v1093_v31  ;;  %v1740_v23 = vld [vmem:[%s3935_s5 + $0x7b8] sm:$0xff]  ;;  %v1733_v18 = vld [vmem:[%s3935_s5 + $0x780] sm:$0xff]  ;;  %v1470_v31 = vld [vmem:[%s3929_s6 + $0x748] sm:$0xff] }
 0x236   : > { %6630 = vst [vmem:[#allocation120_spill] sm:$0xff] %v5474_v53  ;;  %6631 = vst [vmem:[#allocation121_spill] sm:$0xff] %v5476_v46  ;;  %v5483_v29 = vmul.f32 %v1606_v8, %v1094_v6  ;;  %v2110_v54 = vadd.f32 %v5403_v50, %v1342_v24  ;;  %v2114_v58 = vadd.f32 %v5392_v17, %v1346_v1  ;;  %v1341_v8 = vld [vmem:[%s3929_s6 + $0x340] sm:$0xff]  ;;  %v1474_v6 = vld [vmem:[%s3929_s6 + $0x768] sm:$0xff] }
 0x237   : > { %v5488_v55 = vmul.f32 %v1607_v44, %v1095_v3  ;;  %v1225_v49 = vmul.f32 %v4166_v12, %v948_v15  ;;  %v1226_v7 = vmul.f32 %v4171_v13, %v948_v15  ;;  %v5497_v50 = vmul.f32 %v1608_v40, %v1096_v57  ;;  %v1734_v44 = vld [vmem:[%s3935_s5 + $0x788] sm:$0xff]  ;;  %v1736_v46 = vld [vmem:[%s3935_s5 + $0x798] sm:$0xff]  ;;  %v1345_v57 = vld [vmem:[%s3929_s6 + $0x360] sm:$0xff] }
 0x238   : > { %v1227_v24 = vmul.f32 %v3998_v19, %v948_v15  ;;  %v1228_v41 = vmul.f32 %v4009_v22, %v948_v15  ;;  %v1221_v17 = vmul.f32 %v4166_v12, %v943_v30  ;;  %v2950_v1 = vpack.c.bf16 %v2114_v58, %v2110_v54  ;;  %v1469_v54 = vld [vmem:[%s3929_s6 + $0x740] sm:$0xff] }
 0x239   : > { %6632 = vst [vmem:[#allocation122_spill] sm:$0xff] %v5488_v55  ;;  %6633 = vst [vmem:[#allocation123_spill] sm:$0xff] %v5497_v50  ;;  %v5505_v3 = vmul.f32 %v1737_v0, %v1225_v49  ;;  %v5507_v53 = vmul.f32 %v1738_v14, %v1226_v7  ;;  %v1735_v55 = vld [vmem:[%s3935_s5 + $0x790] sm:$0xff]  ;;  %v1222_v40 = vmul.f32 %v4171_v13, %v943_v30  ;;  %v798_v50 = vpop.permute.xlu1 %797  ;;  %v1473_v0 = vld [vmem:[%s3929_s6 + $0x760] sm:$0xff]  ;;  %v793_v14 = vpop.permute.xlu0 %792 }
 0x23a   : > { %v5513_v25 = vmul.f32 %v1739_v11, %v1227_v24  ;;  %v5515_v15 = vmul.f32 %v1740_v23, %v1228_v41  ;;  %v1223_v10 = vmul.f32 %v3998_v19, %v943_v30  ;;  %v1224_v9 = vmul.f32 %v4009_v22, %v943_v30  ;;  %2951 = vmatprep.subr.bf16.mxu0 %v2950_v1  ;;  %v1617_v1 = vld [vmem:[%s3935_s5 + $0x3e0] sm:$0xff] }
 0x23b   : > { %v5521_v58 = vmul.f32 %v1733_v18, %v1221_v17  ;;  %v5523_v49 = vmul.f32 %v1734_v44, %v1222_v40  ;;  %v2238_v11 = vadd.f32 %v5443_v20, %v1470_v31  ;;  %v2242_v23 = vadd.f32 %v5427_v26, %v1474_v6  ;;  %v1618_v17 = vld [vmem:[%s3935_s5 + $0x3e8] sm:$0xff]  ;;  %v1619_v26 = vld [vmem:[%s3935_s5 + $0x3f0] sm:$0xff] }
 0x23c   : > { %6634 = vst [vmem:[#allocation124_spill] sm:$0xff] %v5513_v25  ;;  %6635 = vst [vmem:[#allocation125_spill] sm:$0xff] %v5515_v15  ;;  %v5527_v7 = vmul.f32 %v1735_v55, %v1223_v10  ;;  %v5529_v24 = vmul.f32 %v1736_v46, %v1224_v9  ;;  %v2109_v30 = vadd.f32 %v5401_v52, %v1341_v8  ;;  %v1620_v10 = vld [vmem:[%s3935_s5 + $0x3f8] sm:$0xff]  ;;  %v1613_v8 = vld [vmem:[%s3935_s5 + $0x3c0] sm:$0xff] }
 0x23d   : > { %v2113_v41 = vadd.f32 %v5386_v33, %v1345_v57  ;;  %v3078_v18 = vpack.c.bf16 %v2242_v23, %v2238_v11  ;;  %v2237_v44 = vadd.f32 %v5441_v51, %v1469_v54  ;;  %v2241_v20 = vadd.f32 %v5425_v2, %v1473_v0  ;;  %v1614_v31 = vld [vmem:[%s3935_s5 + $0x3c8] sm:$0xff]  ;;  %v1615_v40 = vld [vmem:[%s3935_s5 + $0x3d0] sm:$0xff]  ;;  %v958_v11 = vpop.permute.xlu1 %957 }
 0x23e   : > { %6636 = vst [vmem:[#allocation126_spill] sm:$0xff] %v5527_v7  ;;  %6637 = vst [vmem:[#allocation127_spill] sm:$0xff] %v5529_v24  ;;  %v1105_v9 = vmul.f32 %v4166_v12, %v798_v50  ;;  %v1106_v55 = vmul.f32 %v4171_v13, %v798_v50  ;;  %v1107_v52 = vmul.f32 %v3998_v19, %v798_v50  ;;  %v1350_v51 = vld [vmem:[%s3929_s6 + $0x388] sm:$0xff] }
 0x23f   : > { %v2952_v46 = vpack.c.bf16 %v2113_v41, %v2109_v30  ;;  %v1108_v33 = vmul.f32 %v4009_v22, %v798_v50  ;;  %3079 = vmatprep.subr.bf16.mxu1 %v3078_v18  ;;  %v3080_v6 = vpack.c.bf16 %v2241_v20, %v2237_v44  ;;  %v1101_v57 = vmul.f32 %v4166_v12, %v793_v14  ;;  %v1354_v0 = vld [vmem:[%s3929_s6 + $0x3a8] sm:$0xff]  ;;  %v1616_v41 = vld [vmem:[%s3935_s5 + $0x3d8] sm:$0xff]  ;;  %v953_v18 = vpop.permute.xlu0 %952 }
 0x240   : > { %v5546_v2 = vmul.f32 %v1617_v1, %v1105_v9  ;;  %v1102_v54 = vmul.f32 %v4171_v13, %v793_v14  ;;  %v5552_v50 = vmul.f32 %v1618_v17, %v1106_v55  ;;  %v5554_v23 = vmul.f32 %v1619_v26, %v1107_v52  ;;  %v1745_v26 = vld [vmem:[%s3935_s5 + $0x7e0] sm:$0xff]  ;;  %v1747_v52 = vld [vmem:[%s3935_s5 + $0x7f0] sm:$0xff] }
 0x241   : > { %2953 = vmatpush1.bf16.xpose.msra.mxu0 %v2952_v46  ;;  %v5556_v30 = vmul.f32 %v1620_v10, %v1108_v33  ;;  %v1103_v1 = vmul.f32 %v3998_v19, %v793_v14  ;;  %3081 = vmatpush1.bf16.xpose.msra.mxu1 %v3080_v6  ;;  %v1104_v44 = vmul.f32 %v4009_v22, %v793_v14  ;;  %v1746_v10 = vld [vmem:[%s3935_s5 + $0x7e8] sm:$0xff]  ;;  %v1748_v33 = vld [vmem:[%s3935_s5 + $0x7f8] sm:$0xff] }
 0x242   : > { %6638 = vst [vmem:[#allocation128_spill] sm:$0xff] %v5554_v23  ;;  %v5561_v20 = vmul.f32 %v1613_v8, %v1101_v57  ;;  %v1870_v9 = vmul.f32 %v1614_v31, %v1102_v54  ;;  %v2118_v17 = vadd.f32 %v5483_v29, %v1350_v51  ;;  %v2122_v55 = vadd.f32 %v5472_v21, %v1354_v0  ;;  %v1741_v31 = vld [vmem:[%s3935_s5 + $0x7c0] sm:$0xff]  ;;  %v1742_v57 = vld [vmem:[%s3935_s5 + $0x7c8] sm:$0xff] }
 0x243   : > { %6639 = vst [vmem:[#allocation129_spill] sm:$0xff] %v5556_v30  ;;  %v5566_v46 = vmul.f32 %v1615_v40, %v1103_v1  ;;  %v1233_v14 = vmul.f32 %v4166_v12, %v958_v11  ;;  %v1234_v8 = vmul.f32 %v4171_v13, %v958_v11  ;;  %v1349_v29 = vld [vmem:[%s3929_s6 + $0x380] sm:$0xff]  ;;  %v5575_v51 = vmul.f32 %v1616_v41, %v1104_v44  ;;  %v1478_v54 = vld [vmem:[%s3929_s6 + $0x788] sm:$0xff]  ;;  %v1743_v41 = vld [vmem:[%s3935_s5 + $0x7d0] sm:$0xff] }
 0x244   : > { %v1235_v6 = vmul.f32 %v3998_v19, %v958_v11  ;;  %v1236_v40 = vmul.f32 %v4009_v22, %v958_v11  ;;  %v1229_v21 = vmul.f32 %v4166_v12, %v953_v18  ;;  %v1482_v0 = vld [vmem:[%s3929_s6 + $0x7a8] sm:$0xff]  ;;  %v1353_v1 = vld [vmem:[%s3929_s6 + $0x3a0] sm:$0xff]  ;;  %v2954_v23 = vpack.c.bf16 %v2122_v55, %v2118_v17  ;;  %v1744_v44 = vld [vmem:[%s3935_s5 + $0x7d8] sm:$0xff] }
 0x245   : > { %6640 = vst [vmem:[#allocation130_spill] sm:$0xff] %v5566_v46  ;;  %6641 = vst [vmem:[#allocation131_spill] sm:$0xff] %v5575_v51  ;;  %v1491_v46 = vld [vmem:[%s3929_s6 + $0x7f0] sm:$0xff]  ;;  %v2001_v30 = vmul.f32 %v1745_v26, %v1233_v14  ;;  %v2002_v25 = vmul.f32 %v1746_v10, %v1234_v8  ;;  %v1230_v51 = vmul.f32 %v4171_v13, %v953_v18  ;;  %v1477_v17 = vld [vmem:[%s3929_s6 + $0x780] sm:$0xff] }
 0x246   : > { %v2003_v11 = vmul.f32 %v1747_v52, %v1235_v6  ;;  %v5588_v7 = vmul.f32 %v1748_v33, %v1236_v40  ;;  %v1487_v12 = vld [vmem:[%s3929_s6 + $0x7d0] sm:$0xff]  ;;  %v1231_v15 = vmul.f32 %v3998_v19, %v953_v18  ;;  %v1232_v24 = vmul.f32 %v4009_v22, %v953_v18  ;;  %v1481_v26 = vld [vmem:[%s3929_s6 + $0x7a0] sm:$0xff]  ;;  %2955 = vmatprep.subr.bf16.mxu0 %v2954_v23  ;;  %v1358_v52 = vld [vmem:[%s3929_s6 + $0x3c8] sm:$0xff] }
 0x247   : > { %v1997_v10 = vmul.f32 %v1741_v31, %v1229_v21  ;;  %v1998_v55 = vmul.f32 %v1742_v57, %v1230_v51  ;;  %v2246_v14 = vadd.f32 %v5523_v49, %v1478_v54  ;;  %v2250_v13 = vadd.f32 %v5507_v53, %v1482_v0  ;;  %v1362_v33 = vld [vmem:[%s3929_s6 + $0x3e8] sm:$0xff]  ;;  %v1357_v31 = vld [vmem:[%s3929_s6 + $0x3c0] sm:$0xff]  ;;  %v1240_v54 = vld [vmem:[%s3929_s6 + $0x18] sm:$0xff] }
 0x248   : > { %v1486_v8 = vld [vmem:[%s3929_s6 + $0x7c8] sm:$0xff]  ;;  %v5600_v19 = vadd.f32 %v2003_v11, %v1491_v46  ;;  %v1999_v6 = vmul.f32 %v1743_v41, %v1231_v15  ;;  %v5602_v22 = vmul.f32 %v1744_v44, %v1232_v24  ;;  %v2117_v23 = vadd.f32 %v5481_v59, %v1349_v29  ;;  %v1361_v46 = vld [vmem:[%s3929_s6 + $0x3e0] sm:$0xff]  ;;  %v1368_v41 = vld [vmem:[%s3929_s6 + $0x418] sm:$0xff] }
 0x249   : > { %v1490_v18 = vld [vmem:[%s3929_s6 + $0x7e8] sm:$0xff]  ;;  %v3082_v51 = vpack.c.bf16 %v2250_v13, %v2246_v14  ;;  %v2121_v49 = vadd.f32 %v5466_v45, %v1353_v1  ;;  %v2245_v53 = vadd.f32 %v5521_v58, %v1477_v17  ;;  %v2249_v40 = vadd.f32 %v5505_v3, %v1481_v26  ;;  %v1485_v57 = vld [vmem:[%s3929_s6 + $0x7c0] sm:$0xff]  ;;  %v1244_v45 = vld [vmem:[%s3929_s6 + $0x38] sm:$0xff] }
 0x24a   : > { %v1489_v15 = vld [vmem:[%s3929_s6 + $0x7e0] sm:$0xff]  ;;  %v5613_v21 = vadd.f32 %v1999_v6, %v1487_v12  ;;  %v2126_v24 = vadd.f32 %v1870_v9, %v1358_v52  ;;  %v2130_v59 = vadd.f32 %v5552_v50, %v1362_v33  ;;  %v2254_v29 = vadd.f32 %v1998_v55, %v1486_v8  ;;  %v1372_v9 = vld [vmem:[%s3929_s6 + $0x438] sm:$0xff]  ;;  %v1239_v17 = vld [vmem:[%s3929_s6 + $0x10] sm:$0xff] }
 0x24b   : > { %3083 = vmatprep.subr.bf16.mxu1 %v3082_v51  ;;  %v2956_v58 = vpack.c.bf16 %v2121_v49, %v2117_v23  ;;  %v3084_v0 = vpack.c.bf16 %v2249_v40, %v2245_v53  ;;  %v2258_v1 = vadd.f32 %v2002_v25, %v1490_v18  ;;  %v5619_v3 = vadd.f32 %v5561_v20, %v1357_v31  ;;  %v1243_v26 = vld [vmem:[%s3929_s6 + $0x30] sm:$0xff]  ;;  %v1248_v52 = vld [vmem:[%s3929_s6 + $0x58] sm:$0xff] }
 0x24c   : > { %v2958_v44 = vpack.c.bf16 %v2130_v59, %v2126_v24  ;;  %v2129_v50 = vadd.f32 %v5546_v2, %v1361_v46  ;;  %v2253_v11 = vadd.f32 %v1997_v10, %v1485_v57  ;;  %v2257_v12 = vadd.f32 %v2001_v30, %v1489_v15  ;;  %v1367_v55 = vld [vmem:[%s3929_s6 + $0x410] sm:$0xff]  ;;  %v1252_v2 = vld [vmem:[%s3929_s6 + $0x78] sm:$0xff] }
 0x24d   : > { %2957 = vmatpush1.bf16.xpose.msra.mxu0 %v2956_v58  ;;  %3085 = vmatpush1.bf16.xpose.msra.mxu1 %v3084_v0  ;;  %v3086_v25 = vpack.c.bf16 %v2258_v1, %v2254_v29  ;;  %v2008_v20 = vadd.f32 %v4199_v43, %v1240_v54  ;;  %v2012_v14 = vadd.f32 %v4233_v5, %v1244_v45  ;;  %v1371_v13 = vld [vmem:[%s3929_s6 + $0x430] sm:$0xff]  ;;  %v1376_v6 = vld [vmem:[%s3929_s6 + $0x458] sm:$0xff] }
 0x24e   : > { %2959 = vmatprep.subr.bf16.mxu0 %v2958_v44  ;;  %v2960_v30 = vpack.c.bf16 %v2129_v50, %v5619_v3  ;;  %v3088_v10 = vpack.c.bf16 %v2257_v12, %v2253_v11  ;;  %v2136_v33 = vadd.f32 %v4191_v37, %v1368_v41  ;;  %v2140_v8 = vadd.f32 %v4223_v63, %v1372_v9  ;;  %v1380_v43 = vld [vmem:[%s3929_s6 + $0x478] sm:$0xff]  ;;  %v1247_v23 = vld [vmem:[%s3929_s6 + $0x50] sm:$0xff]  ;;  %v6642_v41 = vld [vmem:[#allocation34_spill] sm:$0xff] }
 0x24f   : > { %3087 = vmatprep.subr.bf16.mxu1 %v3086_v25  ;;  %v2962_v5 = vpack.c.bf16 %v2012_v14, %v2008_v20  ;;  %v5639_v18 = vadd.f32 %v4197_v42, %v1239_v17  ;;  %v5642_v31 = vadd.f32 %v4231_v4, %v1243_v26  ;;  %v5645_v37 = vadd.f32 %v4189_v36, %v1367_v55  ;;  %v1251_v63 = vld [vmem:[%s3929_s6 + $0x70] sm:$0xff]  ;;  %v1256_v46 = vld [vmem:[%s3929_s6 + $0x98] sm:$0xff]  ;;  %v6644_v50 = vld [vmem:[#allocation30_spill] sm:$0xff] }
 0x250   : > { %v1375_v51 = vld [vmem:[%s3929_s6 + $0x450] sm:$0xff]  ;;  %v3090_v49 = vpack.c.bf16 %v2140_v8, %v2136_v33  ;;  %v5650_v53 = vadd.f32 %v4221_v62, %v1371_v13  ;;  %v5653_v40 = vadd.f32 %v4268_v48, %v1248_v52  ;;  %v5656_v42 = vadd.f32 %v4257_v38, %v1252_v2  ;;  %v1260_v57 = vld [vmem:[%s3929_s6 + $0xb8] sm:$0xff] }
 0x251   : > { %v1379_v4 = vld [vmem:[%s3929_s6 + $0x470] sm:$0xff]  ;;  %v2964_v36 = vpack.c.bf16 %v5642_v31, %v5639_v18  ;;  %v5664_v15 = vadd.f32 %v4303_v39, %v1376_v6  ;;  %v5667_v62 = vadd.f32 %v4293_v28, %v1380_v43  ;;  %v5670_v48 = vadd.f32 %v4266_v47, %v1247_v23  ;;  %v1384_v24 = vld [vmem:[%s3929_s6 + $0x498] sm:$0xff] }
 0x252   : > { %v1388_v38 = vld [vmem:[%s3929_s6 + $0x4b8] sm:$0xff]  ;;  %v1255_v59 = vld [vmem:[%s3929_s6 + $0x90] sm:$0xff]  ;;  %v3092_v29 = vpack.c.bf16 %v5650_v53, %v5645_v37  ;;  %v2966_v54 = vpack.c.bf16 %v5656_v42, %v5653_v40  ;;  %v5680_v39 = vadd.f32 %v4255_v35, %v1251_v63  ;;  %v5683_v28 = vadd.f32 %v4301_v32, %v1375_v51 }
 0x253   : > { %v1259_v47 = vld [vmem:[%s3929_s6 + $0xb0] sm:$0xff]  ;;  %v3094_v45 = vpack.c.bf16 %v5667_v62, %v5664_v15  ;;  %v5689_v58 = vadd.f32 %v4291_v27, %v1379_v4  ;;  %v5692_v0 = vadd.f32 %v4358_v16, %v1256_v46  ;;  %v5695_v1 = vadd.f32 %v4334_v56, %v1260_v57  ;;  %v1264_v11 = vld [vmem:[%s3929_s6 + $0xd8] sm:$0xff]  ;;  %v6650_v4 = vld [vmem:[#allocation42_spill] sm:$0xff] }
 0x254   : > { %v1383_v35 = vld [vmem:[%s3929_s6 + $0x490] sm:$0xff]  ;;  %v5702_v9 = vadd.f32 %v6642_v41, %v1384_v24  ;;  %v5708_v16 = vadd.f32 %v6644_v50, %v1255_v59  ;;  %v1268_v56 = vld [vmem:[%s3929_s6 + $0xf8] sm:$0xff] }
 0x255   : > { %v1387_v3 = vld [vmem:[%s3929_s6 + $0x4b0] sm:$0xff]  ;;  %v1392_v12 = vld [vmem:[%s3929_s6 + $0x4d8] sm:$0xff]  ;;  %2961 = vmatpush1.bf16.xpose.msra.mxu0 %v2960_v30  ;;  %3089 = vmatpush1.bf16.xpose.msra.mxu1 %v3088_v10 }
 0x256   : > { %v6643_v44 = vld [vmem:[#allocation32_spill] sm:$0xff]  ;;  %v6645_v55 = vld [vmem:[#allocation29_spill] sm:$0xff]  ;;  %2963 = vmatprep.subr.bf16.mxu0 %v2962_v5  ;;  %3091 = vmatprep.subr.bf16.mxu1 %v3090_v49  ;;  %v6647_v10 = vld [vmem:[#allocation31_spill] sm:$0xff]  ;;  %v5743_v46 = vadd.f32 %v6650_v4, %v1392_v12 }
 0x257   : > { %v5705_v27 = vadd.f32 %v6643_v44, %v1388_v38  ;;  %v5718_v25 = vadd.f32 %v6645_v55, %v1259_v47  ;;  %v1396_v20 = vld [vmem:[%s3929_s6 + $0x4f8] sm:$0xff]  ;;  %v1263_v14 = vld [vmem:[%s3929_s6 + $0xd0] sm:$0xff]  ;;  %v5729_v33 = vadd.f32 %v6647_v10, %v1387_v3  ;;  %v6648_v5 = vld [vmem:[#allocation38_spill] sm:$0xff] }
 0x258   : > { %v1267_v13 = vld [vmem:[%s3929_s6 + $0xf0] sm:$0xff]  ;;  %v6646_v2 = vld [vmem:[#allocation33_spill] sm:$0xff]  ;;  %v5737_v63 = vadd.f32 %v6648_v5, %v1264_v11  ;;  %v6656_v5 = vld [vmem:[#allocation46_spill] sm:$0xff] }
 0x259   : > { %v5726_v30 = vadd.f32 %v6646_v2, %v1383_v35  ;;  %v1391_v8 = vld [vmem:[%s3929_s6 + $0x4d0] sm:$0xff]  ;;  %v1272_v43 = vld [vmem:[%s3929_s6 + $0x118] sm:$0xff]  ;;  %v2269_v12 = vld [vmem:[%s3922_s11] sm:$0xff] }
 0x25a   : > { %v1395_v6 = vld [vmem:[%s3929_s6 + $0x4f0] sm:$0xff]  ;;  %v1276_v57 = vld [vmem:[%s3929_s6 + $0x138] sm:$0xff] }
 0x25b   : > { %v6649_v51 = vld [vmem:[#allocation36_spill] sm:$0xff]  ;;  %v6652_v35 = vld [vmem:[#allocation37_spill] sm:$0xff]  ;;  %v6653_v41 = vld [vmem:[#allocation35_spill] sm:$0xff] }
 0x25c   : > { %v5740_v49 = vadd.f32 %v6649_v51, %v1268_v56  ;;  %v1400_v24 = vld [vmem:[%s3929_s6 + $0x518] sm:$0xff]  ;;  %v5753_v3 = vadd.f32 %v6652_v35, %v1263_v14  ;;  %v5756_v44 = vadd.f32 %v6653_v41, %v1267_v13  ;;  %v1271_v11 = vld [vmem:[%s3929_s6 + $0x110] sm:$0xff]  ;;  %v5771_v13 = vadd.f32 %v6656_v5, %v1272_v43  ;;  %2342 = vmatmul.mubr.f32.vlgmr.msra.gmra.mrb[0].mxu0 %v2269_v12 }
 0x25d   : > { %v6651_v59 = vld [vmem:[#allocation40_spill] sm:$0xff]  ;;  %v6654_v2 = vld [vmem:[#allocation41_spill] sm:$0xff]  ;;  %v6661_v35 = vld [vmem:[#allocation43_spill] sm:$0xff]  ;;  %2496 = vmatmul.mubr.f32.vlgmr.msra.gmra.mrb[0].mxu1 %v2269_v12  ;;  %2965 = vmatpush1.bf16.xpose.msra.mxu0 %v2964_v36 }
 0x25e   : > { %v5750_v47 = vadd.f32 %v6651_v59, %v1396_v20  ;;  %v1404_v50 = vld [vmem:[%s3929_s6 + $0x538] sm:$0xff]  ;;  %v1275_v56 = vld [vmem:[%s3929_s6 + $0x130] sm:$0xff]  ;;  %v5765_v10 = vadd.f32 %v6654_v2, %v1391_v8  ;;  %v6658_v8 = vld [vmem:[#allocation50_spill] sm:$0xff]  ;;  %3093 = vmatpush1.bf16.xpose.msra.mxu1 %v3092_v29  ;;  %2967 = vmatprep.subr.bf16.mxu0 %v2966_v54 }
 0x25f   : > { %v6655_v20 = vld [vmem:[#allocation39_spill] sm:$0xff]  ;;  %v6657_v41 = vld [vmem:[#allocation44_spill] sm:$0xff]  ;;  %v5783_v2 = vadd.f32 %v6658_v8, %v1400_v24  ;;  %v6660_v59 = vld [vmem:[#allocation45_spill] sm:$0xff]  ;;  %3095 = vmatprep.subr.bf16.mxu1 %v3094_v45 }
 0x260   : > { %v5768_v14 = vadd.f32 %v6655_v20, %v1395_v6  ;;  %v1399_v51 = vld [vmem:[%s3929_s6 + $0x510] sm:$0xff]  ;;  %v5780_v55 = vadd.f32 %v6657_v41, %v1276_v57  ;;  %v1280_v6 = vld [vmem:[%s3929_s6 + $0x158] sm:$0xff]  ;;  %v5793_v23 = vadd.f32 %v6660_v59, %v1271_v11  ;;  %v5796_v57 = vadd.f32 %v6661_v35, %v1275_v56  ;;  %v2274_v35 = vld [vmem:[%s3922_s11 + $0x28] sm:$0xff] }
 0x261   : > { %v1403_v4 = vld [vmem:[%s3929_s6 + $0x530] sm:$0xff]  ;;  %v1284_v43 = vld [vmem:[%s3929_s6 + $0x178] sm:$0xff]  ;;  %2347 = vmatprep.mubr.f32.mxu0 %v2274_v35  ;;  %2501 = vmatprep.mubr.f32.mxu1 %v2274_v35 }
 0x262   : > { %v6659_v5 = vld [vmem:[#allocation48_spill] sm:$0xff]  ;;  %v6662_v52 = vld [vmem:[#allocation49_spill] sm:$0xff]  ;;  %v6669_v54 = vld [vmem:[#allocation51_spill] sm:$0xff] }
 0x263   : > { %v5790_v38 = vadd.f32 %v6659_v5, %v1404_v50  ;;  %v1408_v41 = vld [vmem:[%s3929_s6 + $0x558] sm:$0xff]  ;;  %v1279_v24 = vld [vmem:[%s3929_s6 + $0x150] sm:$0xff]  ;;  %v5804_v50 = vadd.f32 %v6662_v52, %v1399_v51  ;;  %v6664_v51 = vld [vmem:[#allocation54_spill] sm:$0xff] }
 0x264   : > { %v1283_v8 = vld [vmem:[%s3929_s6 + $0x170] sm:$0xff]  ;;  %v1412_v59 = vld [vmem:[%s3929_s6 + $0x578] sm:$0xff]  ;;  %v5840_v36 = vadd.f32 %v4697_v60, %v1408_v41 }
 0x265   : > { %v6663_v5 = vld [vmem:[#allocation47_spill] sm:$0xff]  ;;  %v1288_v20 = vld [vmem:[%s3929_s6 + $0x198] sm:$0xff]  ;;  %v5852_v45 = vadd.f32 %v6669_v54, %v1283_v8 }
 0x266   : > { %v5807_v11 = vadd.f32 %v6663_v5, %v1403_v4  ;;  %v1407_v56 = vld [vmem:[%s3929_s6 + $0x550] sm:$0xff]  ;;  %v5823_v4 = vadd.f32 %v6664_v51, %v1280_v6  ;;  %v1292_v18 = vld [vmem:[%s3929_s6 + $0x1b8] sm:$0xff]  ;;  %v2273_v51 = vld [vmem:[%s3922_s11 + $0x20] sm:$0xff] }
 0x267   : > { %v1411_v5 = vld [vmem:[%s3929_s6 + $0x570] sm:$0xff]  ;;  %v1416_v29 = vld [vmem:[%s3929_s6 + $0x598] sm:$0xff]  ;;  %6670 = vst [vmem:[#allocation32_spill] sm:$0xff] %v5852_v45  ;;  %2348 = vmatmul.mubr.f32.gmra.mrb[2].mxu0 %v2273_v51  ;;  %2502 = vmatmul.mubr.f32.gmra.mrb[2].mxu1 %v2273_v51 }
 0x268   : > { %v6665_v37 = vld [vmem:[#allocation52_spill] sm:$0xff]  ;;  %v6667_v15 = vld [vmem:[#allocation53_spill] sm:$0xff]  ;;  %v6676_v8 = vld [vmem:[#allocation59_spill] sm:$0xff] }
 0x269   : > { %v5837_v53 = vadd.f32 %v6665_v37, %v1284_v43  ;;  %v1420_v6 = vld [vmem:[%s3929_s6 + $0x5b8] sm:$0xff]  ;;  %v5849_v62 = vadd.f32 %v6667_v15, %v1279_v24  ;;  %v1287_v60 = vld [vmem:[%s3929_s6 + $0x190] sm:$0xff]  ;;  %v5869_v54 = vadd.f32 %v6676_v8, %v1292_v18 }
 0x26a   : > { %v6666_v40 = vld [vmem:[#allocation56_spill] sm:$0xff]  ;;  %v6671_v43 = vld [vmem:[#allocation57_spill] sm:$0xff] }
 0x26b   : > { %v5846_v42 = vadd.f32 %v6666_v40, %v1412_v59  ;;  %6668 = vst [vmem:[#allocation34_spill] sm:$0xff] %v5849_v62  ;;  %v5855_v37 = vadd.f32 %v6671_v43, %v1407_v56  ;;  %v1291_v41 = vld [vmem:[%s3929_s6 + $0x1b0] sm:$0xff]  ;;  %v6674_v24 = vld [vmem:[#allocation61_spill] sm:$0xff] }
 0x26c   : > { %v1415_v31 = vld [vmem:[%s3929_s6 + $0x590] sm:$0xff]  ;;  %v5866_v15 = vadd.f32 %v6674_v24, %v1288_v20  ;;  %v1296_v43 = vld [vmem:[%s3929_s6 + $0x1d8] sm:$0xff] }
 0x26d   : > { %6672 = vst [vmem:[#allocation30_spill] sm:$0xff] %v5855_v37  ;;  %v6673_v40 = vld [vmem:[#allocation55_spill] sm:$0xff]  ;;  %v2272_v52 = vld [vmem:[%s3922_s11 + $0x18] sm:$0xff]  ;;  %v6685_v37 = vld [vmem:[#allocation62_spill] sm:$0xff] }
 0x26e   : > { %v5863_v12 = vadd.f32 %v6673_v40, %v1411_v5  ;;  %6675 = vst [vmem:[#allocation29_spill] sm:$0xff] %v5866_v15  ;;  %v1419_v56 = vld [vmem:[%s3929_s6 + $0x5b0] sm:$0xff]  ;;  %v6677_v5 = vld [vmem:[#allocation65_spill] sm:$0xff]  ;;  %2418 = vmatprep.mubr.f32.mxu0 %v2272_v52  ;;  %2572 = vmatprep.mubr.f32.mxu1 %v2272_v52 }
 0x26f   : > { %v5879_v40 = vadd.f32 %v6677_v5, %v1416_v29  ;;  %v6679_v20 = vld [vmem:[#allocation63_spill] sm:$0xff]  ;;  %v1300_v18 = vld [vmem:[%s3929_s6 + $0x1f8] sm:$0xff]  ;;  %v6683_v29 = vld [vmem:[#allocation58_spill] sm:$0xff]  ;;  %v5905_v26 = vadd.f32 %v6685_v37, %v1419_v56 }
 0x270   : > { %v5882_v24 = vadd.f32 %v6679_v20, %v1420_v6  ;;  %v1424_v8 = vld [vmem:[%s3929_s6 + $0x5d8] sm:$0xff]  ;;  %v5895_v5 = vadd.f32 %v6683_v29, %v1291_v41  ;;  %v1295_v6 = vld [vmem:[%s3929_s6 + $0x1d0] sm:$0xff] }
 0x271   : > { %6678 = vst [vmem:[#allocation33_spill] sm:$0xff] %v5879_v40  ;;  %v1428_v17 = vld [vmem:[%s3929_s6 + $0x5f8] sm:$0xff]  ;;  %v1299_v20 = vld [vmem:[%s3929_s6 + $0x1f0] sm:$0xff] }
 0x272   : > { %6680 = vst [vmem:[#allocation31_spill] sm:$0xff] %v5882_v24  ;;  %v6681_v32 = vld [vmem:[#allocation60_spill] sm:$0xff]  ;;  %v6687_v29 = vld [vmem:[#allocation67_spill] sm:$0xff]  ;;  %v6690_v24 = vpack.c.bf16 %v5680_v39, %v5670_v48  ;;  %v6696_v48 = vpack.c.bf16 %v5695_v1, %v5692_v0  ;;  %v6697_v39 = vpack.c.bf16 %v5705_v27, %v5702_v9  ;;  %v6700_v1 = vld [vmem:[#allocation70_spill] sm:$0xff] }
 0x273   : > { %v5892_v59 = vadd.f32 %v6681_v32, %v1287_v60  ;;  %v6684_v45 = vld [vmem:[#allocation64_spill] sm:$0xff]  ;;  %v6686_v32 = vld [vmem:[#allocation69_spill] sm:$0xff]  ;;  %v5915_v62 = vadd.f32 %v6687_v29, %v1300_v18  ;;  %v6689_v37 = vld [vmem:[#allocation71_spill] sm:$0xff]  ;;  %v6691_v18 = vpack.c.bf16 %v5689_v58, %v5683_v28 }
 0x274   : > { %v5902_v35 = vadd.f32 %v6684_v45, %v1415_v31  ;;  %v5908_v60 = vadd.f32 %v6686_v32, %v1296_v43  ;;  %v1423_v15 = vld [vmem:[%s3929_s6 + $0x5d0] sm:$0xff]  ;;  %v6688_v31 = vld [vmem:[#allocation73_spill] sm:$0xff]  ;;  %v5921_v56 = vadd.f32 %v6689_v37, %v1428_v17  ;;  %2969 = vmatpush1.bf16.xpose.msra.mxu0 %v6690_v24 }
 0x275   : > { %6682 = vst [vmem:[#allocation38_spill] sm:$0xff] %v5892_v59  ;;  %v1427_v41 = vld [vmem:[%s3929_s6 + $0x5f0] sm:$0xff]  ;;  %v5918_v45 = vadd.f32 %v6688_v31, %v1424_v8  ;;  %v1304_v43 = vld [vmem:[%s3929_s6 + $0x218] sm:$0xff]  ;;  %3097 = vmatpush1.bf16.xpose.msra.mxu1 %v6691_v18  ;;  %v6694_v31 = vld [vmem:[#allocation66_spill] sm:$0xff]  ;;  %2971 = vmatprep.subr.bf16.mxu0 %v6696_v48 }
 0x276   : > { %v1308_v32 = vld [vmem:[%s3929_s6 + $0x238] sm:$0xff]  ;;  %v1303_v40 = vld [vmem:[%s3929_s6 + $0x210] sm:$0xff]  ;;  %v5938_v37 = vadd.f32 %v6694_v31, %v1299_v20  ;;  %3099 = vmatprep.subr.bf16.mxu1 %v6697_v39  ;;  %v5961_v9 = vadd.f32 %v6700_v1, %v1427_v41  ;;  %v6711_v1 = vld [vmem:[#allocation74_spill] sm:$0xff] }
 0x277   : > { %v6692_v29 = vld [vmem:[#allocation68_spill] sm:$0xff]  ;;  %v6702_v27 = vld [vmem:[#allocation77_spill] sm:$0xff]  ;;  %v6704_v31 = vld [vmem:[#allocation75_spill] sm:$0xff] }
 0x278   : > { %v5935_v17 = vadd.f32 %v6692_v29, %v1295_v6  ;;  %6695 = vst [vmem:[#allocation42_spill] sm:$0xff] %v5938_v37  ;;  %v1432_v52 = vld [vmem:[%s3929_s6 + $0x618] sm:$0xff]  ;;  %v1307_v59 = vld [vmem:[%s3929_s6 + $0x230] sm:$0xff]  ;;  %6701 = vst [vmem:[#allocation37_spill] sm:$0xff] %v5961_v9  ;;  %v5964_v29 = vadd.f32 %v6702_v27, %v1304_v43  ;;  %v5967_v48 = vadd.f32 %v6704_v31, %v1308_v32 }
 0x279   : > { %v1436_v51 = vld [vmem:[%s3929_s6 + $0x638] sm:$0xff]  ;;  %v1431_v20 = vld [vmem:[%s3929_s6 + $0x610] sm:$0xff]  ;;  %v5981_v43 = vadd.f32 %v6711_v1, %v1307_v59 }
 0x27a   : > { %6693 = vst [vmem:[#allocation36_spill] sm:$0xff] %v5935_v17  ;;  %v6698_v24 = vld [vmem:[#allocation72_spill] sm:$0xff]  ;;  %6703 = vst [vmem:[#allocation35_spill] sm:$0xff] %v5964_v29  ;;  %v6708_v28 = vld [vmem:[#allocation79_spill] sm:$0xff] }
 0x27b   : > { %v5954_v6 = vadd.f32 %v6698_v24, %v1423_v15  ;;  %v1435_v18 = vld [vmem:[%s3929_s6 + $0x630] sm:$0xff]  ;;  %6705 = vst [vmem:[#allocation41_spill] sm:$0xff] %v5967_v48  ;;  %v1312_v39 = vld [vmem:[%s3929_s6 + $0x258] sm:$0xff]  ;;  %v5975_v8 = vadd.f32 %v6708_v28, %v1436_v51  ;;  %6712 = vst [vmem:[#allocation44_spill] sm:$0xff] %v5981_v43 }
 0x27c   : > { %v1316_v15 = vld [vmem:[%s3929_s6 + $0x278] sm:$0xff]  ;;  %v1311_v31 = vld [vmem:[%s3929_s6 + $0x250] sm:$0xff] }
 0x27d   : > { %6699 = vst [vmem:[#allocation40_spill] sm:$0xff] %v5954_v6  ;;  %v6706_v24 = vld [vmem:[#allocation81_spill] sm:$0xff]  ;;  %v6709_v0 = vld [vmem:[#allocation76_spill] sm:$0xff]  ;;  %v6721_v37 = vld [vmem:[#allocation87_spill] sm:$0xff] }
 0x27e   : > { %v5972_v58 = vadd.f32 %v6706_v24, %v1432_v52  ;;  %v5978_v41 = vadd.f32 %v6709_v0, %v1303_v40  ;;  %v1440_v27 = vld [vmem:[%s3929_s6 + $0x658] sm:$0xff]  ;;  %v6715_v40 = vld [vmem:[#allocation78_spill] sm:$0xff]  ;;  %v1315_v59 = vld [vmem:[%s3929_s6 + $0x270] sm:$0xff] }
 0x27f   : > { %v1444_v32 = vld [vmem:[%s3929_s6 + $0x678] sm:$0xff]  ;;  %v5994_v28 = vadd.f32 %v6715_v40, %v1435_v18  ;;  %v1439_v0 = vld [vmem:[%s3929_s6 + $0x650] sm:$0xff] }
 0x280   : > { %6707 = vst [vmem:[#allocation39_spill] sm:$0xff] %v5972_v58  ;;  %6710 = vst [vmem:[#allocation46_spill] sm:$0xff] %v5978_v41  ;;  %v6713_v24 = vld [vmem:[#allocation80_spill] sm:$0xff]  ;;  %v6716_v6 = vld [vmem:[#allocation85_spill] sm:$0xff]  ;;  %v6017_v58 = vadd.f32 %v6721_v37, %v1444_v32 }
 0x281   : > { %v5991_v51 = vadd.f32 %v6713_v24, %v1431_v20  ;;  %v1443_v1 = vld [vmem:[%s3929_s6 + $0x670] sm:$0xff]  ;;  %v6004_v52 = vadd.f32 %v6716_v6, %v1312_v39  ;;  %v1320_v18 = vld [vmem:[%s3929_s6 + $0x298] sm:$0xff] }
 0x282   : > { %v6718_v20 = vld [vmem:[#allocation83_spill] sm:$0xff]  ;;  %v1324_v40 = vld [vmem:[%s3929_s6 + $0x2b8] sm:$0xff] }
 0x283   : > { %6714 = vst [vmem:[#allocation50_spill] sm:$0xff] %v5991_v51  ;;  %6717 = vst [vmem:[#allocation48_spill] sm:$0xff] %v6004_v52  ;;  %v6007_v24 = vadd.f32 %v6718_v20, %v1316_v15  ;;  %v6720_v48 = vld [vmem:[#allocation89_spill] sm:$0xff]  ;;  %v6722_v17 = vld [vmem:[#allocation84_spill] sm:$0xff]  ;;  %v6726_v51 = vpack.c.bf16 %v5718_v25, %v5708_v16  ;;  %v6727_v15 = vpack.c.bf16 %v5729_v33, %v5726_v30 }
 0x284   : > { %v6014_v9 = vadd.f32 %v6720_v48, %v1440_v27  ;;  %v6020_v41 = vadd.f32 %v6722_v17, %v1311_v31  ;;  %v1448_v6 = vld [vmem:[%s3929_s6 + $0x698] sm:$0xff]  ;;  %v1319_v39 = vld [vmem:[%s3929_s6 + $0x290] sm:$0xff]  ;;  %v6723_v20 = vld [vmem:[#allocation82_spill] sm:$0xff]  ;;  %v6731_v16 = vpack.c.bf16 %v5740_v49, %v5737_v63  ;;  %v6732_v25 = vpack.c.bf16 %v5750_v47, %v5743_v46 }
 0x285   : > { %6719 = vst [vmem:[#allocation45_spill] sm:$0xff] %v6007_v24  ;;  %v6027_v43 = vadd.f32 %v6723_v20, %v1315_v59  ;;  %v6724_v29 = vld [vmem:[#allocation88_spill] sm:$0xff]  ;;  %v6725_v27 = vld [vmem:[#allocation86_spill] sm:$0xff]  ;;  %2973 = vmatpush1.bf16.xpose.msra.mxu0 %v6726_v51  ;;  %3101 = vmatpush1.bf16.xpose.msra.mxu1 %v6727_v15  ;;  %v6728_v59 = vld [vmem:[#allocation93_spill] sm:$0xff] }
 0x286   : > { %v6030_v48 = vadd.f32 %v6724_v29, %v1439_v0  ;;  %v6033_v37 = vadd.f32 %v6725_v27, %v1443_v1  ;;  %v1452_v32 = vld [vmem:[%s3929_s6 + $0x6b8] sm:$0xff]  ;;  %v1323_v17 = vld [vmem:[%s3929_s6 + $0x2b0] sm:$0xff]  ;;  %v6047_v0 = vadd.f32 %v6728_v59, %v1320_v18  ;;  %2975 = vmatprep.subr.bf16.mxu0 %v6731_v16  ;;  %3103 = vmatprep.subr.bf16.mxu1 %v6732_v25  ;;  %v6743_v30 = vld [vmem:[#allocation94_spill] sm:$0xff] }
 0x287   : > { %v1447_v31 = vld [vmem:[%s3929_s6 + $0x690] sm:$0xff]  ;;  %v1328_v52 = vld [vmem:[%s3929_s6 + $0x2d8] sm:$0xff] }
 0x288   : > { %6729 = vst [vmem:[#allocation43_spill] sm:$0xff] %v6047_v0  ;;  %v6730_v1 = vld [vmem:[#allocation91_spill] sm:$0xff]  ;;  %v1332_v24 = vld [vmem:[%s3929_s6 + $0x2f8] sm:$0xff] }
 0x289   : > { %v6050_v20 = vadd.f32 %v6730_v1, %v1324_v40  ;;  %v1451_v27 = vld [vmem:[%s3929_s6 + $0x6b0] sm:$0xff]  ;;  %v6733_v51 = vld [vmem:[#allocation97_spill] sm:$0xff]  ;;  %v6739_v1 = vld [vmem:[#allocation90_spill] sm:$0xff] }
 0x28a   : > { %v6066_v18 = vadd.f32 %v6733_v51, %v1448_v6  ;;  %v1456_v40 = vld [vmem:[%s3929_s6 + $0x6d8] sm:$0xff]  ;;  %v6735_v49 = vld [vmem:[#allocation95_spill] sm:$0xff]  ;;  %v6079_v16 = vadd.f32 %v6739_v1, %v1323_v17  ;;  %v6087_v29 = vadd.f32 %v6743_v30, %v1451_v27 }
 0x28b   : > { %v1460_v15 = vld [vmem:[%s3929_s6 + $0x6f8] sm:$0xff]  ;;  %v6073_v46 = vadd.f32 %v6735_v49, %v1452_v32  ;;  %v1327_v25 = vld [vmem:[%s3929_s6 + $0x2d0] sm:$0xff]  ;;  %v6103_v27 = vadd.f32 %v5289_v61, %v1456_v40  ;;  %v6752_v61 = vld [vmem:[#allocation98_spill] sm:$0xff] }
 0x28c   : > { %6734 = vst [vmem:[#allocation49_spill] sm:$0xff] %v6066_v18  ;;  %v6737_v47 = vld [vmem:[#allocation92_spill] sm:$0xff]  ;;  %6740 = vst [vmem:[#allocation52_spill] sm:$0xff] %v6079_v16  ;;  %v6744_v63 = vld [vmem:[#allocation101_spill] sm:$0xff] }
 0x28d   : > { %6736 = vst [vmem:[#allocation47_spill] sm:$0xff] %v6073_v46  ;;  %v6076_v59 = vadd.f32 %v6737_v47, %v1319_v39  ;;  %v1331_v6 = vld [vmem:[%s3929_s6 + $0x2f0] sm:$0xff]  ;;  %v6090_v32 = vadd.f32 %v6744_v63, %v1328_v52  ;;  %v1336_v1 = vld [vmem:[%s3929_s6 + $0x318] sm:$0xff]  ;;  %6748 = vst [vmem:[#allocation57_spill] sm:$0xff] %v6103_v27  ;;  %v6763_v27 = vpack.c.bf16 %v5756_v44, %v5753_v3 }
 0x28e   : > { %v6741_v51 = vld [vmem:[#allocation96_spill] sm:$0xff]  ;;  %v6746_v49 = vld [vmem:[#allocation99_spill] sm:$0xff]  ;;  %v6119_v40 = vadd.f32 %v6752_v61, %v1331_v6  ;;  %v6758_v61 = vld [vmem:[#allocation106_spill] sm:$0xff]  ;;  %v6764_v6 = vpack.c.bf16 %v5768_v14, %v5765_v10  ;;  %v6769_v3 = vpack.c.bf16 %v5780_v55, %v5771_v13  ;;  %v6770_v44 = vpack.c.bf16 %v5790_v38, %v5783_v2 }
 0x28f   : > { %6738 = vst [vmem:[#allocation54_spill] sm:$0xff] %v6076_v59  ;;  %v6084_v33 = vadd.f32 %v6741_v51, %v1447_v31  ;;  %6745 = vst [vmem:[#allocation53_spill] sm:$0xff] %v6090_v32  ;;  %v6093_v39 = vadd.f32 %v6746_v49, %v1332_v24  ;;  %v1455_v47 = vld [vmem:[%s3929_s6 + $0x6d0] sm:$0xff]  ;;  %v1340_v24 = vld [vmem:[%s3929_s6 + $0x338] sm:$0xff]  ;;  %2977 = vmatpush1.bf16.xpose.msra.mxu0 %v6763_v27 }
 0x290   : > { %v1459_v17 = vld [vmem:[%s3929_s6 + $0x6f0] sm:$0xff]  ;;  %v1464_v63 = vld [vmem:[%s3929_s6 + $0x718] sm:$0xff]  ;;  %6753 = vst [vmem:[#allocation61_spill] sm:$0xff] %v6119_v40  ;;  %v6755_v49 = vld [vmem:[#allocation102_spill] sm:$0xff]  ;;  %3105 = vmatpush1.bf16.xpose.msra.mxu1 %v6764_v6  ;;  %2979 = vmatprep.subr.bf16.mxu0 %v6769_v3 }
 0x291   : > { %6742 = vst [vmem:[#allocation56_spill] sm:$0xff] %v6084_v33  ;;  %6747 = vst [vmem:[#allocation51_spill] sm:$0xff] %v6093_v39  ;;  %v6749_v52 = vld [vmem:[#allocation103_spill] sm:$0xff]  ;;  %v1468_v51 = vld [vmem:[%s3929_s6 + $0x738] sm:$0xff]  ;;  %v6129_v33 = vadd.f32 %v6755_v49, %v1459_v17  ;;  %v6139_v39 = vadd.f32 %v6758_v61, %v1340_v24  ;;  %3107 = vmatprep.subr.bf16.mxu1 %v6770_v44 }
 0x292   : > { %v6106_v30 = vadd.f32 %v6749_v52, %v1460_v15  ;;  %v6750_v18 = vld [vmem:[#allocation100_spill] sm:$0xff]  ;;  %v6765_v24 = vld [vmem:[#allocation107_spill] sm:$0xff]  ;;  %v6773_v13 = vld [vmem:[#allocation109_spill] sm:$0xff] }
 0x293   : > { %v6116_v31 = vadd.f32 %v6750_v18, %v1327_v25  ;;  %v1335_v15 = vld [vmem:[%s3929_s6 + $0x310] sm:$0xff]  ;;  %v1344_v49 = vld [vmem:[%s3929_s6 + $0x358] sm:$0xff]  ;;  %v6780_v14 = vld [vmem:[#allocation118_spill] sm:$0xff] }
 0x294   : > { %v1339_v52 = vld [vmem:[%s3929_s6 + $0x330] sm:$0xff]  ;;  %v1352_v44 = vld [vmem:[%s3929_s6 + $0x398] sm:$0xff] }
 0x295   : > { %6751 = vst [vmem:[#allocation55_spill] sm:$0xff] %v6116_v31  ;;  %v6754_v16 = vld [vmem:[#allocation104_spill] sm:$0xff]  ;;  %v6771_v27 = vld [vmem:[#allocation111_spill] sm:$0xff] }
 0x296   : > { %v6126_v46 = vadd.f32 %v6754_v16, %v1455_v47  ;;  %v6756_v0 = vld [vmem:[#allocation108_spill] sm:$0xff]  ;;  %v6761_v47 = vld [vmem:[#allocation110_spill] sm:$0xff]  ;;  %v6782_v55 = vld [vmem:[#allocation115_spill] sm:$0xff] }
 0x297   : > { %v6132_v32 = vadd.f32 %v6756_v0, %v1336_v1  ;;  %v1463_v18 = vld [vmem:[%s3929_s6 + $0x710] sm:$0xff]  ;;  %v6145_v17 = vadd.f32 %v6761_v47, %v1468_v51  ;;  %v1348_v0 = vld [vmem:[%s3929_s6 + $0x378] sm:$0xff] }
 0x298   : > { %v1467_v25 = vld [vmem:[%s3929_s6 + $0x730] sm:$0xff]  ;;  %v6767_v51 = vld [vmem:[#allocation105_spill] sm:$0xff] }
 0x299   : > { %6757 = vst [vmem:[#allocation59_spill] sm:$0xff] %v6132_v32  ;;  %v6759_v59 = vld [vmem:[#allocation112_spill] sm:$0xff]  ;;  %6762 = vst [vmem:[#allocation63_spill] sm:$0xff] %v6145_v17  ;;  %v6162_v61 = vadd.f32 %v6767_v51, %v1339_v52  ;;  %v6185_v38 = vadd.f32 %v6773_v13, %v1467_v25  ;;  %v6777_v51 = vld [vmem:[#allocation114_spill] sm:$0xff] }
 0x29a   : > { %v6142_v16 = vadd.f32 %v6759_v59, %v1464_v63  ;;  %v1343_v1 = vld [vmem:[%s3929_s6 + $0x350] sm:$0xff]  ;;  %v6159_v63 = vadd.f32 %v6765_v24, %v1335_v15  ;;  %v1472_v47 = vld [vmem:[%s3929_s6 + $0x758] sm:$0xff]  ;;  %v6178_v15 = vadd.f32 %v6771_v27, %v1463_v18  ;;  %v6191_v3 = vadd.f32 %v6777_v51, %v1348_v0 }
 0x29b   : > { %6768 = vst [vmem:[#allocation58_spill] sm:$0xff] %v6162_v61  ;;  %v1476_v31 = vld [vmem:[%s3929_s6 + $0x778] sm:$0xff]  ;;  %v1347_v40 = vld [vmem:[%s3929_s6 + $0x370] sm:$0xff]  ;;  %6774 = vst [vmem:[#allocation62_spill] sm:$0xff] %v6185_v38  ;;  %v6196_v27 = vadd.f32 %v5449_v34, %v1472_v47  ;;  %v6202_v25 = vadd.f32 %v6782_v55, %v1343_v1 }
 0x29c   : > { %6760 = vst [vmem:[#allocation65_spill] sm:$0xff] %v6142_v16  ;;  %6766 = vst [vmem:[#allocation60_spill] sm:$0xff] %v6159_v63  ;;  %v1471_v52 = vld [vmem:[%s3929_s6 + $0x750] sm:$0xff]  ;;  %v1356_v18 = vld [vmem:[%s3929_s6 + $0x3b8] sm:$0xff]  ;;  %v6199_v10 = vadd.f32 %v6780_v14, %v1476_v31 }
 0x29d   : > { %6772 = vst [vmem:[#allocation64_spill] sm:$0xff] %v6178_v15  ;;  %v1475_v6 = vld [vmem:[%s3929_s6 + $0x770] sm:$0xff]  ;;  %6778 = vst [vmem:[#allocation67_spill] sm:$0xff] %v6191_v3  ;;  %v6784_v13 = vld [vmem:[#allocation113_spill] sm:$0xff] }
 0x29e   : > { %v6775_v2 = vld [vmem:[#allocation116_spill] sm:$0xff]  ;;  %6779 = vst [vmem:[#allocation73_spill] sm:$0xff] %v6196_v27  ;;  %6781 = vst [vmem:[#allocation71_spill] sm:$0xff] %v6199_v10  ;;  %v6786_v47 = vld [vmem:[#allocation119_spill] sm:$0xff] }
 0x29f   : > { %v6188_v24 = vadd.f32 %v6775_v2, %v1344_v49  ;;  %6783 = vst [vmem:[#allocation68_spill] sm:$0xff] %v6202_v25  ;;  %v6205_v49 = vadd.f32 %v6784_v13, %v1347_v40  ;;  %v1480_v2 = vld [vmem:[%s3929_s6 + $0x798] sm:$0xff]  ;;  %v1351_v51 = vld [vmem:[%s3929_s6 + $0x390] sm:$0xff]  ;;  %v6215_v31 = vadd.f32 %v6786_v47, %v1471_v52  ;;  %v6792_v10 = vld [vmem:[#allocation122_spill] sm:$0xff] }
 0x2a0   : > { %v1484_v0 = vld [vmem:[%s3929_s6 + $0x7b8] sm:$0xff]  ;;  %v1355_v55 = vld [vmem:[%s3929_s6 + $0x3b0] sm:$0xff]  ;;  %v2119_v61 = vadd.f32 %v6792_v10, %v1351_v51 }
 0x2a1   : > { %6776 = vst [vmem:[#allocation69_spill] sm:$0xff] %v6188_v24  ;;  %6785 = vst [vmem:[#allocation66_spill] sm:$0xff] %v6205_v49  ;;  %v6787_v1 = vld [vmem:[#allocation117_spill] sm:$0xff]  ;;  %v1479_v40 = vld [vmem:[%s3929_s6 + $0x790] sm:$0xff] }
 0x2a2   : > { %v6218_v14 = vadd.f32 %v6787_v1, %v1475_v6  ;;  %v1483_v13 = vld [vmem:[%s3929_s6 + $0x7b0] sm:$0xff]  ;;  %v6789_v52 = vld [vmem:[#allocation121_spill] sm:$0xff] }
 0x2a3   : > { %v6788_v15 = vld [vmem:[#allocation123_spill] sm:$0xff]  ;;  %v6231_v47 = vadd.f32 %v6789_v52, %v1356_v18  ;;  %v1360_v6 = vld [vmem:[%s3929_s6 + $0x3d8] sm:$0xff]  ;;  %v6794_v18 = vld [vmem:[#allocation126_spill] sm:$0xff] }
 0x2a4   : > { %v6228_v34 = vadd.f32 %v6788_v15, %v1352_v44  ;;  %v1364_v1 = vld [vmem:[%s3929_s6 + $0x3f8] sm:$0xff]  ;;  %v3144_v24 = vpack.c.bf16 %v6218_v14, %v6215_v31  ;;  %v6790_v3 = vld [vmem:[#allocation127_spill] sm:$0xff]  ;;  %v2247_v52 = vadd.f32 %v6794_v18, %v1479_v40  ;;  %v6801_v14 = vpack.c.bf16 %v5846_v42, %v5840_v36  ;;  %v6807_v42 = vld [vmem:[#allocation30_spill] sm:$0xff] }
 0x2a5   : > { %v6238_v38 = vadd.f32 %v6790_v3, %v1480_v2  ;;  %v6791_v63 = vld [vmem:[#allocation125_spill] sm:$0xff]  ;;  %v6793_v44 = vld [vmem:[#allocation120_spill] sm:$0xff]  ;;  %v6796_v3 = vpack.c.bf16 %v5796_v57, %v5793_v23  ;;  %v6798_v2 = vld [vmem:[#allocation131_spill] sm:$0xff] }
 0x2a6   : > { %v2252_v27 = vadd.f32 %v6791_v63, %v1484_v0  ;;  %v1488_v59 = vld [vmem:[%s3929_s6 + $0x7d8] sm:$0xff]  ;;  %v3018_v15 = vpack.c.bf16 %v6231_v47, %v6228_v34  ;;  %v2123_v25 = vadd.f32 %v6793_v44, %v1355_v55  ;;  %v1359_v32 = vld [vmem:[%s3929_s6 + $0x3d0] sm:$0xff]  ;;  %v6797_v63 = vpack.c.bf16 %v5807_v11, %v5804_v50 }
 0x2a7   : > { %v6795_v49 = vld [vmem:[#allocation124_spill] sm:$0xff]  ;;  %2981 = vmatpush1.bf16.xpose.msra.mxu0 %v6796_v3  ;;  %v2128_v0 = vadd.f32 %v6798_v2, %v1360_v6  ;;  %v6799_v51 = vld [vmem:[#allocation129_spill] sm:$0xff]  ;;  %v2256_v55 = vadd.f32 %v5602_v22, %v1488_v59  ;;  %v3152_v47 = vpack.c.bf16 %v5600_v19, %v5613_v21  ;;  %v6814_v19 = vld [vmem:[#allocation38_spill] sm:$0xff] }
 0x2a8   : > { %v2251_v16 = vadd.f32 %v6795_v49, %v1483_v13  ;;  %v1492_v17 = vld [vmem:[%s3929_s6 + $0x7f8] sm:$0xff]  ;;  %v1363_v31 = vld [vmem:[%s3929_s6 + $0x3f0] sm:$0xff]  ;;  %3109 = vmatpush1.bf16.xpose.msra.mxu1 %v6797_v63  ;;  %v3146_v10 = vpack.c.bf16 %v2252_v27, %v6238_v38  ;;  %v2132_v34 = vadd.f32 %v6799_v51, %v1364_v1  ;;  %v6800_v49 = vpack.c.bf16 %v5837_v53, %v5823_v4  ;;  %v6802_v38 = vld [vmem:[#allocation130_spill] sm:$0xff] }
 0x2a9   : > { %3111 = vmatprep.subr.bf16.mxu1 %v6801_v14  ;;  %v3020_v23 = vpack.c.bf16 %v2123_v25, %v2119_v61  ;;  %v2260_v11 = vadd.f32 %v5588_v7, %v1492_v17  ;;  %v2127_v27 = vadd.f32 %v6802_v38, %v1359_v32  ;;  %v6803_v40 = vld [vmem:[#allocation128_spill] sm:$0xff]  ;;  %v6805_v1 = vld [vmem:[#allocation34_spill] sm:$0xff]  ;;  %v6809_v22 = vld [vmem:[#allocation29_spill] sm:$0xff]  ;;  %v6815_v21 = vpack.c.bf16 %v5895_v5, %v6814_v19 }
 0x2aa   : > { %2983 = vmatprep.subr.bf16.mxu0 %v6800_v49  ;;  %v3148_v57 = vpack.c.bf16 %v2251_v16, %v2247_v52  ;;  %v3022_v50 = vpack.c.bf16 %v2132_v34, %v2128_v0  ;;  %v2131_v13 = vadd.f32 %v6803_v40, %v1363_v31  ;;  %v6804_v6 = vld [vmem:[#allocation32_spill] sm:$0xff]  ;;  %v6808_v16 = vpack.c.bf16 %v5863_v12, %v6807_v42  ;;  %v6811_v32 = vld [vmem:[#allocation31_spill] sm:$0xff]  ;;  %v6812_v17 = vld [vmem:[#allocation33_spill] sm:$0xff] }
 0x2ab   : > { %v3150_v4 = vpack.c.bf16 %v2260_v11, %v2256_v55  ;;  %v6806_v36 = vpack.c.bf16 %v6804_v6, %v6805_v1  ;;  %v6810_v7 = vpack.c.bf16 %v5869_v54, %v6809_v22  ;;  %v6813_v59 = vpack.c.bf16 %v6811_v32, %v6812_v17  ;;  %v6819_v25 = vld [vmem:[#allocation42_spill] sm:$0xff]  ;;  %v6820_v44 = vld [vmem:[#allocation36_spill] sm:$0xff]  ;;  %v6822_v52 = vld [vmem:[#allocation37_spill] sm:$0xff] }
 0x2ac   : > { %v3024_v53 = vpack.c.bf16 %v2131_v13, %v2127_v27  ;;  %v6816_v61 = vpack.c.bf16 %v5905_v26, %v5902_v35  ;;  %v6817_v12 = vpack.c.bf16 %v5915_v62, %v5908_v60  ;;  %v6818_v54 = vpack.c.bf16 %v5921_v56, %v5918_v45  ;;  %v6823_v31 = vld [vmem:[#allocation40_spill] sm:$0xff]  ;;  %v6825_v3 = vld [vmem:[#allocation41_spill] sm:$0xff]  ;;  %v6826_v63 = vld [vmem:[#allocation35_spill] sm:$0xff] }
 0x2ad   : > { %v6821_v18 = vpack.c.bf16 %v6819_v25, %v6820_v44  ;;  %v6824_v5 = vpack.c.bf16 %v6822_v52, %v6823_v31  ;;  %v6827_v26 = vpack.c.bf16 %v6825_v3, %v6826_v63  ;;  %v6828_v35 = vld [vmem:[#allocation39_spill] sm:$0xff]  ;;  %v6830_v60 = vld [vmem:[#allocation44_spill] sm:$0xff]  ;;  %v6831_v2 = vld [vmem:[#allocation46_spill] sm:$0xff]  ;;  %v6838_v14 = vpack.c.bf16 %v6017_v58, %v6014_v9 }
 0x2ae   : > { %v6829_v62 = vpack.c.bf16 %v5975_v8, %v6828_v35  ;;  %v6832_v45 = vpack.c.bf16 %v6830_v60, %v6831_v2  ;;  %v6833_v56 = vld [vmem:[#allocation50_spill] sm:$0xff]  ;;  %v6835_v51 = vld [vmem:[#allocation45_spill] sm:$0xff]  ;;  %v6836_v34 = vld [vmem:[#allocation48_spill] sm:$0xff]  ;;  %v6839_v8 = vpack.c.bf16 %v6027_v43, %v6020_v41  ;;  %v6840_v55 = vpack.c.bf16 %v6033_v37, %v6030_v48 }
 0x2af   : > { %2985 = vmatpush1.bf16.xpose.msra.mxu0 %v6806_v36  ;;  %v6834_v0 = vpack.c.bf16 %v5994_v28, %v6833_v56  ;;  %v6837_v49 = vpack.c.bf16 %v6835_v51, %v6836_v34  ;;  %v6841_v11 = vld [vmem:[#allocation43_spill] sm:$0xff]  ;;  %v6844_v27 = vld [vmem:[#allocation49_spill] sm:$0xff]  ;;  %v6846_v13 = vld [vmem:[#allocation52_spill] sm:$0xff]  ;;  %v6859_v22 = vpack.c.bf16 %v6129_v33, %v6126_v46 }
 0x2b0   : > { %3113 = vmatpush1.bf16.xpose.msra.mxu1 %v6808_v16  ;;  %2987 = vmatprep.subr.bf16.mxu0 %v6810_v7  ;;  %v6842_v28 = vpack.c.bf16 %v6050_v20, %v6841_v11  ;;  %v6843_v38 = vld [vmem:[#allocation47_spill] sm:$0xff]  ;;  %v6847_v6 = vld [vmem:[#allocation54_spill] sm:$0xff]  ;;  %v6849_v9 = vld [vmem:[#allocation56_spill] sm:$0xff] }
 0x2b1   : > { %3115 = vmatprep.subr.bf16.mxu1 %v6813_v59  ;;  %v6845_v40 = vpack.c.bf16 %v6843_v38, %v6844_v27  ;;  %v6848_v58 = vpack.c.bf16 %v6846_v13, %v6847_v6  ;;  %v6850_v41 = vpack.c.bf16 %v6087_v29, %v6849_v9  ;;  %v6851_v43 = vld [vmem:[#allocation51_spill] sm:$0xff]  ;;  %v6852_v1 = vld [vmem:[#allocation53_spill] sm:$0xff]  ;;  %v6865_v19 = vld [vmem:[#allocation58_spill] sm:$0xff] }
 0x2b2   : > { %v6853_v48 = vpack.c.bf16 %v6851_v43, %v6852_v1  ;;  %v6854_v37 = vld [vmem:[#allocation57_spill] sm:$0xff]  ;;  %v6857_v42 = vld [vmem:[#allocation55_spill] sm:$0xff]  ;;  %v6877_v52 = vld [vmem:[#allocation66_spill] sm:$0xff] }
 0x2b3   : > { %v6855_v20 = vpack.c.bf16 %v6106_v30, %v6854_v37  ;;  %v6856_v36 = vld [vmem:[#allocation61_spill] sm:$0xff]  ;;  %v6860_v7 = vld [vmem:[#allocation59_spill] sm:$0xff]  ;;  %v6866_v30 = vld [vmem:[#allocation60_spill] sm:$0xff] }
 0x2b4   : > { %v6858_v16 = vpack.c.bf16 %v6856_v36, %v6857_v42  ;;  %v6861_v29 = vpack.c.bf16 %v6139_v39, %v6860_v7  ;;  %v6862_v32 = vld [vmem:[#allocation63_spill] sm:$0xff]  ;;  %v6863_v17 = vld [vmem:[#allocation65_spill] sm:$0xff]  ;;  %v6878_v31 = vld [vmem:[#allocation68_spill] sm:$0xff] }
 0x2b5   : > { %v6864_v59 = vpack.c.bf16 %v6862_v32, %v6863_v17  ;;  %v6871_v33 = vld [vmem:[#allocation67_spill] sm:$0xff]  ;;  %v6872_v46 = vld [vmem:[#allocation69_spill] sm:$0xff] }
 0x2b6   : > { %v6873_v25 = vpack.c.bf16 %v6871_v33, %v6872_v46  ;;  %v6874_v39 = vld [vmem:[#allocation71_spill] sm:$0xff]  ;;  %v6875_v44 = vld [vmem:[#allocation73_spill] sm:$0xff] }
 0x2b7   : > { %2989 = vmatpush1.bf16.xpose.msra.mxu0 %v6815_v21  ;;  %v6867_v21 = vpack.c.bf16 %v6865_v19, %v6866_v30  ;;  %v2271_v3 = vld [vmem:[%s3922_s11 + $0x10] sm:$0xff]  ;;  %v2276_v63 = vld [vmem:[%s3922_s11 + $0x38] sm:$0xff]  ;;  %v2261_v35 = vld [vmem:[#allocation2] sm:$0xff] }
 0x2b8   : > { %3117 = vmatpush1.bf16.xpose.msra.mxu1 %v6816_v61  ;;  %2991 = vmatprep.subr.bf16.mxu0 %v6817_v12  ;;  %v6868_v61 = vld [vmem:[#allocation62_spill] sm:$0xff]  ;;  %v6869_v12 = vld [vmem:[#allocation64_spill] sm:$0xff] }
 0x2b9   : > { %3119 = vmatprep.subr.bf16.mxu1 %v6818_v54  ;;  %v6870_v54 = vpack.c.bf16 %v6868_v61, %v6869_v12  ;;  %v2265_v2 = vld [vmem:[#allocation2 + $0x20] sm:$0xff]  ;;  %v2266_v56 = vld [vmem:[#allocation2 + $0x28] sm:$0xff] }
 0x2bf   : > { %2993 = vmatpush1.bf16.xpose.msra.mxu0 %v6821_v18  ;;  %v6876_v18 = vpack.c.bf16 %v6874_v39, %v6875_v44 }
 0x2c0   : > { %3121 = vmatpush1.bf16.xpose.msra.mxu1 %v6824_v5  ;;  %2995 = vmatprep.subr.bf16.mxu0 %v6827_v26  ;;  %v6879_v5 = vpack.c.bf16 %v6877_v52, %v6878_v31  ;;  %v2275_v26 = vld [vmem:[%s3922_s11 + $0x30] sm:$0xff]  ;;  %s6880_s11 = sld [smem:[#allocation23_spill]] }
 0x2c1   : > { %3123 = vmatprep.subr.bf16.mxu1 %v6829_v62  ;;  %v2263_v62 = vld [vmem:[#allocation2 + $0x10] sm:$0xff] }
 0x2c6   : > { %p2889_p10 = scmp.ne.s32.totalorder %s6880_s11, 1 }
 0x2c7   : > { %2997 = vmatpush1.bf16.xpose.msra.mxu0 %v6832_v45  ;;  %v2267_v45 = vld [vmem:[#allocation2 + $0x30] sm:$0xff]  ;;  %v2605_v38 = vld [vmem:[#allocation11] sm:$0xf] (!%p2889_p10)  ;;  %v2606_v27 = vld [vmem:[#allocation12] sm:$0xf] (!%p2889_p10) }
 0x2c8   : > { %3125 = vmatpush1.bf16.xpose.msra.mxu1 %v6834_v0  ;;  %2999 = vmatprep.subr.bf16.mxu0 %v6837_v49  ;;  %v2268_v0 = vld [vmem:[#allocation2 + $0x38] sm:$0xff] }
 0x2c9   : > { %3127 = vmatprep.subr.bf16.mxu1 %v6838_v14 }
 0x2cf   : > { %3001 = vmatpush1.bf16.xpose.msra.mxu0 %v6839_v8 }
 0x2d0   : > { %3129 = vmatpush1.bf16.xpose.msra.mxu1 %v6840_v55  ;;  %3003 = vmatprep.subr.bf16.mxu0 %v6842_v28 }
 0x2d1   : > { %3131 = vmatprep.subr.bf16.mxu1 %v6845_v40  ;;  %v2607_v40 = vld [vmem:[#allocation14] sm:$0xf] (!%p2889_p10) }
 0x2d2   : > { %v2608_v13 = vmul.f32 (!%p2889_p10), %v2607_v40, %v2606_v27 }
 0x2d4   : > { %v2609_v6 = vadd.f32 (!%p2889_p10), %v2608_v13, %v2605_v38 }
 0x2d7   : > { %3005 = vmatpush1.bf16.xpose.msra.mxu0 %v6848_v58 }
 0x2d8   : > { %3133 = vmatpush1.bf16.xpose.msra.mxu1 %v6850_v41  ;;  %3007 = vmatprep.subr.bf16.mxu0 %v6853_v48  ;;  %v6881_v48 = vld [vmem:[#allocation28_spill] sm:$0xff] (!%p2889_p10) }
 0x2d9   : > { %3135 = vmatprep.subr.bf16.mxu1 %v6855_v20  ;;  %v6882_v37 = vsub.s32 (!%p2889_p10), 0, %v6881_v48  ;;  %v6883_v36 = vsub.s32 (!%p2889_p10), 1, %v6881_v48  ;;  %v6885_v7 = vsub.s32 (!%p2889_p10), 3, %v6881_v48 }
 0x2db   : > { %v2622_v20 = vrot.slane (!%p2889_p10), %v2609_v6, %v6882_v37  ;;  %v2626_v42 = vrot.slane (!%p2889_p10), %v2609_v6, %v6883_v36 }
 0x2df   : > { %3009 = vmatpush1.bf16.xpose.msra.mxu0 %v6858_v16  ;;  %v6884_v16 = vsub.s32 (!%p2889_p10), 2, %v6881_v48 }
 0x2e0   : > { %3137 = vmatpush1.bf16.xpose.msra.mxu1 %v6859_v22  ;;  %3011 = vmatprep.subr.bf16.mxu0 %v6861_v29  ;;  %v2634_v29 = vrot.slane (!%p2889_p10), %v2609_v6, %v6885_v7 }
 0x2e1   : > { %3139 = vmatprep.subr.bf16.mxu1 %v6864_v59  ;;  %v2630_v22 = vrot.slane (!%p2889_p10), %v2609_v6, %v6884_v16 }
 0x2e7   : > { %3013 = vmatpush1.bf16.xpose.msra.mxu0 %v6867_v21 }
 0x2e8   : > { %3141 = vmatpush1.bf16.xpose.msra.mxu1 %v6870_v54  ;;  %3015 = vmatprep.subr.bf16.mxu0 %v6873_v25 }
 0x2e9   : > { %3143 = vmatprep.subr.bf16.mxu1 %v6876_v18 }
 0x2ef   : > { %3017 = vmatpush1.bf16.xpose.msra.mxu0 %v6879_v5 }
 0x2f0   : > { %3145 = vmatpush1.bf16.xpose.msra.mxu1 %v3144_v24  ;;  %3019 = vmatprep.subr.bf16.mxu0 %v3018_v15  ;;  %v2262_v24 = vld [vmem:[#allocation2 + $0x8] sm:$0xff]  ;;  %v2264_v15 = vld [vmem:[#allocation2 + $0x18] sm:$0xff] }
 0x2f1   : > { %3147 = vmatprep.subr.bf16.mxu1 %v3146_v10 }
 0x2f7   : > { %3021 = vmatpush1.bf16.xpose.msra.mxu0 %v3020_v23 }
 0x2f8   : > { %3149 = vmatpush1.bf16.xpose.msra.mxu1 %v3148_v57  ;;  %3023 = vmatprep.subr.bf16.mxu0 %v3022_v50 }
 0x2f9   : > { %3151 = vmatprep.subr.bf16.mxu1 %v3150_v4 }
 0x2ff   : > { %3025 = vmatpush1.bf16.xpose.msra.mxu0 %v3024_v53 }
 0x300   : > { %3153 = vmatpush1.bf16.xpose.msra.mxu1 %v3152_v47 }
 0x306   : > { %2419 = vmatmul.mubr.f32.vlgmr.msra.gmra.mrb[0].mxu0 %v2271_v3 }
 0x307   : > { %2573 = vmatmul.mubr.f32.vlgmr.msra.gmra.mrb[0].mxu1 %v2271_v3  ;;  %2424 = vmatprep.mubr.f32.mxu0 %v2276_v63 }
 0x308   : > { %2578 = vmatprep.mubr.f32.mxu1 %v2276_v63 }
 0x30a   : > { %2425 = vmatmul.mubr.f32.gmra.mrb[2].mxu0 %v2275_v26 }
 0x30b   : > { %2579 = vmatmul.mubr.f32.gmra.mrb[2].mxu1 %v2275_v26 }
 0x3d9   : > { %v2420_v10 = vpop.f32.mrb[0].mxu0 }
 0x3da   : > { %v2574_v23 = vpop.f32.mrb[0].mxu1  ;;  %v2585_v57 = vadd.f32 %v2420_v10, %v2261_v35  ;;  %v2422_v4 = vpop.f32.mrb[1].mxu0 }
 0x3db   : > { %v2587_v50 = vadd.f32 %v2574_v23, %v2263_v62  ;;  %v2576_v53 = vpop.f32.mrb[1].mxu1  ;;  %v2586_v47 = vadd.f32 %v2422_v4, %v2262_v24 }
 0x3dc   : > { %v2588_v60 = vadd.f32 %v2576_v53, %v2264_v15  ;;  %2593 = vst [vmem:[#allocation2] sm:$0xff] %v2585_v57  ;;  %2604 = sbr.rel (%p2889_p10) target bundleno = 1005 (0x3ed), region = 88 }
 0x3dd   : > { %2595 = vst [vmem:[#allocation2 + $0x10] sm:$0xff] %v2587_v50  ;;  %2594 = vst [vmem:[#allocation2 + $0x8] sm:$0xff] %v2586_v47  ;;  %v2426_v51 = vpop.f32.mrb[2].mxu0 }
 0x3de   : > { %2596 = vst [vmem:[#allocation2 + $0x18] sm:$0xff] %v2588_v60  ;;  %v2580_v34 = vpop.f32.mrb[2].mxu1  ;;  %v2589_v49 = vadd.f32 %v2426_v51, %v2265_v2  ;;  %v2428_v8 = vpop.f32.mrb[3].mxu0 }
 0x3df   : > { %v2591_v14 = vadd.f32 %v2580_v34, %v2267_v45  ;;  %v2582_v55 = vpop.f32.mrb[3].mxu1  ;;  %v2590_v11 = vadd.f32 %v2428_v8, %v2266_v56 }
 0x3e0   : > { %v2592_v28 = vadd.f32 %v2582_v55, %v2268_v0  ;;  %2597 = vst [vmem:[#allocation2 + $0x20] sm:$0xff] %v2589_v49 }
 0x3e1   : > { %2599 = vst [vmem:[#allocation2 + $0x30] sm:$0xff] %v2591_v14  ;;  %2598 = vst [vmem:[#allocation2 + $0x28] sm:$0xff] %v2590_v11 }
 0x3e2   : > { %2600 = vst [vmem:[#allocation2 + $0x38] sm:$0xff] %v2592_v28 }
 0x3e3   : > { %v2610_v58 = vld [vmem:[#allocation2] sm:$0xff] }
 0x3e4   : > { %v2611_v9 = vld [vmem:[#allocation2 + $0x8] sm:$0xff]  ;;  %v2612_v41 = vld [vmem:[#allocation2 + $0x10] sm:$0xff]  ;;  %v2639_v19 = vadd.f32 %v2622_v20, %v2610_v58 }
 0x3e5   : > { %v2613_v43 = vld [vmem:[#allocation2 + $0x18] sm:$0xff]  ;;  %v2640_v30 = vadd.f32 %v2626_v42, %v2611_v9  ;;  %v2641_v21 = vadd.f32 %v2630_v22, %v2612_v41 }
 0x3e6   : > { %v2642_v61 = vadd.f32 %v2634_v29, %v2613_v43  ;;  %2647 = vst [vmem:[#allocation15] sm:$0xff] %v2639_v19 }
 0x3e7   : > { %v2614_v1 = vld [vmem:[#allocation2 + $0x20] sm:$0xff]  ;;  %2648 = vst [vmem:[#allocation15 + $0x8] sm:$0xff] %v2640_v30  ;;  %2649 = vst [vmem:[#allocation15 + $0x10] sm:$0xff] %v2641_v21 }
 0x3e8   : > { %v2615_v32 = vld [vmem:[#allocation2 + $0x28] sm:$0xff]  ;;  %v2616_v17 = vld [vmem:[#allocation2 + $0x30] sm:$0xff]  ;;  %v2643_v12 = vadd.f32 %v2622_v20, %v2614_v1  ;;  %2650 = vst [vmem:[#allocation15 + $0x18] sm:$0xff] %v2642_v61 }
 0x3e9   : > { %v2617_v59 = vld [vmem:[#allocation2 + $0x38] sm:$0xff]  ;;  %v2644_v54 = vadd.f32 %v2626_v42, %v2615_v32  ;;  %v2645_v33 = vadd.f32 %v2630_v22, %v2616_v17 }
 0x3ea   : > { %v2646_v46 = vadd.f32 %v2634_v29, %v2617_v59  ;;  %2651 = vst [vmem:[#allocation15 + $0x20] sm:$0xff] %v2643_v12 }
 0x3eb   : > { %2652 = vst [vmem:[#allocation15 + $0x28] sm:$0xff] %v2644_v54  ;;  %2653 = vst [vmem:[#allocation15 + $0x30] sm:$0xff] %v2645_v33 }
 0x3ec   : > { %2654 = vst [vmem:[#allocation15 + $0x38] sm:$0xff] %v2646_v46 }
 0x3ed PF: > { %s6886_s6 = sld [smem:[#allocation24_spill]]  ;;  %s3593_s5 = smov [#allocation15]  }
 0x3ee   : > { %s2667_s29 = sshll.u32 %s3593_s5, 4  ;;  %s2668_s29 = int_to_ptr.vmem [resolvable:$true] %s2667_s29 }
 0x3ef   : > { %s3483_s23 = scalar_lea.vmem %s2668_s29, 1024  ;;  %p3490_p5 = scmp.lt.s32.totalorder %s2668_s29, %s2668_s29 }
 0x3f0   : > { %p3484_p8 = scmp.ne.s32.totalorder %s2668_s29, %s3483_s23  ;;  %p3491_p11 = scmp.lt.s32.totalorder %s3483_s23, %s3483_s23 }
 0x3f2   : > { %p3492_p4 = por %p3491_p11, %p3490_p5 }
 0x3f3   : > { %p3216_p6 = scmp.eq.s32.totalorder %s6886_s6, 1 }
 0x3f5   : > { %p3485_p3 = pnand %p3484_p8, %p3216_p6 }
 0x3f7   : > { %p3486_p1 = pneg %p3485_p3 }
 0x3f9   : > { %p3493_p13 = pnand %p3492_p4, %p3486_p1 }
 0x3fb   : > { %3496 = shalt.err (!%p3493_p13)
}
 0x3fc   : > { %s6887_s26 = sld [smem:[#allocation136_spill]] }
 0x402   : > { %s3497_s18 = scalar_lea.hbm %s6887_s26, 1024 }
 0x403   : > { %p3498_p2 = scmp.ne.s32.totalorder %s6887_s26, %s3497_s18  ;;  %p3503_p7 = scmp.lt.u32.totalorder %s3497_s18, %s6887_s26 }
 0x405   : > { %p3499_p12 = pnand %p3498_p2, %p3216_p6 }
 0x407   : > { %p3500_p0 = pneg %p3499_p12 }
 0x409   : > { %p3505_p9 = pnand %p3503_p7, %p3500_p0 }
 0x40b   : > { %3508 = shalt.err (!%p3505_p9)
}
 0x40c   : > { %s3594_s30 = smov 512   ;;  %s3595_s3 = smov 32  }
 0x40d   : > { %3183 = dma.vmem_to_hbm [thread:$0]  (%p3216_p6), %s2668_s29, 1024, %s6887_s26, [#allocation5], %s3594_s30, %s3594_s30, %s3595_s3  }
 0x40e   : > { %3554 = dma.done.wait (%p3216_p6), [#allocation5], 1024  }
 0x40f   : > { %3556 = vsyncadd (%p3216_p6), [#allocation5], 4294966272 }
 0x410 PF: > { %s29_s10 = sadd.s32 1, %s3579_s10   ;;  %s6888_s16 = sld [smem:[#allocation22_spill]] }
 0x411   : > { %p26_p10 = scmp.ge.s32.totalorder %s29_s10, 4   ;;  %s6889_s29 = sld [smem:[#allocation27_spill]] }
 0x412   : > { %s6890_s21 = sld [smem:[#allocation26_spill]]  ;;  %s6891_s27 = smov %s3563_s28 }
 0x413   : > { %s6893_s30 = smov %s3575_s9  ;;  %28 = sbr.rel (!%p26_p10) target bundleno = 16 (0x10), region = 153 }
 0x416   : > { %s6892_s28 = smov %s6888_s16 }
 0x418   : > { %s6894_s9 = smov %s6890_s21 }
 0x41a   :  { %2683 = vsyncpa [#allocation4], 1 }
 0x41b   :  { %2685 = vsyncpa [#allocation4 + $0x1], 1 }
 0x41c   :  { %2686 = vsyncpa [#allocation7], 1 }
 0x41d   :  { %2688 = vsyncpa [#allocation7 + $0x1], 1 }
 0x41e   :  { %2689 = vsyncpa [#allocation10], 1 }
 0x41f   :  { %2691 = vsyncpa [#allocation10 + $0x1], 1 }
 0x420   :  { %2692 = vsyncpa [#allocation13], 1 }
 0x421   :  { %2693 = vsyncpa [#allocation5], 1 }
 0x422   :  { %2695 = vsyncpa [#allocation5 + $0x1], 1 }

</bundles_post_ra>
